<compile_context>
chip_gen: v5e
topology: v5e:2x2
jax: 0.10.0
libtpu: 0.0.40
codegen_flags: <defaults>
</compile_context>

<pallas_src>
import math

import numpy as np
import jax
import jax.numpy as jnp
from jax.experimental import pallas as pl
from jax.experimental.pallas import tpu as pltpu

# ------------------------------ configuration ------------------------------
B, T, D = 2, 8, 32          # batch, time, size
BT = B * T
H = 4                       # attention heads
DH = D // H                 # head dim
FF_H = 64                   # macaron feed-forward hidden
CG_U = 64                   # cgMLP linear units (even)
CG_K = 7                    # cgMLP depthwise conv kernel
MERGE_K = 31                # merge_conv_kernel
MERGE_P = (MERGE_K - 1) // 2
N_EXP = 2                   # MoE experts
MOE_H = 64                  # MoE expert hidden
EPS = 1e-5                  # LayerNorm eps (PyTorch default)
LANES = 128                 # lane width
WPL = 192                   # weight-pack lane width (widest fused block)
CG_OFF_IN_BR = 128          # lane offset of the cgMLP part inside br_w (vreg aligned)

assert LANES % D == 0 and (BT * D) % LANES == 0
ROWS_OUT = BT * D // LANES  # 4   lane-dense output rows
GROUP = LANES // D          # 4   tokens per output row

# original (torch-equivalent) parameter set
PARAM_SHAPES = [
    ("ln_mac_g", (1, D)), ("ln_mac_b", (1, D)),
    ("mac_w1", (D, FF_H)), ("mac_b1", (1, FF_H)),
    ("mac_w2", (FF_H, D)), ("mac_b2", (1, D)),
    ("ln_mha_g", (1, D)), ("ln_mha_b", (1, D)),
    ("wq", (D, D)), ("bq", (1, D)),
    ("wk", (D, D)), ("bk", (1, D)),
    ("wv", (D, D)), ("bv", (1, D)),
    ("wo", (D, D)), ("bo", (1, D)),
    ("ln_mlp_g", (1, D)), ("ln_mlp_b", (1, D)),
    ("cg_w1", (D, CG_U)), ("cg_b1", (1, CG_U)),
    ("cg_ln_g", (1, CG_U // 2)), ("cg_ln_b", (1, CG_U // 2)),
    ("cg_cw", (CG_K, CG_U // 2)), ("cg_cb", (1, CG_U // 2)),
    ("cg_w2", (CG_U // 2, D)), ("cg_b2", (1, D)),
    ("fus_w", (MERGE_K, 2 * D)), ("fus_b", (1, 2 * D)),
    ("mrg_w", (2 * D, D)), ("mrg_b", (1, D)),
    ("ln_ff_g", (1, D)), ("ln_ff_b", (1, D)),
    ("moe_wr", (D, N_EXP)), ("moe_br", (1, N_EXP)),
    ("moe_w1", (N_EXP, D, MOE_H)), ("moe_b1", (N_EXP, 1, MOE_H)),
    ("moe_w2", (N_EXP, MOE_H, D)), ("moe_b2", (N_EXP, 1, D)),
    ("ln_fin_g", (1, D)), ("ln_fin_b", (1, D)),
]


def _round8(n):
    return ((n + 7) // 8) * 8


# --------------------- packed-parameter layout (static) ---------------------
# vector pack (f32, 128 lanes): one row per bias / LN-affine still needed after
# folding.  LN gammas/betas of macaron / mha / mlp / moe-ff are folded away.
V_ROWS = [
    ("mac_b1f", FF_H), ("mac_b2", D), ("bqkv_f", 3 * D), ("cg_b1f", CG_U),
    ("cg_ln_g", CG_U // 2), ("cg_ln_b", CG_U // 2), ("cg_cb", CG_U // 2),
    ("xc_b", 2 * D), ("fus_b", 2 * D), ("mrg_b", D),
    ("moe_b1s_f", N_EXP * MOE_H), ("moe_br_f", N_EXP),
    ("ln_fin_g", D), ("ln_fin_b", D),
]
V_IDX = {name: i for i, (name, _) in enumerate(V_ROWS)}
V_WIDTH = {name: w for name, w in V_ROWS}
V_NROWS = _round8(len(V_ROWS))

# weight pack (bf16, 192 lanes): fused / folded GEMM + conv blocks, 8-aligned rows
W_BLOCKS = [
    ("mac_w1f", D, FF_H),                       # macaron 1st layer, ln_mac folded
    ("mac_w2", FF_H, D),
    ("br_w", D, WPL),                           # [qkv folded | pad | cg_w1 folded]
    ("out_bd", 2 * D, 2 * D),                   # block-diag [wo ; cg_w2]
    ("cg_cw", CG_K, CG_U // 2),
    ("fus_w", MERGE_K, 2 * D),
    ("mrg_w", 2 * D, D),
    ("moe_in", D, N_EXP * MOE_H + N_EXP),       # [expert W1 stack | router], ln_ff folded
    ("probs_w", N_EXP, N_EXP * MOE_H + D),      # [0/1 selector | expert b2 rows]
    ("moe_w2s", N_EXP * MOE_H, D),              # expert W2 stack (rows)
    ("outperm", BT, BT),                        # row permutation for lane-dense output
]
W_OFF = {}
_off = 0
for _n, _r, _c in W_BLOCKS:
    W_OFF[_n] = (_off, _r, _c)
    _off += _round8(_r)
W_NROWS = _off                                   # 480 (already 8-aligned)

# advisory cost estimate (lets XLA schedule the wrapper glue around the call)
_FLOPS = (2 * BT * D * FF_H + 2 * BT * FF_H * D + 2 * BT * D * WPL
          + 2 * 2 * (H * B) * T * T * DH + 2 * BT * (2 * D) * (2 * D)
          + 2 * BT * (CG_U // 2) * CG_K + 2 * BT * (2 * D) * MERGE_K
          + 2 * BT * (2 * D) * D + 2 * BT * D * (N_EXP * MOE_H + N_EXP)
          + 2 * BT * N_EXP * (N_EXP * MOE_H + D) + 2 * BT * (N_EXP * MOE_H) * D
          + 2 * BT * BT * D)
_TRANS = (H * B) * T * T + BT * N_EXP + BT * CG_U + 8 * BT
_BYTES = (W_NROWS * WPL * 2 + V_NROWS * LANES * 4 + BT * D * 4 * 2
          + B * T * 4 + LANES * 4)


# ------------------------------ kernel helpers ------------------------------
def _normalize(x):
    mu = jnp.mean(x, axis=-1, keepdims=True)
    xc = x - mu
    var = jnp.mean(xc * xc, axis=-1, keepdims=True)
    return xc * jax.lax.rsqrt(var + EPS)


def _layernorm(x, g, b):
    return _normalize(x) * g + b


def _dwconv_time(x, w, b, ksize, pad, rmod):
    """Depthwise conv over time on a flat (B*T, C) slab.

    Equivalent to torch.nn.Conv1d(C, C, ksize, padding=pad, groups=C) applied
    independently per batch item (zero padding outside each item's T frames).
    Shifts are XLU sublane rolls of the flat slab; rows whose source frame
    falls outside the current batch item are masked.  Taps whose window lies
    entirely in the zero pad (|d| >= T) are skipped statically.
    """
    n = x.shape[0]
    eff = min(pad, T - 1)
    w_rows = [w[k:k + 1, :] for k in range(ksize)]       # hoisted per-tap rows
    y = x * w_rows[pad]                                  # centre tap: no roll/mask
    for d in range(-eff, eff + 1):
        if d == 0:
            continue
        rolled = pltpu.roll(x, (-d) % n, 0)              # rolled[r] = x[(r + d) % n]
        valid = jnp.logical_and(rmod + d >= 0, rmod + d < T)
        y = y + jnp.where(valid, rolled, 0.0) * w_rows[pad + d]
    return y + b


# --------------------------------- kernel -----------------------------------
def moe_ebranchformer_kernel(mask_ref, x_ref, vp_ref, wp_ref, out_ref, psum_ref):
    def vrow(name):                                      # bias / LN row straight from ref
        i, w = V_IDX[name], V_WIDTH[name]
        return vp_ref[i:i + 1, 0:w]

    def wblk(name):                                      # bf16 weight block straight from ref
        o, r, c = W_OFF[name]
        return wp_ref[o:o + r, 0:c]

    xf = x_ref[...]                                      # (BT, D) f32
    mask_f = mask_ref[...]                               # (B, T)  f32; 1 = valid key

    # hoisted per-row time index (row % T), T is a power of two
    r_iota = jax.lax.broadcasted_iota(jnp.int32, (BT, 1), 0)
    rmod = jnp.bitwise_and(r_iota, T - 1)

    # ---- macaron feed-forward: x += 0.5 * FF(LN(x))  (LN folded into W1) ----
    hm = _normalize(xf)
    hm = jnp.maximum(
        jnp.dot(hm, wblk("mac_w1f"), preferred_element_type=jnp.float32)
        + vrow("mac_b1f"), 0.0)
    xf = xf + 0.5 * (jnp.dot(hm, wblk("mac_w2"), preferred_element_type=jnp.float32)
                     + vrow("mac_b2"))

    # ---- one shared normalization + fused branch-entry GEMM [qkv | cg] ----
    xhat = _normalize(xf)
    br = jnp.dot(xhat, wblk("br_w"), preferred_element_type=jnp.float32)   # (BT, 192)
    qkv = br[:, 0:3 * D] + vrow("bqkv_f")                                   # (BT, 96)
    gcg = br[:, CG_OFF_IN_BR:CG_OFF_IN_BR + CG_U] + vrow("cg_b1f")          # (BT, 64)

    # ---- branch 1: MHSA with all heads batched along the leading dim ----
    key_bias = jnp.where(mask_f > 0.5, 0.0, -1e9).reshape(B, 1, T)          # hoisted
    key_keep = (mask_f > 0.5).reshape(B, 1, T)                              # hoisted

    def stack_heads(mat):                                # (BT, D) -> (H*B, T, DH)
        return jnp.concatenate(
            [mat[:, hh * DH:(hh + 1) * DH].reshape(B, T, DH) for hh in range(H)],
            axis=0)

    qs = stack_heads(qkv[:, 0:D])
    ks = stack_heads(qkv[:, D:2 * D])
    vs = stack_heads(qkv[:, 2 * D:3 * D])
    bias_x = jnp.concatenate([key_bias] * H, axis=0)     # (H*B, 1, T)
    keep_x = jnp.concatenate([key_keep] * H, axis=0)

    s = jnp.einsum('xqd,xkd->xqk', qs, ks,
                   preferred_element_type=jnp.float32) * (1.0 / math.sqrt(DH)) + bias_x
    m = jnp.max(s, axis=-1, keepdims=True)
    e = jnp.exp(s - m)
    a = e * pl.reciprocal(jnp.sum(e, axis=-1, keepdims=True), approx=True)
    a = jnp.where(keep_x, a, 0.0)
    o = jnp.einsum('xqk,xkd->xqd', a, vs, preferred_element_type=jnp.float32)
    att = jnp.concatenate(
        [o[hh * B:(hh + 1) * B].reshape(BT, DH) for hh in range(H)], axis=-1)  # (BT, D)

    # ---- branch 2: convolutional gating MLP ----
    gcg = jax.nn.gelu(gcg)        # TODO(synk): tanh approx vs torch exact-erf GELU
    xr = gcg[:, 0:CG_U // 2]
    xg = _layernorm(gcg[:, CG_U // 2:CG_U], vrow("cg_ln_g"), vrow("cg_ln_b"))
    xg = _dwconv_time(xg, wblk("cg_cw"), vrow("cg_cb"), CG_K, (CG_K - 1) // 2, rmod)
    gated = xr * xg                                                          # (BT, 32)

    # ---- fused wo / cg_w2 block-diagonal projection -> x_concat = [x1 | x2] ----
    xo_in = jnp.concatenate([att, gated], axis=-1)                           # (BT, 64)
    x_concat = (jnp.dot(xo_in, wblk("out_bd"), preferred_element_type=jnp.float32)
                + vrow("xc_b"))                                              # (BT, 64)

    # ---- merge: depthwise fusion conv, merge projection, residual ----
    x_tmp = _dwconv_time(x_concat, wblk("fus_w"), vrow("fus_b"), MERGE_K, MERGE_P, rmod)
    xf = xf + (jnp.dot(x_concat + x_tmp, wblk("mrg_w"),
                       preferred_element_type=jnp.float32) + vrow("mrg_b"))

    # ---- MoE feed-forward (ln_ff folded into router + expert first layers) ----
    xhat2 = _normalize(xf)
    mo = jnp.dot(xhat2, wblk("moe_in"), preferred_element_type=jnp.float32)  # (BT, 130)
    h1 = jnp.maximum(mo[:, 0:N_EXP * MOE_H] + vrow("moe_b1s_f"), 0.0)        # (BT, 128)
    logits = mo[:, N_EXP * MOE_H:N_EXP * MOE_H + N_EXP] + vrow("moe_br_f")   # (BT, 2)
    lmax = jnp.max(logits, axis=-1, keepdims=True)
    le = jnp.exp(logits - lmax)
    probs = le / jnp.sum(le, axis=-1, keepdims=True)     # exact (feeds aux loss)
    pw = jnp.dot(probs, wblk("probs_w"), preferred_element_type=jnp.float32)  # (BT, 160)
    moe = (jnp.dot(h1 * pw[:, 0:N_EXP * MOE_H], wblk("moe_w2s"),
                   preferred_element_type=jnp.float32)
           + pw[:, N_EXP * MOE_H:N_EXP * MOE_H + D])
    xf = xf + 0.5 * moe

    # ---- final LayerNorm ----
    xf = _layernorm(xf, vrow("ln_fin_g"), vrow("ln_fin_b"))

    # ---- lane-dense output: permute rows (MXU) then regroup GROUP rows/lane row ----
    xp = jnp.dot(wblk("outperm"), xf, preferred_element_type=jnp.float32)    # (BT, D)
    out_ref[...] = jnp.concatenate(
        [xp[j * ROWS_OUT:(j + 1) * ROWS_OUT, :] for j in range(GROUP)],
        axis=-1).astype(out_ref.dtype)                                       # (4, 128)

    # router mass over all tokens, one lane-dense row
    # TODO(synk): includes masked/padded frames (matches previous realisation)
    psum = jnp.sum(probs, axis=0, keepdims=True)                             # (1, 2)
    psum_ref[...] = jnp.concatenate(
        [psum, jnp.zeros((1, LANES - N_EXP), jnp.float32)], axis=-1)


# -------------------------------- packing -----------------------------------
def init_params(key):
    params = {}
    keys = jax.random.split(key, len(PARAM_SHAPES))
    for (name, shape), kk in zip(PARAM_SHAPES, keys):
        if name.endswith("_g"):                                # LayerNorm gamma -> 1
            params[name] = jnp.ones(shape, jnp.float32)
        elif name.startswith("ln_") or name.endswith("ln_b"):  # LayerNorm beta -> 0
            params[name] = jnp.zeros(shape, jnp.float32)
        else:                                                  # weights / biases
            params[name] = 0.05 * jax.random.normal(kk, shape, jnp.float32)
    return params


def pack_params(params):
    """Fold LN affines into downstream weights and pack into two slabs.

    Runs ONCE, outside the jitted layer call (perf review item 1).
    Returns (vec_pack f32 (16,128), weight_pack bf16 (480,192)).
    """
    f32 = jnp.float32
    p = {k: v.astype(f32) for k, v in params.items()}

    wqkv = jnp.concatenate([p["wq"], p["wk"], p["wv"]], axis=1)              # (D, 96)
    bqkv = jnp.concatenate([p["bq"], p["bk"], p["bv"]], axis=1)              # (1, 96)

    # LN folding: LN(x)@W + c = xhat@(diag(g)W) + (b@W + c)
    mac_w1f = p["mac_w1"] * p["ln_mac_g"].reshape(-1, 1)
    mac_b1f = p["mac_b1"] + p["ln_mac_b"] @ p["mac_w1"]
    wqkv_f = wqkv * p["ln_mha_g"].reshape(-1, 1)
    bqkv_f = bqkv + p["ln_mha_b"] @ wqkv
    cg_w1f = p["cg_w1"] * p["ln_mlp_g"].reshape(-1, 1)
    cg_b1f = p["cg_b1"] + p["ln_mlp_b"] @ p["cg_w1"]

    moe_w1s = jnp.concatenate([p["moe_w1"][e] for e in range(N_EXP)], axis=1)
    moe_b1s = jnp.concatenate([p["moe_b1"][e] for e in range(N_EXP)], axis=1)
    moe_w1s_f = moe_w1s * p["ln_ff_g"].reshape(-1, 1)
    moe_b1s_f = moe_b1s + p["ln_ff_b"] @ moe_w1s
    moe_wr_f = p["moe_wr"] * p["ln_ff_g"].reshape(-1, 1)
    moe_br_f = p["moe_br"] + p["ln_ff_b"] @ p["moe_wr"]

    # fused / block-structured weights
    br_w = jnp.concatenate(
        [wqkv_f, jnp.zeros((D, CG_OFF_IN_BR - 3 * D), f32), cg_w1f], axis=1)  # (D, 192)
    out_bd = jnp.concatenate(
        [jnp.concatenate([p["wo"], jnp.zeros((D, D), f32)], axis=1),
         jnp.concatenate([jnp.zeros((D, D), f32), p["cg_w2"]], axis=1)], axis=0)
    moe_in = jnp.concatenate([moe_w1s_f, moe_wr_f], axis=1)                   # (D, 130)
    sel = jnp.kron(jnp.eye(N_EXP, dtype=f32), jnp.ones((1, MOE_H), f32))      # (2, 128)
    b2mat = jnp.concatenate([p["moe_b2"][e] for e in range(N_EXP)], axis=0)   # (2, D)
    probs_w = jnp.concatenate([sel, b2mat], axis=1)                           # (2, 160)
    moe_w2s = jnp.concatenate([p["moe_w2"][e] for e in range(N_EXP)], axis=0)

    perm = np.zeros((BT, BT), np.float32)         # out row permutation for lane-dense store
    for inew in range(BT):
        perm[inew, GROUP * (inew % ROWS_OUT) + inew // ROWS_OUT] = 1.0
    outperm = jnp.asarray(perm)

    wvals = {
        "mac_w1f": mac_w1f, "mac_w2": p["mac_w2"], "br_w": br_w, "out_bd": out_bd,
        "cg_cw": p["cg_cw"], "fus_w": p["fus_w"], "mrg_w": p["mrg_w"],
        "moe_in": moe_in, "probs_w": probs_w, "moe_w2s": moe_w2s, "outperm": outperm,
    }
    blocks = []
    for name, r, c in W_BLOCKS:
        wv = wvals[name].astype(f32)
        blocks.append(jnp.pad(wv, ((0, _round8(r) - r), (0, WPL - c))))
    wp = jnp.concatenate(blocks, axis=0).astype(jnp.bfloat16)                 # (480, 192)

    vvals = {
        "mac_b1f": mac_b1f, "mac_b2": p["mac_b2"], "bqkv_f": bqkv_f, "cg_b1f": cg_b1f,
        "cg_ln_g": p["cg_ln_g"], "cg_ln_b": p["cg_ln_b"], "cg_cb": p["cg_cb"],
        "xc_b": jnp.concatenate([p["bo"], p["cg_b2"]], axis=1),
        "fus_b": p["fus_b"], "mrg_b": p["mrg_b"],
        "moe_b1s_f": moe_b1s_f, "moe_br_f": moe_br_f,
        "ln_fin_g": p["ln_fin_g"], "ln_fin_b": p["ln_fin_b"],
    }
    rows = []
    for name, w in V_ROWS:
        v = vvals[name].reshape(1, -1).astype(f32)
        rows.append(jnp.pad(v, ((0, 0), (0, LANES - v.shape[1]))))
    vp = jnp.concatenate(rows, axis=0)
    vp = jnp.pad(vp, ((0, V_NROWS - vp.shape[0]), (0, 0)))                    # (16, 128)
    return vp, wp


# -------------------------------- wrapper -----------------------------------
@jax.jit
def moe_ebranchformer_layer(x, mask, pos_emb, vec_pack, weight_pack):
    """x: (B,T,D) f32, mask: (B,1,T) bool, pos_emb: (1,T,D) f32 (unused).
    vec_pack / weight_pack come from pack_params() (packed once, offline)."""
    del pos_emb  # TODO(synk): relative positional encoding not consumed
    mask_f = mask.reshape(B, T).astype(jnp.float32)
    xf = x.reshape(BT, D).astype(jnp.float32)

    out_flat, psum = pl.pallas_call(
        moe_ebranchformer_kernel,
        out_shape=[jax.ShapeDtypeStruct((ROWS_OUT, LANES), jnp.float32),
                   jax.ShapeDtypeStruct((1, LANES), jnp.float32)],
        cost_estimate=pl.CostEstimate(flops=_FLOPS, transcendentals=_TRANS,
                                      bytes_accessed=_BYTES),
    )(mask_f, xf, vec_pack, weight_pack)

    out = out_flat.reshape(B, T, D)          # lane-dense slab -> (B,T,D), free reshape
    # batch-wide MoE load-balancing auxiliary loss (scalar glue in the wrapper)
    mean_p = psum[0, :N_EXP] / (B * T)
    aux_loss = (N_EXP * jnp.sum(mean_p * mean_p)).reshape((1,))
    return out, mask, aux_loss


# ---------------------------------- main -------------------------------------
if __name__ == "__main__":
    key = jax.random.PRNGKey(0)
    kx, kp = jax.random.split(key)
    x = jax.random.normal(kx, (B, T, D), jnp.float32)
    mask = jnp.ones((B, 1, T), dtype=jnp.bool_)
    pos_emb = jax.random.normal(jax.random.PRNGKey(1), (1, T, D), jnp.float32)

    params = init_params(kp)
    vec_pack, weight_pack = pack_params(params)      # packed ONCE, outside the jit

    out, mask_out, aux_loss = moe_ebranchformer_layer(x, mask, pos_emb,
                                                      vec_pack, weight_pack)
    jax.block_until_ready((out, mask_out, aux_loss))
    assert out.shape == (B, T, D) and mask_out.shape == (B, 1, T) and aux_loss.shape == (1,)
    assert bool(jnp.all(jnp.isfinite(out))) and bool(jnp.isfinite(aux_loss[0]))
    print("KERNEL_OK")
</pallas_src>

<mosaic_0001>
module attributes {stable_mosaic.version = 11 : i64} {
  func.func @moe_ebranchformer_kernel(%arg0: memref<2x8xf32, #tpu.memory_space<vmem>>, %arg1: memref<16x32xf32, #tpu.memory_space<vmem>>, %arg2: memref<16x128xf32, #tpu.memory_space<vmem>>, %arg3: memref<480x192xbf16, #tpu.memory_space<vmem>>, %arg4: memref<4x128xf32, #tpu.memory_space<vmem>>, %arg5: memref<1x128xf32, #tpu.memory_space<vmem>>) attributes {dimension_semantics = [], scalar_prefetch = 0 : i64, scratch_operands = 0 : i64, tpu.core_type = #tpu.core_type<tc>} {
    %c0 = arith.constant 0 : index
    %c0_0 = arith.constant 0 : index
    %0 = vector.load %arg1[%c0, %c0_0] : memref<16x32xf32, #tpu.memory_space<vmem>>, vector<16x32xf32>
    %c0_1 = arith.constant 0 : index
    %c0_2 = arith.constant 0 : index
    %1 = vector.load %arg0[%c0_1, %c0_2] : memref<2x8xf32, #tpu.memory_space<vmem>>, vector<2x8xf32>
    %2 = tpu.iota {dimensions = array<i32: 0>} : vector<16x1xi32>
    %c7_i32 = arith.constant 7 : i32
    %3 = vector.broadcast %c7_i32 : i32 to vector<16x1xi32>
    %4 = arith.andi %2, %3 : vector<16x1xi32>
    %cst = arith.constant dense<0.000000e+00> : vector<16xf32>
    %5 = vector.multi_reduction <add>, %0, %cst [1] : vector<16x32xf32> to vector<16xf32>
    %6 = vector.shape_cast %5 : vector<16xf32> to vector<16x1xf32>
    %cst_3 = arith.constant 3.200000e+01 : f32
    %7 = vector.broadcast %cst_3 : f32 to vector<16x1xf32>
    %8 = arith.divf %6, %7 : vector<16x1xf32>
    %9 = vector.broadcast %8 : vector<16x1xf32> to vector<16x32xf32>
    %10 = arith.subf %0, %9 : vector<16x32xf32>
    %11 = arith.mulf %10, %10 : vector<16x32xf32>
    %cst_4 = arith.constant dense<0.000000e+00> : vector<16xf32>
    %12 = vector.multi_reduction <add>, %11, %cst_4 [1] : vector<16x32xf32> to vector<16xf32>
    %13 = vector.shape_cast %12 : vector<16xf32> to vector<16x1xf32>
    %cst_5 = arith.constant 3.200000e+01 : f32
    %14 = vector.broadcast %cst_5 : f32 to vector<16x1xf32>
    %15 = arith.divf %13, %14 : vector<16x1xf32>
    %cst_6 = arith.constant 9.99999974E-6 : f32
    %16 = vector.broadcast %cst_6 : f32 to vector<16x1xf32>
    %17 = arith.addf %15, %16 : vector<16x1xf32>
    %18 = math.rsqrt %17 : vector<16x1xf32>
    %19 = vector.broadcast %18 : vector<16x1xf32> to vector<16x32xf32>
    %20 = arith.mulf %10, %19 : vector<16x32xf32>
    %c0_7 = arith.constant 0 : index
    %c0_8 = arith.constant 0 : index
    %21 = vector.load %arg3[%c0_7, %c0_8] : memref<480x192xbf16, #tpu.memory_space<vmem>>, vector<32x64xbf16>
    %cst_9 = arith.constant dense<0.000000e+00> : vector<16x64xf32>
    %22 = tpu.matmul %20, %21, %cst_9 {dimension_numbers = #tpu.dot_dimension_numbers<[1], [0], [0], [1], [0, 0, 1, 1], [], []>} : vector<16x32xf32>, vector<32x64xbf16>, vector<16x64xf32> -> vector<16x64xf32>
    %c0_10 = arith.constant 0 : index
    %c0_11 = arith.constant 0 : index
    %23 = vector.load %arg2[%c0_10, %c0_11] : memref<16x128xf32, #tpu.memory_space<vmem>>, vector<1x64xf32>
    %24 = vector.broadcast %23 : vector<1x64xf32> to vector<16x64xf32>
    %25 = arith.addf %22, %24 : vector<16x64xf32>
    %cst_12 = arith.constant 0.000000e+00 : f32
    %26 = vector.broadcast %cst_12 : f32 to vector<16x64xf32>
    %27 = arith.maximumf %25, %26 : vector<16x64xf32>
    %c32 = arith.constant 32 : index
    %c0_13 = arith.constant 0 : index
    %28 = vector.load %arg3[%c32, %c0_13] : memref<480x192xbf16, #tpu.memory_space<vmem>>, vector<64x32xbf16>
    %cst_14 = arith.constant dense<0.000000e+00> : vector<16x32xf32>
    %29 = tpu.matmul %27, %28, %cst_14 {dimension_numbers = #tpu.dot_dimension_numbers<[1], [0], [0], [1], [0, 0, 1, 1], [], []>} : vector<16x64xf32>, vector<64x32xbf16>, vector<16x32xf32> -> vector<16x32xf32>
    %c1 = arith.constant 1 : index
    %c0_15 = arith.constant 0 : index
    %30 = vector.load %arg2[%c1, %c0_15] : memref<16x128xf32, #tpu.memory_space<vmem>>, vector<1x32xf32>
    %31 = vector.broadcast %30 : vector<1x32xf32> to vector<16x32xf32>
    %32 = arith.addf %29, %31 : vector<16x32xf32>
    %cst_16 = arith.constant 5.000000e-01 : f32
    %33 = vector.broadcast %cst_16 : f32 to vector<16x32xf32>
    %34 = arith.mulf %33, %32 : vector<16x32xf32>
    %35 = arith.addf %0, %34 : vector<16x32xf32>
    %cst_17 = arith.constant dense<0.000000e+00> : vector<16xf32>
    %36 = vector.multi_reduction <add>, %35, %cst_17 [1] : vector<16x32xf32> to vector<16xf32>
    %37 = vector.shape_cast %36 : vector<16xf32> to vector<16x1xf32>
    %cst_18 = arith.constant 3.200000e+01 : f32
    %38 = vector.broadcast %cst_18 : f32 to vector<16x1xf32>
    %39 = arith.divf %37, %38 : vector<16x1xf32>
    %40 = vector.broadcast %39 : vector<16x1xf32> to vector<16x32xf32>
    %41 = arith.subf %35, %40 : vector<16x32xf32>
    %42 = arith.mulf %41, %41 : vector<16x32xf32>
    %cst_19 = arith.constant dense<0.000000e+00> : vector<16xf32>
    %43 = vector.multi_reduction <add>, %42, %cst_19 [1] : vector<16x32xf32> to vector<16xf32>
    %44 = vector.shape_cast %43 : vector<16xf32> to vector<16x1xf32>
    %cst_20 = arith.constant 3.200000e+01 : f32
    %45 = vector.broadcast %cst_20 : f32 to vector<16x1xf32>
    %46 = arith.divf %44, %45 : vector<16x1xf32>
    %cst_21 = arith.constant 9.99999974E-6 : f32
    %47 = vector.broadcast %cst_21 : f32 to vector<16x1xf32>
    %48 = arith.addf %46, %47 : vector<16x1xf32>
    %49 = math.rsqrt %48 : vector<16x1xf32>
    %50 = vector.broadcast %49 : vector<16x1xf32> to vector<16x32xf32>
    %51 = arith.mulf %41, %50 : vector<16x32xf32>
    %c96 = arith.constant 96 : index
    %c0_22 = arith.constant 0 : index
    %52 = vector.load %arg3[%c96, %c0_22] : memref<480x192xbf16, #tpu.memory_space<vmem>>, vector<32x192xbf16>
    %cst_23 = arith.constant dense<0.000000e+00> : vector<16x192xf32>
    %53 = tpu.matmul %51, %52, %cst_23 {dimension_numbers = #tpu.dot_dimension_numbers<[1], [0], [0], [1], [0, 0, 1, 1], [], []>} : vector<16x32xf32>, vector<32x192xbf16>, vector<16x192xf32> -> vector<16x192xf32>
    %54 = vector.extract_strided_slice %53 {offsets = [0, 0], sizes = [16, 96], strides = [1, 1]} : vector<16x192xf32> to vector<16x96xf32>
    %c2 = arith.constant 2 : index
    %c0_24 = arith.constant 0 : index
    %55 = vector.load %arg2[%c2, %c0_24] : memref<16x128xf32, #tpu.memory_space<vmem>>, vector<1x96xf32>
    %56 = vector.broadcast %55 : vector<1x96xf32> to vector<16x96xf32>
    %57 = arith.addf %54, %56 : vector<16x96xf32>
    %58 = vector.extract_strided_slice %53 {offsets = [0, 128], sizes = [16, 64], strides = [1, 1]} : vector<16x192xf32> to vector<16x64xf32>
    %c3 = arith.constant 3 : index
    %c0_25 = arith.constant 0 : index
    %59 = vector.load %arg2[%c3, %c0_25] : memref<16x128xf32, #tpu.memory_space<vmem>>, vector<1x64xf32>
    %60 = vector.broadcast %59 : vector<1x64xf32> to vector<16x64xf32>
    %61 = arith.addf %58, %60 : vector<16x64xf32>
    %cst_26 = arith.constant 5.000000e-01 : f32
    %62 = vector.broadcast %cst_26 : f32 to vector<2x8xf32>
    %63 = arith.cmpf ogt, %1, %62 : vector<2x8xf32>
    %cst_27 = arith.constant 0.000000e+00 : f32
    %cst_28 = arith.constant -1.000000e+09 : f32
    %64 = vector.broadcast %cst_27 : f32 to vector<2x8xf32>
    %65 = vector.broadcast %cst_28 : f32 to vector<2x8xf32>
    %66 = arith.select %63, %64, %65 : vector<2x8xi1>, vector<2x8xf32>
    %67 = vector.shape_cast %66 : vector<2x8xf32> to vector<2x1x8xf32>
    %cst_29 = arith.constant 5.000000e-01 : f32
    %68 = vector.broadcast %cst_29 : f32 to vector<2x8xf32>
    %69 = arith.cmpf ogt, %1, %68 : vector<2x8xf32>
    %70 = vector.shape_cast %69 : vector<2x8xi1> to vector<2x1x8xi1>
    %71 = vector.extract_strided_slice %57 {offsets = [0, 0], sizes = [16, 32], strides = [1, 1]} : vector<16x96xf32> to vector<16x32xf32>
    %72 = vector.extract_strided_slice %71 {offsets = [0, 0], sizes = [16, 8], strides = [1, 1]} : vector<16x32xf32> to vector<16x8xf32>
    %73 = vector.shape_cast %72 : vector<16x8xf32> to vector<2x8x8xf32>
    %74 = vector.extract_strided_slice %71 {offsets = [0, 8], sizes = [16, 8], strides = [1, 1]} : vector<16x32xf32> to vector<16x8xf32>
    %75 = vector.shape_cast %74 : vector<16x8xf32> to vector<2x8x8xf32>
    %76 = vector.extract_strided_slice %71 {offsets = [0, 16], sizes = [16, 8], strides = [1, 1]} : vector<16x32xf32> to vector<16x8xf32>
    %77 = vector.shape_cast %76 : vector<16x8xf32> to vector<2x8x8xf32>
    %78 = vector.extract_strided_slice %71 {offsets = [0, 24], sizes = [16, 8], strides = [1, 1]} : vector<16x32xf32> to vector<16x8xf32>
    %79 = vector.shape_cast %78 : vector<16x8xf32> to vector<2x8x8xf32>
    %80 = tpu.concatenate %73, %75, %77, %79 in 0 : vector<2x8x8xf32>, vector<2x8x8xf32>, vector<2x8x8xf32>, vector<2x8x8xf32> -> vector<8x8x8xf32>
    %81 = vector.extract_strided_slice %57 {offsets = [0, 32], sizes = [16, 32], strides = [1, 1]} : vector<16x96xf32> to vector<16x32xf32>
    %82 = vector.extract_strided_slice %81 {offsets = [0, 0], sizes = [16, 8], strides = [1, 1]} : vector<16x32xf32> to vector<16x8xf32>
    %83 = vector.shape_cast %82 : vector<16x8xf32> to vector<2x8x8xf32>
    %84 = vector.extract_strided_slice %81 {offsets = [0, 8], sizes = [16, 8], strides = [1, 1]} : vector<16x32xf32> to vector<16x8xf32>
    %85 = vector.shape_cast %84 : vector<16x8xf32> to vector<2x8x8xf32>
    %86 = vector.extract_strided_slice %81 {offsets = [0, 16], sizes = [16, 8], strides = [1, 1]} : vector<16x32xf32> to vector<16x8xf32>
    %87 = vector.shape_cast %86 : vector<16x8xf32> to vector<2x8x8xf32>
    %88 = vector.extract_strided_slice %81 {offsets = [0, 24], sizes = [16, 8], strides = [1, 1]} : vector<16x32xf32> to vector<16x8xf32>
    %89 = vector.shape_cast %88 : vector<16x8xf32> to vector<2x8x8xf32>
    %90 = tpu.concatenate %83, %85, %87, %89 in 0 : vector<2x8x8xf32>, vector<2x8x8xf32>, vector<2x8x8xf32>, vector<2x8x8xf32> -> vector<8x8x8xf32>
    %91 = vector.extract_strided_slice %57 {offsets = [0, 64], sizes = [16, 32], strides = [1, 1]} : vector<16x96xf32> to vector<16x32xf32>
    %92 = vector.extract_strided_slice %91 {offsets = [0, 0], sizes = [16, 8], strides = [1, 1]} : vector<16x32xf32> to vector<16x8xf32>
    %93 = vector.shape_cast %92 : vector<16x8xf32> to vector<2x8x8xf32>
    %94 = vector.extract_strided_slice %91 {offsets = [0, 8], sizes = [16, 8], strides = [1, 1]} : vector<16x32xf32> to vector<16x8xf32>
    %95 = vector.shape_cast %94 : vector<16x8xf32> to vector<2x8x8xf32>
    %96 = vector.extract_strided_slice %91 {offsets = [0, 16], sizes = [16, 8], strides = [1, 1]} : vector<16x32xf32> to vector<16x8xf32>
    %97 = vector.shape_cast %96 : vector<16x8xf32> to vector<2x8x8xf32>
    %98 = vector.extract_strided_slice %91 {offsets = [0, 24], sizes = [16, 8], strides = [1, 1]} : vector<16x32xf32> to vector<16x8xf32>
    %99 = vector.shape_cast %98 : vector<16x8xf32> to vector<2x8x8xf32>
    %100 = tpu.concatenate %93, %95, %97, %99 in 0 : vector<2x8x8xf32>, vector<2x8x8xf32>, vector<2x8x8xf32>, vector<2x8x8xf32> -> vector<8x8x8xf32>
    %101 = tpu.concatenate %67, %67, %67, %67 in 0 : vector<2x1x8xf32>, vector<2x1x8xf32>, vector<2x1x8xf32>, vector<2x1x8xf32> -> vector<8x1x8xf32>
    %102 = tpu.concatenate %70, %70, %70, %70 in 0 : vector<2x1x8xi1>, vector<2x1x8xi1>, vector<2x1x8xi1>, vector<2x1x8xi1> -> vector<8x1x8xi1>
    "tpu.trace_start"() <{level = 10 : i32, message = "xqd,xkd->xqk"}> : () -> ()
    %cst_30 = arith.constant dense<0.000000e+00> : vector<8x8x8xf32>
    %103 = tpu.matmul %80, %90, %cst_30 {dimension_numbers = #tpu.dot_dimension_numbers<[2], [2], [1], [1], [0, 0, 0, 1, 1, 1], [0], [0]>} : vector<8x8x8xf32>, vector<8x8x8xf32>, vector<8x8x8xf32> -> vector<8x8x8xf32>
    "tpu.trace_stop"() : () -> ()
    %cst_31 = arith.constant 0.353553385 : f32
    %104 = vector.broadcast %cst_31 : f32 to vector<8x8x8xf32>
    %105 = arith.mulf %103, %104 : vector<8x8x8xf32>
    %106 = vector.broadcast %101 : vector<8x1x8xf32> to vector<8x8x8xf32>
    %107 = arith.addf %105, %106 : vector<8x8x8xf32>
    %cst_32 = arith.constant dense<0xFF800000> : vector<8x8xf32>
    %108 = vector.multi_reduction <maximumf>, %107, %cst_32 [2] : vector<8x8x8xf32> to vector<8x8xf32>
    %109 = vector.shape_cast %108 : vector<8x8xf32> to vector<8x8x1xf32>
    %110 = vector.broadcast %109 : vector<8x8x1xf32> to vector<8x8x8xf32>
    %111 = arith.subf %107, %110 : vector<8x8x8xf32>
    %112 = math.exp %111 : vector<8x8x8xf32>
    %cst_33 = arith.constant dense<0.000000e+00> : vector<8x8xf32>
    %113 = vector.multi_reduction <add>, %112, %cst_33 [2] : vector<8x8x8xf32> to vector<8x8xf32>
    %114 = vector.shape_cast %113 : vector<8x8xf32> to vector<8x8x1xf32>
    %115 = tpu.reciprocal %114 {approx = true} : vector<8x8x1xf32> -> vector<8x8x1xf32>
    %116 = vector.broadcast %115 : vector<8x8x1xf32> to vector<8x8x8xf32>
    %117 = arith.mulf %112, %116 : vector<8x8x8xf32>
    %cst_34 = arith.constant 0.000000e+00 : f32
    %118 = vector.shape_cast %102 : vector<8x1x8xi1> to vector<8x1x8xi1>
    %119 = vector.broadcast %118 : vector<8x1x8xi1> to vector<8x8x8xi1>
    %120 = vector.broadcast %cst_34 : f32 to vector<8x8x8xf32>
    %121 = arith.select %119, %117, %120 : vector<8x8x8xi1>, vector<8x8x8xf32>
    "tpu.trace_start"() <{level = 10 : i32, message = "xqk,xkd->xqd"}> : () -> ()
    %cst_35 = arith.constant dense<0.000000e+00> : vector<8x8x8xf32>
    %122 = tpu.matmul %121, %100, %cst_35 {dimension_numbers = #tpu.dot_dimension_numbers<[2], [1], [1], [2], [0, 0, 0, 1, 1, 2], [0], [0]>} : vector<8x8x8xf32>, vector<8x8x8xf32>, vector<8x8x8xf32> -> vector<8x8x8xf32>
    "tpu.trace_stop"() : () -> ()
    %123 = vector.extract_strided_slice %122 {offsets = [0, 0, 0], sizes = [2, 8, 8], strides = [1, 1, 1]} : vector<8x8x8xf32> to vector<2x8x8xf32>
    %124 = vector.shape_cast %123 : vector<2x8x8xf32> to vector<16x8xf32>
    %125 = vector.extract_strided_slice %122 {offsets = [2, 0, 0], sizes = [2, 8, 8], strides = [1, 1, 1]} : vector<8x8x8xf32> to vector<2x8x8xf32>
    %126 = vector.shape_cast %125 : vector<2x8x8xf32> to vector<16x8xf32>
    %127 = vector.extract_strided_slice %122 {offsets = [4, 0, 0], sizes = [2, 8, 8], strides = [1, 1, 1]} : vector<8x8x8xf32> to vector<2x8x8xf32>
    %128 = vector.shape_cast %127 : vector<2x8x8xf32> to vector<16x8xf32>
    %129 = vector.extract_strided_slice %122 {offsets = [6, 0, 0], sizes = [2, 8, 8], strides = [1, 1, 1]} : vector<8x8x8xf32> to vector<2x8x8xf32>
    %130 = vector.shape_cast %129 : vector<2x8x8xf32> to vector<16x8xf32>
    %131 = tpu.concatenate %124, %126, %128, %130 in 1 : vector<16x8xf32>, vector<16x8xf32>, vector<16x8xf32>, vector<16x8xf32> -> vector<16x32xf32>
    %132 = arith.mulf %61, %61 : vector<16x64xf32>
    %133 = arith.mulf %61, %132 : vector<16x64xf32>
    %cst_36 = arith.constant 4.471500e-02 : f32
    %134 = vector.broadcast %cst_36 : f32 to vector<16x64xf32>
    %135 = arith.mulf %134, %133 : vector<16x64xf32>
    %136 = arith.addf %61, %135 : vector<16x64xf32>
    %cst_37 = arith.constant 0.797884583 : f32
    %137 = vector.broadcast %cst_37 : f32 to vector<16x64xf32>
    %138 = arith.mulf %137, %136 : vector<16x64xf32>
    %139 = math.tanh %138 : vector<16x64xf32>
    %cst_38 = arith.constant 1.000000e+00 : f32
    %140 = vector.broadcast %cst_38 : f32 to vector<16x64xf32>
    %141 = arith.addf %140, %139 : vector<16x64xf32>
    %cst_39 = arith.constant 5.000000e-01 : f32
    %142 = vector.broadcast %cst_39 : f32 to vector<16x64xf32>
    %143 = arith.mulf %142, %141 : vector<16x64xf32>
    %144 = arith.mulf %61, %143 : vector<16x64xf32>
    %145 = vector.extract_strided_slice %144 {offsets = [0, 0], sizes = [16, 32], strides = [1, 1]} : vector<16x64xf32> to vector<16x32xf32>
    %146 = vector.extract_strided_slice %144 {offsets = [0, 32], sizes = [16, 32], strides = [1, 1]} : vector<16x64xf32> to vector<16x32xf32>
    %c4 = arith.constant 4 : index
    %c0_40 = arith.constant 0 : index
    %147 = vector.load %arg2[%c4, %c0_40] : memref<16x128xf32, #tpu.memory_space<vmem>>, vector<1x32xf32>
    %c5 = arith.constant 5 : index
    %c0_41 = arith.constant 0 : index
    %148 = vector.load %arg2[%c5, %c0_41] : memref<16x128xf32, #tpu.memory_space<vmem>>, vector<1x32xf32>
    %cst_42 = arith.constant dense<0.000000e+00> : vector<16xf32>
    %149 = vector.multi_reduction <add>, %146, %cst_42 [1] : vector<16x32xf32> to vector<16xf32>
    %150 = vector.shape_cast %149 : vector<16xf32> to vector<16x1xf32>
    %cst_43 = arith.constant 3.200000e+01 : f32
    %151 = vector.broadcast %cst_43 : f32 to vector<16x1xf32>
    %152 = arith.divf %150, %151 : vector<16x1xf32>
    %153 = vector.broadcast %152 : vector<16x1xf32> to vector<16x32xf32>
    %154 = arith.subf %146, %153 : vector<16x32xf32>
    %155 = arith.mulf %154, %154 : vector<16x32xf32>
    %cst_44 = arith.constant dense<0.000000e+00> : vector<16xf32>
    %156 = vector.multi_reduction <add>, %155, %cst_44 [1] : vector<16x32xf32> to vector<16xf32>
    %157 = vector.shape_cast %156 : vector<16xf32> to vector<16x1xf32>
    %cst_45 = arith.constant 3.200000e+01 : f32
    %158 = vector.broadcast %cst_45 : f32 to vector<16x1xf32>
    %159 = arith.divf %157, %158 : vector<16x1xf32>
    %cst_46 = arith.constant 9.99999974E-6 : f32
    %160 = vector.broadcast %cst_46 : f32 to vector<16x1xf32>
    %161 = arith.addf %159, %160 : vector<16x1xf32>
    %162 = math.rsqrt %161 : vector<16x1xf32>
    %163 = vector.broadcast %162 : vector<16x1xf32> to vector<16x32xf32>
    %164 = arith.mulf %154, %163 : vector<16x32xf32>
    %165 = vector.broadcast %147 : vector<1x32xf32> to vector<16x32xf32>
    %166 = arith.mulf %164, %165 : vector<16x32xf32>
    %167 = vector.broadcast %148 : vector<1x32xf32> to vector<16x32xf32>
    %168 = arith.addf %166, %167 : vector<16x32xf32>
    %c192 = arith.constant 192 : index
    %c0_47 = arith.constant 0 : index
    %169 = vector.load %arg3[%c192, %c0_47] : memref<480x192xbf16, #tpu.memory_space<vmem>>, vector<7x32xbf16>
    %c6 = arith.constant 6 : index
    %c0_48 = arith.constant 0 : index
    %170 = vector.load %arg2[%c6, %c0_48] : memref<16x128xf32, #tpu.memory_space<vmem>>, vector<1x32xf32>
    %171 = vector.extract_strided_slice %169 {offsets = [0, 0], sizes = [1, 32], strides = [1, 1]} : vector<7x32xbf16> to vector<1x32xbf16>
    %172 = vector.extract_strided_slice %169 {offsets = [1, 0], sizes = [1, 32], strides = [1, 1]} : vector<7x32xbf16> to vector<1x32xbf16>
    %173 = vector.extract_strided_slice %169 {offsets = [2, 0], sizes = [1, 32], strides = [1, 1]} : vector<7x32xbf16> to vector<1x32xbf16>
    %174 = vector.extract_strided_slice %169 {offsets = [3, 0], sizes = [1, 32], strides = [1, 1]} : vector<7x32xbf16> to vector<1x32xbf16>
    %175 = vector.extract_strided_slice %169 {offsets = [4, 0], sizes = [1, 32], strides = [1, 1]} : vector<7x32xbf16> to vector<1x32xbf16>
    %176 = vector.extract_strided_slice %169 {offsets = [5, 0], sizes = [1, 32], strides = [1, 1]} : vector<7x32xbf16> to vector<1x32xbf16>
    %177 = vector.extract_strided_slice %169 {offsets = [6, 0], sizes = [1, 32], strides = [1, 1]} : vector<7x32xbf16> to vector<1x32xbf16>
    %178 = arith.extf %174 : vector<1x32xbf16> to vector<1x32xf32>
    %179 = vector.broadcast %178 : vector<1x32xf32> to vector<16x32xf32>
    %180 = arith.mulf %168, %179 : vector<16x32xf32>
    %c3_i32 = arith.constant 3 : i32
    %181 = tpu.dynamic_rotate %168 by %c3_i32 dim 0 : vector<16x32xf32>, i32 -> vector<16x32xf32>
    %c-3_i32 = arith.constant -3 : i32
    %182 = vector.broadcast %c-3_i32 : i32 to vector<16x1xi32>
    %183 = arith.addi %4, %182 : vector<16x1xi32>
    %c0_i32 = arith.constant 0 : i32
    %184 = vector.broadcast %c0_i32 : i32 to vector<16x1xi32>
    %185 = arith.cmpi sge, %183, %184 : vector<16x1xi32>
    %c-3_i32_49 = arith.constant -3 : i32
    %186 = vector.broadcast %c-3_i32_49 : i32 to vector<16x1xi32>
    %187 = arith.addi %4, %186 : vector<16x1xi32>
    %c8_i32 = arith.constant 8 : i32
    %188 = vector.broadcast %c8_i32 : i32 to vector<16x1xi32>
    %189 = arith.cmpi slt, %187, %188 : vector<16x1xi32>
    %190 = arith.andi %185, %189 : vector<16x1xi1>
    %cst_50 = arith.constant 0.000000e+00 : f32
    %191 = vector.shape_cast %190 : vector<16x1xi1> to vector<16x1xi1>
    %192 = vector.broadcast %191 : vector<16x1xi1> to vector<16x32xi1>
    %193 = vector.broadcast %cst_50 : f32 to vector<16x32xf32>
    %194 = arith.select %192, %181, %193 : vector<16x32xi1>, vector<16x32xf32>
    %195 = arith.extf %171 : vector<1x32xbf16> to vector<1x32xf32>
    %196 = vector.broadcast %195 : vector<1x32xf32> to vector<16x32xf32>
    %197 = arith.mulf %194, %196 : vector<16x32xf32>
    %198 = arith.addf %180, %197 : vector<16x32xf32>
    %c2_i32 = arith.constant 2 : i32
    %199 = tpu.dynamic_rotate %168 by %c2_i32 dim 0 : vector<16x32xf32>, i32 -> vector<16x32xf32>
    %c-2_i32 = arith.constant -2 : i32
    %200 = vector.broadcast %c-2_i32 : i32 to vector<16x1xi32>
    %201 = arith.addi %4, %200 : vector<16x1xi32>
    %c0_i32_51 = arith.constant 0 : i32
    %202 = vector.broadcast %c0_i32_51 : i32 to vector<16x1xi32>
    %203 = arith.cmpi sge, %201, %202 : vector<16x1xi32>
    %c-2_i32_52 = arith.constant -2 : i32
    %204 = vector.broadcast %c-2_i32_52 : i32 to vector<16x1xi32>
    %205 = arith.addi %4, %204 : vector<16x1xi32>
    %c8_i32_53 = arith.constant 8 : i32
    %206 = vector.broadcast %c8_i32_53 : i32 to vector<16x1xi32>
    %207 = arith.cmpi slt, %205, %206 : vector<16x1xi32>
    %208 = arith.andi %203, %207 : vector<16x1xi1>
    %cst_54 = arith.constant 0.000000e+00 : f32
    %209 = vector.shape_cast %208 : vector<16x1xi1> to vector<16x1xi1>
    %210 = vector.broadcast %209 : vector<16x1xi1> to vector<16x32xi1>
    %211 = vector.broadcast %cst_54 : f32 to vector<16x32xf32>
    %212 = arith.select %210, %199, %211 : vector<16x32xi1>, vector<16x32xf32>
    %213 = arith.extf %172 : vector<1x32xbf16> to vector<1x32xf32>
    %214 = vector.broadcast %213 : vector<1x32xf32> to vector<16x32xf32>
    %215 = arith.mulf %212, %214 : vector<16x32xf32>
    %216 = arith.addf %198, %215 : vector<16x32xf32>
    %c1_i32 = arith.constant 1 : i32
    %217 = tpu.dynamic_rotate %168 by %c1_i32 dim 0 : vector<16x32xf32>, i32 -> vector<16x32xf32>
    %c-1_i32 = arith.constant -1 : i32
    %218 = vector.broadcast %c-1_i32 : i32 to vector<16x1xi32>
    %219 = arith.addi %4, %218 : vector<16x1xi32>
    %c0_i32_55 = arith.constant 0 : i32
    %220 = vector.broadcast %c0_i32_55 : i32 to vector<16x1xi32>
    %221 = arith.cmpi sge, %219, %220 : vector<16x1xi32>
    %c-1_i32_56 = arith.constant -1 : i32
    %222 = vector.broadcast %c-1_i32_56 : i32 to vector<16x1xi32>
    %223 = arith.addi %4, %222 : vector<16x1xi32>
    %c8_i32_57 = arith.constant 8 : i32
    %224 = vector.broadcast %c8_i32_57 : i32 to vector<16x1xi32>
    %225 = arith.cmpi slt, %223, %224 : vector<16x1xi32>
    %226 = arith.andi %221, %225 : vector<16x1xi1>
    %cst_58 = arith.constant 0.000000e+00 : f32
    %227 = vector.shape_cast %226 : vector<16x1xi1> to vector<16x1xi1>
    %228 = vector.broadcast %227 : vector<16x1xi1> to vector<16x32xi1>
    %229 = vector.broadcast %cst_58 : f32 to vector<16x32xf32>
    %230 = arith.select %228, %217, %229 : vector<16x32xi1>, vector<16x32xf32>
    %231 = arith.extf %173 : vector<1x32xbf16> to vector<1x32xf32>
    %232 = vector.broadcast %231 : vector<1x32xf32> to vector<16x32xf32>
    %233 = arith.mulf %230, %232 : vector<16x32xf32>
    %234 = arith.addf %216, %233 : vector<16x32xf32>
    %c15_i32 = arith.constant 15 : i32
    %235 = tpu.dynamic_rotate %168 by %c15_i32 dim 0 : vector<16x32xf32>, i32 -> vector<16x32xf32>
    %c1_i32_59 = arith.constant 1 : i32
    %236 = vector.broadcast %c1_i32_59 : i32 to vector<16x1xi32>
    %237 = arith.addi %4, %236 : vector<16x1xi32>
    %c0_i32_60 = arith.constant 0 : i32
    %238 = vector.broadcast %c0_i32_60 : i32 to vector<16x1xi32>
    %239 = arith.cmpi sge, %237, %238 : vector<16x1xi32>
    %c1_i32_61 = arith.constant 1 : i32
    %240 = vector.broadcast %c1_i32_61 : i32 to vector<16x1xi32>
    %241 = arith.addi %4, %240 : vector<16x1xi32>
    %c8_i32_62 = arith.constant 8 : i32
    %242 = vector.broadcast %c8_i32_62 : i32 to vector<16x1xi32>
    %243 = arith.cmpi slt, %241, %242 : vector<16x1xi32>
    %244 = arith.andi %239, %243 : vector<16x1xi1>
    %cst_63 = arith.constant 0.000000e+00 : f32
    %245 = vector.shape_cast %244 : vector<16x1xi1> to vector<16x1xi1>
    %246 = vector.broadcast %245 : vector<16x1xi1> to vector<16x32xi1>
    %247 = vector.broadcast %cst_63 : f32 to vector<16x32xf32>
    %248 = arith.select %246, %235, %247 : vector<16x32xi1>, vector<16x32xf32>
    %249 = arith.extf %175 : vector<1x32xbf16> to vector<1x32xf32>
    %250 = vector.broadcast %249 : vector<1x32xf32> to vector<16x32xf32>
    %251 = arith.mulf %248, %250 : vector<16x32xf32>
    %252 = arith.addf %234, %251 : vector<16x32xf32>
    %c14_i32 = arith.constant 14 : i32
    %253 = tpu.dynamic_rotate %168 by %c14_i32 dim 0 : vector<16x32xf32>, i32 -> vector<16x32xf32>
    %c2_i32_64 = arith.constant 2 : i32
    %254 = vector.broadcast %c2_i32_64 : i32 to vector<16x1xi32>
    %255 = arith.addi %4, %254 : vector<16x1xi32>
    %c0_i32_65 = arith.constant 0 : i32
    %256 = vector.broadcast %c0_i32_65 : i32 to vector<16x1xi32>
    %257 = arith.cmpi sge, %255, %256 : vector<16x1xi32>
    %c2_i32_66 = arith.constant 2 : i32
    %258 = vector.broadcast %c2_i32_66 : i32 to vector<16x1xi32>
    %259 = arith.addi %4, %258 : vector<16x1xi32>
    %c8_i32_67 = arith.constant 8 : i32
    %260 = vector.broadcast %c8_i32_67 : i32 to vector<16x1xi32>
    %261 = arith.cmpi slt, %259, %260 : vector<16x1xi32>
    %262 = arith.andi %257, %261 : vector<16x1xi1>
    %cst_68 = arith.constant 0.000000e+00 : f32
    %263 = vector.shape_cast %262 : vector<16x1xi1> to vector<16x1xi1>
    %264 = vector.broadcast %263 : vector<16x1xi1> to vector<16x32xi1>
    %265 = vector.broadcast %cst_68 : f32 to vector<16x32xf32>
    %266 = arith.select %264, %253, %265 : vector<16x32xi1>, vector<16x32xf32>
    %267 = arith.extf %176 : vector<1x32xbf16> to vector<1x32xf32>
    %268 = vector.broadcast %267 : vector<1x32xf32> to vector<16x32xf32>
    %269 = arith.mulf %266, %268 : vector<16x32xf32>
    %270 = arith.addf %252, %269 : vector<16x32xf32>
    %c13_i32 = arith.constant 13 : i32
    %271 = tpu.dynamic_rotate %168 by %c13_i32 dim 0 : vector<16x32xf32>, i32 -> vector<16x32xf32>
    %c3_i32_69 = arith.constant 3 : i32
    %272 = vector.broadcast %c3_i32_69 : i32 to vector<16x1xi32>
    %273 = arith.addi %4, %272 : vector<16x1xi32>
    %c0_i32_70 = arith.constant 0 : i32
    %274 = vector.broadcast %c0_i32_70 : i32 to vector<16x1xi32>
    %275 = arith.cmpi sge, %273, %274 : vector<16x1xi32>
    %c3_i32_71 = arith.constant 3 : i32
    %276 = vector.broadcast %c3_i32_71 : i32 to vector<16x1xi32>
    %277 = arith.addi %4, %276 : vector<16x1xi32>
    %c8_i32_72 = arith.constant 8 : i32
    %278 = vector.broadcast %c8_i32_72 : i32 to vector<16x1xi32>
    %279 = arith.cmpi slt, %277, %278 : vector<16x1xi32>
    %280 = arith.andi %275, %279 : vector<16x1xi1>
    %cst_73 = arith.constant 0.000000e+00 : f32
    %281 = vector.shape_cast %280 : vector<16x1xi1> to vector<16x1xi1>
    %282 = vector.broadcast %281 : vector<16x1xi1> to vector<16x32xi1>
    %283 = vector.broadcast %cst_73 : f32 to vector<16x32xf32>
    %284 = arith.select %282, %271, %283 : vector<16x32xi1>, vector<16x32xf32>
    %285 = arith.extf %177 : vector<1x32xbf16> to vector<1x32xf32>
    %286 = vector.broadcast %285 : vector<1x32xf32> to vector<16x32xf32>
    %287 = arith.mulf %284, %286 : vector<16x32xf32>
    %288 = arith.addf %270, %287 : vector<16x32xf32>
    %289 = vector.broadcast %170 : vector<1x32xf32> to vector<16x32xf32>
    %290 = arith.addf %288, %289 : vector<16x32xf32>
    %291 = arith.mulf %145, %290 : vector<16x32xf32>
    %292 = tpu.concatenate %131, %291 in 1 : vector<16x32xf32>, vector<16x32xf32> -> vector<16x64xf32>
    %c128 = arith.constant 128 : index
    %c0_74 = arith.constant 0 : index
    %293 = vector.load %arg3[%c128, %c0_74] : memref<480x192xbf16, #tpu.memory_space<vmem>>, vector<64x64xbf16>
    %cst_75 = arith.constant dense<0.000000e+00> : vector<16x64xf32>
    %294 = tpu.matmul %292, %293, %cst_75 {dimension_numbers = #tpu.dot_dimension_numbers<[1], [0], [0], [1], [0, 0, 1, 1], [], []>} : vector<16x64xf32>, vector<64x64xbf16>, vector<16x64xf32> -> vector<16x64xf32>
    %c7 = arith.constant 7 : index
    %c0_76 = arith.constant 0 : index
    %295 = vector.load %arg2[%c7, %c0_76] : memref<16x128xf32, #tpu.memory_space<vmem>>, vector<1x64xf32>
    %296 = vector.broadcast %295 : vector<1x64xf32> to vector<16x64xf32>
    %297 = arith.addf %294, %296 : vector<16x64xf32>
    %c200 = arith.constant 200 : index
    %c0_77 = arith.constant 0 : index
    %298 = vector.load %arg3[%c200, %c0_77] : memref<480x192xbf16, #tpu.memory_space<vmem>>, vector<31x64xbf16>
    %c8 = arith.constant 8 : index
    %c0_78 = arith.constant 0 : index
    %299 = vector.load %arg2[%c8, %c0_78] : memref<16x128xf32, #tpu.memory_space<vmem>>, vector<1x64xf32>
    %300 = vector.extract_strided_slice %298 {offsets = [8, 0], sizes = [1, 64], strides = [1, 1]} : vector<31x64xbf16> to vector<1x64xbf16>
    %301 = vector.extract_strided_slice %298 {offsets = [9, 0], sizes = [1, 64], strides = [1, 1]} : vector<31x64xbf16> to vector<1x64xbf16>
    %302 = vector.extract_strided_slice %298 {offsets = [10, 0], sizes = [1, 64], strides = [1, 1]} : vector<31x64xbf16> to vector<1x64xbf16>
    %303 = vector.extract_strided_slice %298 {offsets = [11, 0], sizes = [1, 64], strides = [1, 1]} : vector<31x64xbf16> to vector<1x64xbf16>
    %304 = vector.extract_strided_slice %298 {offsets = [12, 0], sizes = [1, 64], strides = [1, 1]} : vector<31x64xbf16> to vector<1x64xbf16>
    %305 = vector.extract_strided_slice %298 {offsets = [13, 0], sizes = [1, 64], strides = [1, 1]} : vector<31x64xbf16> to vector<1x64xbf16>
    %306 = vector.extract_strided_slice %298 {offsets = [14, 0], sizes = [1, 64], strides = [1, 1]} : vector<31x64xbf16> to vector<1x64xbf16>
    %307 = vector.extract_strided_slice %298 {offsets = [15, 0], sizes = [1, 64], strides = [1, 1]} : vector<31x64xbf16> to vector<1x64xbf16>
    %308 = vector.extract_strided_slice %298 {offsets = [16, 0], sizes = [1, 64], strides = [1, 1]} : vector<31x64xbf16> to vector<1x64xbf16>
    %309 = vector.extract_strided_slice %298 {offsets = [17, 0], sizes = [1, 64], strides = [1, 1]} : vector<31x64xbf16> to vector<1x64xbf16>
    %310 = vector.extract_strided_slice %298 {offsets = [18, 0], sizes = [1, 64], strides = [1, 1]} : vector<31x64xbf16> to vector<1x64xbf16>
    %311 = vector.extract_strided_slice %298 {offsets = [19, 0], sizes = [1, 64], strides = [1, 1]} : vector<31x64xbf16> to vector<1x64xbf16>
    %312 = vector.extract_strided_slice %298 {offsets = [20, 0], sizes = [1, 64], strides = [1, 1]} : vector<31x64xbf16> to vector<1x64xbf16>
    %313 = vector.extract_strided_slice %298 {offsets = [21, 0], sizes = [1, 64], strides = [1, 1]} : vector<31x64xbf16> to vector<1x64xbf16>
    %314 = vector.extract_strided_slice %298 {offsets = [22, 0], sizes = [1, 64], strides = [1, 1]} : vector<31x64xbf16> to vector<1x64xbf16>
    %315 = arith.extf %307 : vector<1x64xbf16> to vector<1x64xf32>
    %316 = vector.broadcast %315 : vector<1x64xf32> to vector<16x64xf32>
    %317 = arith.mulf %297, %316 : vector<16x64xf32>
    %c7_i32_79 = arith.constant 7 : i32
    %318 = tpu.dynamic_rotate %297 by %c7_i32_79 dim 0 : vector<16x64xf32>, i32 -> vector<16x64xf32>
    %c-7_i32 = arith.constant -7 : i32
    %319 = vector.broadcast %c-7_i32 : i32 to vector<16x1xi32>
    %320 = arith.addi %4, %319 : vector<16x1xi32>
    %c0_i32_80 = arith.constant 0 : i32
    %321 = vector.broadcast %c0_i32_80 : i32 to vector<16x1xi32>
    %322 = arith.cmpi sge, %320, %321 : vector<16x1xi32>
    %c-7_i32_81 = arith.constant -7 : i32
    %323 = vector.broadcast %c-7_i32_81 : i32 to vector<16x1xi32>
    %324 = arith.addi %4, %323 : vector<16x1xi32>
    %c8_i32_82 = arith.constant 8 : i32
    %325 = vector.broadcast %c8_i32_82 : i32 to vector<16x1xi32>
    %326 = arith.cmpi slt, %324, %325 : vector<16x1xi32>
    %327 = arith.andi %322, %326 : vector<16x1xi1>
    %cst_83 = arith.constant 0.000000e+00 : f32
    %328 = vector.shape_cast %327 : vector<16x1xi1> to vector<16x1xi1>
    %329 = vector.broadcast %328 : vector<16x1xi1> to vector<16x64xi1>
    %330 = vector.broadcast %cst_83 : f32 to vector<16x64xf32>
    %331 = arith.select %329, %318, %330 : vector<16x64xi1>, vector<16x64xf32>
    %332 = arith.extf %300 : vector<1x64xbf16> to vector<1x64xf32>
    %333 = vector.broadcast %332 : vector<1x64xf32> to vector<16x64xf32>
    %334 = arith.mulf %331, %333 : vector<16x64xf32>
    %335 = arith.addf %317, %334 : vector<16x64xf32>
    %c6_i32 = arith.constant 6 : i32
    %336 = tpu.dynamic_rotate %297 by %c6_i32 dim 0 : vector<16x64xf32>, i32 -> vector<16x64xf32>
    %c-6_i32 = arith.constant -6 : i32
    %337 = vector.broadcast %c-6_i32 : i32 to vector<16x1xi32>
    %338 = arith.addi %4, %337 : vector<16x1xi32>
    %c0_i32_84 = arith.constant 0 : i32
    %339 = vector.broadcast %c0_i32_84 : i32 to vector<16x1xi32>
    %340 = arith.cmpi sge, %338, %339 : vector<16x1xi32>
    %c-6_i32_85 = arith.constant -6 : i32
    %341 = vector.broadcast %c-6_i32_85 : i32 to vector<16x1xi32>
    %342 = arith.addi %4, %341 : vector<16x1xi32>
    %c8_i32_86 = arith.constant 8 : i32
    %343 = vector.broadcast %c8_i32_86 : i32 to vector<16x1xi32>
    %344 = arith.cmpi slt, %342, %343 : vector<16x1xi32>
    %345 = arith.andi %340, %344 : vector<16x1xi1>
    %cst_87 = arith.constant 0.000000e+00 : f32
    %346 = vector.shape_cast %345 : vector<16x1xi1> to vector<16x1xi1>
    %347 = vector.broadcast %346 : vector<16x1xi1> to vector<16x64xi1>
    %348 = vector.broadcast %cst_87 : f32 to vector<16x64xf32>
    %349 = arith.select %347, %336, %348 : vector<16x64xi1>, vector<16x64xf32>
    %350 = arith.extf %301 : vector<1x64xbf16> to vector<1x64xf32>
    %351 = vector.broadcast %350 : vector<1x64xf32> to vector<16x64xf32>
    %352 = arith.mulf %349, %351 : vector<16x64xf32>
    %353 = arith.addf %335, %352 : vector<16x64xf32>
    %c5_i32 = arith.constant 5 : i32
    %354 = tpu.dynamic_rotate %297 by %c5_i32 dim 0 : vector<16x64xf32>, i32 -> vector<16x64xf32>
    %c-5_i32 = arith.constant -5 : i32
    %355 = vector.broadcast %c-5_i32 : i32 to vector<16x1xi32>
    %356 = arith.addi %4, %355 : vector<16x1xi32>
    %c0_i32_88 = arith.constant 0 : i32
    %357 = vector.broadcast %c0_i32_88 : i32 to vector<16x1xi32>
    %358 = arith.cmpi sge, %356, %357 : vector<16x1xi32>
    %c-5_i32_89 = arith.constant -5 : i32
    %359 = vector.broadcast %c-5_i32_89 : i32 to vector<16x1xi32>
    %360 = arith.addi %4, %359 : vector<16x1xi32>
    %c8_i32_90 = arith.constant 8 : i32
    %361 = vector.broadcast %c8_i32_90 : i32 to vector<16x1xi32>
    %362 = arith.cmpi slt, %360, %361 : vector<16x1xi32>
    %363 = arith.andi %358, %362 : vector<16x1xi1>
    %cst_91 = arith.constant 0.000000e+00 : f32
    %364 = vector.shape_cast %363 : vector<16x1xi1> to vector<16x1xi1>
    %365 = vector.broadcast %364 : vector<16x1xi1> to vector<16x64xi1>
    %366 = vector.broadcast %cst_91 : f32 to vector<16x64xf32>
    %367 = arith.select %365, %354, %366 : vector<16x64xi1>, vector<16x64xf32>
    %368 = arith.extf %302 : vector<1x64xbf16> to vector<1x64xf32>
    %369 = vector.broadcast %368 : vector<1x64xf32> to vector<16x64xf32>
    %370 = arith.mulf %367, %369 : vector<16x64xf32>
    %371 = arith.addf %353, %370 : vector<16x64xf32>
    %c4_i32 = arith.constant 4 : i32
    %372 = tpu.dynamic_rotate %297 by %c4_i32 dim 0 : vector<16x64xf32>, i32 -> vector<16x64xf32>
    %c-4_i32 = arith.constant -4 : i32
    %373 = vector.broadcast %c-4_i32 : i32 to vector<16x1xi32>
    %374 = arith.addi %4, %373 : vector<16x1xi32>
    %c0_i32_92 = arith.constant 0 : i32
    %375 = vector.broadcast %c0_i32_92 : i32 to vector<16x1xi32>
    %376 = arith.cmpi sge, %374, %375 : vector<16x1xi32>
    %c-4_i32_93 = arith.constant -4 : i32
    %377 = vector.broadcast %c-4_i32_93 : i32 to vector<16x1xi32>
    %378 = arith.addi %4, %377 : vector<16x1xi32>
    %c8_i32_94 = arith.constant 8 : i32
    %379 = vector.broadcast %c8_i32_94 : i32 to vector<16x1xi32>
    %380 = arith.cmpi slt, %378, %379 : vector<16x1xi32>
    %381 = arith.andi %376, %380 : vector<16x1xi1>
    %cst_95 = arith.constant 0.000000e+00 : f32
    %382 = vector.shape_cast %381 : vector<16x1xi1> to vector<16x1xi1>
    %383 = vector.broadcast %382 : vector<16x1xi1> to vector<16x64xi1>
    %384 = vector.broadcast %cst_95 : f32 to vector<16x64xf32>
    %385 = arith.select %383, %372, %384 : vector<16x64xi1>, vector<16x64xf32>
    %386 = arith.extf %303 : vector<1x64xbf16> to vector<1x64xf32>
    %387 = vector.broadcast %386 : vector<1x64xf32> to vector<16x64xf32>
    %388 = arith.mulf %385, %387 : vector<16x64xf32>
    %389 = arith.addf %371, %388 : vector<16x64xf32>
    %c3_i32_96 = arith.constant 3 : i32
    %390 = tpu.dynamic_rotate %297 by %c3_i32_96 dim 0 : vector<16x64xf32>, i32 -> vector<16x64xf32>
    %c-3_i32_97 = arith.constant -3 : i32
    %391 = vector.broadcast %c-3_i32_97 : i32 to vector<16x1xi32>
    %392 = arith.addi %4, %391 : vector<16x1xi32>
    %c0_i32_98 = arith.constant 0 : i32
    %393 = vector.broadcast %c0_i32_98 : i32 to vector<16x1xi32>
    %394 = arith.cmpi sge, %392, %393 : vector<16x1xi32>
    %c-3_i32_99 = arith.constant -3 : i32
    %395 = vector.broadcast %c-3_i32_99 : i32 to vector<16x1xi32>
    %396 = arith.addi %4, %395 : vector<16x1xi32>
    %c8_i32_100 = arith.constant 8 : i32
    %397 = vector.broadcast %c8_i32_100 : i32 to vector<16x1xi32>
    %398 = arith.cmpi slt, %396, %397 : vector<16x1xi32>
    %399 = arith.andi %394, %398 : vector<16x1xi1>
    %cst_101 = arith.constant 0.000000e+00 : f32
    %400 = vector.shape_cast %399 : vector<16x1xi1> to vector<16x1xi1>
    %401 = vector.broadcast %400 : vector<16x1xi1> to vector<16x64xi1>
    %402 = vector.broadcast %cst_101 : f32 to vector<16x64xf32>
    %403 = arith.select %401, %390, %402 : vector<16x64xi1>, vector<16x64xf32>
    %404 = arith.extf %304 : vector<1x64xbf16> to vector<1x64xf32>
    %405 = vector.broadcast %404 : vector<1x64xf32> to vector<16x64xf32>
    %406 = arith.mulf %403, %405 : vector<16x64xf32>
    %407 = arith.addf %389, %406 : vector<16x64xf32>
    %c2_i32_102 = arith.constant 2 : i32
    %408 = tpu.dynamic_rotate %297 by %c2_i32_102 dim 0 : vector<16x64xf32>, i32 -> vector<16x64xf32>
    %c-2_i32_103 = arith.constant -2 : i32
    %409 = vector.broadcast %c-2_i32_103 : i32 to vector<16x1xi32>
    %410 = arith.addi %4, %409 : vector<16x1xi32>
    %c0_i32_104 = arith.constant 0 : i32
    %411 = vector.broadcast %c0_i32_104 : i32 to vector<16x1xi32>
    %412 = arith.cmpi sge, %410, %411 : vector<16x1xi32>
    %c-2_i32_105 = arith.constant -2 : i32
    %413 = vector.broadcast %c-2_i32_105 : i32 to vector<16x1xi32>
    %414 = arith.addi %4, %413 : vector<16x1xi32>
    %c8_i32_106 = arith.constant 8 : i32
    %415 = vector.broadcast %c8_i32_106 : i32 to vector<16x1xi32>
    %416 = arith.cmpi slt, %414, %415 : vector<16x1xi32>
    %417 = arith.andi %412, %416 : vector<16x1xi1>
    %cst_107 = arith.constant 0.000000e+00 : f32
    %418 = vector.shape_cast %417 : vector<16x1xi1> to vector<16x1xi1>
    %419 = vector.broadcast %418 : vector<16x1xi1> to vector<16x64xi1>
    %420 = vector.broadcast %cst_107 : f32 to vector<16x64xf32>
    %421 = arith.select %419, %408, %420 : vector<16x64xi1>, vector<16x64xf32>
    %422 = arith.extf %305 : vector<1x64xbf16> to vector<1x64xf32>
    %423 = vector.broadcast %422 : vector<1x64xf32> to vector<16x64xf32>
    %424 = arith.mulf %421, %423 : vector<16x64xf32>
    %425 = arith.addf %407, %424 : vector<16x64xf32>
    %c1_i32_108 = arith.constant 1 : i32
    %426 = tpu.dynamic_rotate %297 by %c1_i32_108 dim 0 : vector<16x64xf32>, i32 -> vector<16x64xf32>
    %c-1_i32_109 = arith.constant -1 : i32
    %427 = vector.broadcast %c-1_i32_109 : i32 to vector<16x1xi32>
    %428 = arith.addi %4, %427 : vector<16x1xi32>
    %c0_i32_110 = arith.constant 0 : i32
    %429 = vector.broadcast %c0_i32_110 : i32 to vector<16x1xi32>
    %430 = arith.cmpi sge, %428, %429 : vector<16x1xi32>
    %c-1_i32_111 = arith.constant -1 : i32
    %431 = vector.broadcast %c-1_i32_111 : i32 to vector<16x1xi32>
    %432 = arith.addi %4, %431 : vector<16x1xi32>
    %c8_i32_112 = arith.constant 8 : i32
    %433 = vector.broadcast %c8_i32_112 : i32 to vector<16x1xi32>
    %434 = arith.cmpi slt, %432, %433 : vector<16x1xi32>
    %435 = arith.andi %430, %434 : vector<16x1xi1>
    %cst_113 = arith.constant 0.000000e+00 : f32
    %436 = vector.shape_cast %435 : vector<16x1xi1> to vector<16x1xi1>
    %437 = vector.broadcast %436 : vector<16x1xi1> to vector<16x64xi1>
    %438 = vector.broadcast %cst_113 : f32 to vector<16x64xf32>
    %439 = arith.select %437, %426, %438 : vector<16x64xi1>, vector<16x64xf32>
    %440 = arith.extf %306 : vector<1x64xbf16> to vector<1x64xf32>
    %441 = vector.broadcast %440 : vector<1x64xf32> to vector<16x64xf32>
    %442 = arith.mulf %439, %441 : vector<16x64xf32>
    %443 = arith.addf %425, %442 : vector<16x64xf32>
    %c15_i32_114 = arith.constant 15 : i32
    %444 = tpu.dynamic_rotate %297 by %c15_i32_114 dim 0 : vector<16x64xf32>, i32 -> vector<16x64xf32>
    %c1_i32_115 = arith.constant 1 : i32
    %445 = vector.broadcast %c1_i32_115 : i32 to vector<16x1xi32>
    %446 = arith.addi %4, %445 : vector<16x1xi32>
    %c0_i32_116 = arith.constant 0 : i32
    %447 = vector.broadcast %c0_i32_116 : i32 to vector<16x1xi32>
    %448 = arith.cmpi sge, %446, %447 : vector<16x1xi32>
    %c1_i32_117 = arith.constant 1 : i32
    %449 = vector.broadcast %c1_i32_117 : i32 to vector<16x1xi32>
    %450 = arith.addi %4, %449 : vector<16x1xi32>
    %c8_i32_118 = arith.constant 8 : i32
    %451 = vector.broadcast %c8_i32_118 : i32 to vector<16x1xi32>
    %452 = arith.cmpi slt, %450, %451 : vector<16x1xi32>
    %453 = arith.andi %448, %452 : vector<16x1xi1>
    %cst_119 = arith.constant 0.000000e+00 : f32
    %454 = vector.shape_cast %453 : vector<16x1xi1> to vector<16x1xi1>
    %455 = vector.broadcast %454 : vector<16x1xi1> to vector<16x64xi1>
    %456 = vector.broadcast %cst_119 : f32 to vector<16x64xf32>
    %457 = arith.select %455, %444, %456 : vector<16x64xi1>, vector<16x64xf32>
    %458 = arith.extf %308 : vector<1x64xbf16> to vector<1x64xf32>
    %459 = vector.broadcast %458 : vector<1x64xf32> to vector<16x64xf32>
    %460 = arith.mulf %457, %459 : vector<16x64xf32>
    %461 = arith.addf %443, %460 : vector<16x64xf32>
    %c14_i32_120 = arith.constant 14 : i32
    %462 = tpu.dynamic_rotate %297 by %c14_i32_120 dim 0 : vector<16x64xf32>, i32 -> vector<16x64xf32>
    %c2_i32_121 = arith.constant 2 : i32
    %463 = vector.broadcast %c2_i32_121 : i32 to vector<16x1xi32>
    %464 = arith.addi %4, %463 : vector<16x1xi32>
    %c0_i32_122 = arith.constant 0 : i32
    %465 = vector.broadcast %c0_i32_122 : i32 to vector<16x1xi32>
    %466 = arith.cmpi sge, %464, %465 : vector<16x1xi32>
    %c2_i32_123 = arith.constant 2 : i32
    %467 = vector.broadcast %c2_i32_123 : i32 to vector<16x1xi32>
    %468 = arith.addi %4, %467 : vector<16x1xi32>
    %c8_i32_124 = arith.constant 8 : i32
    %469 = vector.broadcast %c8_i32_124 : i32 to vector<16x1xi32>
    %470 = arith.cmpi slt, %468, %469 : vector<16x1xi32>
    %471 = arith.andi %466, %470 : vector<16x1xi1>
    %cst_125 = arith.constant 0.000000e+00 : f32
    %472 = vector.shape_cast %471 : vector<16x1xi1> to vector<16x1xi1>
    %473 = vector.broadcast %472 : vector<16x1xi1> to vector<16x64xi1>
    %474 = vector.broadcast %cst_125 : f32 to vector<16x64xf32>
    %475 = arith.select %473, %462, %474 : vector<16x64xi1>, vector<16x64xf32>
    %476 = arith.extf %309 : vector<1x64xbf16> to vector<1x64xf32>
    %477 = vector.broadcast %476 : vector<1x64xf32> to vector<16x64xf32>
    %478 = arith.mulf %475, %477 : vector<16x64xf32>
    %479 = arith.addf %461, %478 : vector<16x64xf32>
    %c13_i32_126 = arith.constant 13 : i32
    %480 = tpu.dynamic_rotate %297 by %c13_i32_126 dim 0 : vector<16x64xf32>, i32 -> vector<16x64xf32>
    %c3_i32_127 = arith.constant 3 : i32
    %481 = vector.broadcast %c3_i32_127 : i32 to vector<16x1xi32>
    %482 = arith.addi %4, %481 : vector<16x1xi32>
    %c0_i32_128 = arith.constant 0 : i32
    %483 = vector.broadcast %c0_i32_128 : i32 to vector<16x1xi32>
    %484 = arith.cmpi sge, %482, %483 : vector<16x1xi32>
    %c3_i32_129 = arith.constant 3 : i32
    %485 = vector.broadcast %c3_i32_129 : i32 to vector<16x1xi32>
    %486 = arith.addi %4, %485 : vector<16x1xi32>
    %c8_i32_130 = arith.constant 8 : i32
    %487 = vector.broadcast %c8_i32_130 : i32 to vector<16x1xi32>
    %488 = arith.cmpi slt, %486, %487 : vector<16x1xi32>
    %489 = arith.andi %484, %488 : vector<16x1xi1>
    %cst_131 = arith.constant 0.000000e+00 : f32
    %490 = vector.shape_cast %489 : vector<16x1xi1> to vector<16x1xi1>
    %491 = vector.broadcast %490 : vector<16x1xi1> to vector<16x64xi1>
    %492 = vector.broadcast %cst_131 : f32 to vector<16x64xf32>
    %493 = arith.select %491, %480, %492 : vector<16x64xi1>, vector<16x64xf32>
    %494 = arith.extf %310 : vector<1x64xbf16> to vector<1x64xf32>
    %495 = vector.broadcast %494 : vector<1x64xf32> to vector<16x64xf32>
    %496 = arith.mulf %493, %495 : vector<16x64xf32>
    %497 = arith.addf %479, %496 : vector<16x64xf32>
    %c12_i32 = arith.constant 12 : i32
    %498 = tpu.dynamic_rotate %297 by %c12_i32 dim 0 : vector<16x64xf32>, i32 -> vector<16x64xf32>
    %c4_i32_132 = arith.constant 4 : i32
    %499 = vector.broadcast %c4_i32_132 : i32 to vector<16x1xi32>
    %500 = arith.addi %4, %499 : vector<16x1xi32>
    %c0_i32_133 = arith.constant 0 : i32
    %501 = vector.broadcast %c0_i32_133 : i32 to vector<16x1xi32>
    %502 = arith.cmpi sge, %500, %501 : vector<16x1xi32>
    %c4_i32_134 = arith.constant 4 : i32
    %503 = vector.broadcast %c4_i32_134 : i32 to vector<16x1xi32>
    %504 = arith.addi %4, %503 : vector<16x1xi32>
    %c8_i32_135 = arith.constant 8 : i32
    %505 = vector.broadcast %c8_i32_135 : i32 to vector<16x1xi32>
    %506 = arith.cmpi slt, %504, %505 : vector<16x1xi32>
    %507 = arith.andi %502, %506 : vector<16x1xi1>
    %cst_136 = arith.constant 0.000000e+00 : f32
    %508 = vector.shape_cast %507 : vector<16x1xi1> to vector<16x1xi1>
    %509 = vector.broadcast %508 : vector<16x1xi1> to vector<16x64xi1>
    %510 = vector.broadcast %cst_136 : f32 to vector<16x64xf32>
    %511 = arith.select %509, %498, %510 : vector<16x64xi1>, vector<16x64xf32>
    %512 = arith.extf %311 : vector<1x64xbf16> to vector<1x64xf32>
    %513 = vector.broadcast %512 : vector<1x64xf32> to vector<16x64xf32>
    %514 = arith.mulf %511, %513 : vector<16x64xf32>
    %515 = arith.addf %497, %514 : vector<16x64xf32>
    %c11_i32 = arith.constant 11 : i32
    %516 = tpu.dynamic_rotate %297 by %c11_i32 dim 0 : vector<16x64xf32>, i32 -> vector<16x64xf32>
    %c5_i32_137 = arith.constant 5 : i32
    %517 = vector.broadcast %c5_i32_137 : i32 to vector<16x1xi32>
    %518 = arith.addi %4, %517 : vector<16x1xi32>
    %c0_i32_138 = arith.constant 0 : i32
    %519 = vector.broadcast %c0_i32_138 : i32 to vector<16x1xi32>
    %520 = arith.cmpi sge, %518, %519 : vector<16x1xi32>
    %c5_i32_139 = arith.constant 5 : i32
    %521 = vector.broadcast %c5_i32_139 : i32 to vector<16x1xi32>
    %522 = arith.addi %4, %521 : vector<16x1xi32>
    %c8_i32_140 = arith.constant 8 : i32
    %523 = vector.broadcast %c8_i32_140 : i32 to vector<16x1xi32>
    %524 = arith.cmpi slt, %522, %523 : vector<16x1xi32>
    %525 = arith.andi %520, %524 : vector<16x1xi1>
    %cst_141 = arith.constant 0.000000e+00 : f32
    %526 = vector.shape_cast %525 : vector<16x1xi1> to vector<16x1xi1>
    %527 = vector.broadcast %526 : vector<16x1xi1> to vector<16x64xi1>
    %528 = vector.broadcast %cst_141 : f32 to vector<16x64xf32>
    %529 = arith.select %527, %516, %528 : vector<16x64xi1>, vector<16x64xf32>
    %530 = arith.extf %312 : vector<1x64xbf16> to vector<1x64xf32>
    %531 = vector.broadcast %530 : vector<1x64xf32> to vector<16x64xf32>
    %532 = arith.mulf %529, %531 : vector<16x64xf32>
    %533 = arith.addf %515, %532 : vector<16x64xf32>
    %c10_i32 = arith.constant 10 : i32
    %534 = tpu.dynamic_rotate %297 by %c10_i32 dim 0 : vector<16x64xf32>, i32 -> vector<16x64xf32>
    %c6_i32_142 = arith.constant 6 : i32
    %535 = vector.broadcast %c6_i32_142 : i32 to vector<16x1xi32>
    %536 = arith.addi %4, %535 : vector<16x1xi32>
    %c0_i32_143 = arith.constant 0 : i32
    %537 = vector.broadcast %c0_i32_143 : i32 to vector<16x1xi32>
    %538 = arith.cmpi sge, %536, %537 : vector<16x1xi32>
    %c6_i32_144 = arith.constant 6 : i32
    %539 = vector.broadcast %c6_i32_144 : i32 to vector<16x1xi32>
    %540 = arith.addi %4, %539 : vector<16x1xi32>
    %c8_i32_145 = arith.constant 8 : i32
    %541 = vector.broadcast %c8_i32_145 : i32 to vector<16x1xi32>
    %542 = arith.cmpi slt, %540, %541 : vector<16x1xi32>
    %543 = arith.andi %538, %542 : vector<16x1xi1>
    %cst_146 = arith.constant 0.000000e+00 : f32
    %544 = vector.shape_cast %543 : vector<16x1xi1> to vector<16x1xi1>
    %545 = vector.broadcast %544 : vector<16x1xi1> to vector<16x64xi1>
    %546 = vector.broadcast %cst_146 : f32 to vector<16x64xf32>
    %547 = arith.select %545, %534, %546 : vector<16x64xi1>, vector<16x64xf32>
    %548 = arith.extf %313 : vector<1x64xbf16> to vector<1x64xf32>
    %549 = vector.broadcast %548 : vector<1x64xf32> to vector<16x64xf32>
    %550 = arith.mulf %547, %549 : vector<16x64xf32>
    %551 = arith.addf %533, %550 : vector<16x64xf32>
    %c9_i32 = arith.constant 9 : i32
    %552 = tpu.dynamic_rotate %297 by %c9_i32 dim 0 : vector<16x64xf32>, i32 -> vector<16x64xf32>
    %c7_i32_147 = arith.constant 7 : i32
    %553 = vector.broadcast %c7_i32_147 : i32 to vector<16x1xi32>
    %554 = arith.addi %4, %553 : vector<16x1xi32>
    %c0_i32_148 = arith.constant 0 : i32
    %555 = vector.broadcast %c0_i32_148 : i32 to vector<16x1xi32>
    %556 = arith.cmpi sge, %554, %555 : vector<16x1xi32>
    %c7_i32_149 = arith.constant 7 : i32
    %557 = vector.broadcast %c7_i32_149 : i32 to vector<16x1xi32>
    %558 = arith.addi %4, %557 : vector<16x1xi32>
    %c8_i32_150 = arith.constant 8 : i32
    %559 = vector.broadcast %c8_i32_150 : i32 to vector<16x1xi32>
    %560 = arith.cmpi slt, %558, %559 : vector<16x1xi32>
    %561 = arith.andi %556, %560 : vector<16x1xi1>
    %cst_151 = arith.constant 0.000000e+00 : f32
    %562 = vector.shape_cast %561 : vector<16x1xi1> to vector<16x1xi1>
    %563 = vector.broadcast %562 : vector<16x1xi1> to vector<16x64xi1>
    %564 = vector.broadcast %cst_151 : f32 to vector<16x64xf32>
    %565 = arith.select %563, %552, %564 : vector<16x64xi1>, vector<16x64xf32>
    %566 = arith.extf %314 : vector<1x64xbf16> to vector<1x64xf32>
    %567 = vector.broadcast %566 : vector<1x64xf32> to vector<16x64xf32>
    %568 = arith.mulf %565, %567 : vector<16x64xf32>
    %569 = arith.addf %551, %568 : vector<16x64xf32>
    %570 = vector.broadcast %299 : vector<1x64xf32> to vector<16x64xf32>
    %571 = arith.addf %569, %570 : vector<16x64xf32>
    %572 = arith.addf %297, %571 : vector<16x64xf32>
    %c232 = arith.constant 232 : index
    %c0_152 = arith.constant 0 : index
    %573 = vector.load %arg3[%c232, %c0_152] : memref<480x192xbf16, #tpu.memory_space<vmem>>, vector<64x32xbf16>
    %cst_153 = arith.constant dense<0.000000e+00> : vector<16x32xf32>
    %574 = tpu.matmul %572, %573, %cst_153 {dimension_numbers = #tpu.dot_dimension_numbers<[1], [0], [0], [1], [0, 0, 1, 1], [], []>} : vector<16x64xf32>, vector<64x32xbf16>, vector<16x32xf32> -> vector<16x32xf32>
    %c9 = arith.constant 9 : index
    %c0_154 = arith.constant 0 : index
    %575 = vector.load %arg2[%c9, %c0_154] : memref<16x128xf32, #tpu.memory_space<vmem>>, vector<1x32xf32>
    %576 = vector.broadcast %575 : vector<1x32xf32> to vector<16x32xf32>
    %577 = arith.addf %574, %576 : vector<16x32xf32>
    %578 = arith.addf %35, %577 : vector<16x32xf32>
    %cst_155 = arith.constant dense<0.000000e+00> : vector<16xf32>
    %579 = vector.multi_reduction <add>, %578, %cst_155 [1] : vector<16x32xf32> to vector<16xf32>
    %580 = vector.shape_cast %579 : vector<16xf32> to vector<16x1xf32>
    %cst_156 = arith.constant 3.200000e+01 : f32
    %581 = vector.broadcast %cst_156 : f32 to vector<16x1xf32>
    %582 = arith.divf %580, %581 : vector<16x1xf32>
    %583 = vector.broadcast %582 : vector<16x1xf32> to vector<16x32xf32>
    %584 = arith.subf %578, %583 : vector<16x32xf32>
    %585 = arith.mulf %584, %584 : vector<16x32xf32>
    %cst_157 = arith.constant dense<0.000000e+00> : vector<16xf32>
    %586 = vector.multi_reduction <add>, %585, %cst_157 [1] : vector<16x32xf32> to vector<16xf32>
    %587 = vector.shape_cast %586 : vector<16xf32> to vector<16x1xf32>
    %cst_158 = arith.constant 3.200000e+01 : f32
    %588 = vector.broadcast %cst_158 : f32 to vector<16x1xf32>
    %589 = arith.divf %587, %588 : vector<16x1xf32>
    %cst_159 = arith.constant 9.99999974E-6 : f32
    %590 = vector.broadcast %cst_159 : f32 to vector<16x1xf32>
    %591 = arith.addf %589, %590 : vector<16x1xf32>
    %592 = math.rsqrt %591 : vector<16x1xf32>
    %593 = vector.broadcast %592 : vector<16x1xf32> to vector<16x32xf32>
    %594 = arith.mulf %584, %593 : vector<16x32xf32>
    %c296 = arith.constant 296 : index
    %c0_160 = arith.constant 0 : index
    %595 = vector.load %arg3[%c296, %c0_160] : memref<480x192xbf16, #tpu.memory_space<vmem>>, vector<32x130xbf16>
    %cst_161 = arith.constant dense<0.000000e+00> : vector<16x130xf32>
    %596 = tpu.matmul %594, %595, %cst_161 {dimension_numbers = #tpu.dot_dimension_numbers<[1], [0], [0], [1], [0, 0, 1, 1], [], []>} : vector<16x32xf32>, vector<32x130xbf16>, vector<16x130xf32> -> vector<16x130xf32>
    %597 = vector.extract_strided_slice %596 {offsets = [0, 0], sizes = [16, 128], strides = [1, 1]} : vector<16x130xf32> to vector<16x128xf32>
    %c10 = arith.constant 10 : index
    %c0_162 = arith.constant 0 : index
    %598 = vector.load %arg2[%c10, %c0_162] : memref<16x128xf32, #tpu.memory_space<vmem>>, vector<1x128xf32>
    %599 = vector.broadcast %598 : vector<1x128xf32> to vector<16x128xf32>
    %600 = arith.addf %597, %599 : vector<16x128xf32>
    %cst_163 = arith.constant 0.000000e+00 : f32
    %601 = vector.broadcast %cst_163 : f32 to vector<16x128xf32>
    %602 = arith.maximumf %600, %601 : vector<16x128xf32>
    %603 = vector.extract_strided_slice %596 {offsets = [0, 128], sizes = [16, 2], strides = [1, 1]} : vector<16x130xf32> to vector<16x2xf32>
    %c11 = arith.constant 11 : index
    %c0_164 = arith.constant 0 : index
    %604 = vector.load %arg2[%c11, %c0_164] : memref<16x128xf32, #tpu.memory_space<vmem>>, vector<1x2xf32>
    %605 = vector.broadcast %604 : vector<1x2xf32> to vector<16x2xf32>
    %606 = arith.addf %603, %605 : vector<16x2xf32>
    %cst_165 = arith.constant dense<0xFF800000> : vector<16xf32>
    %607 = vector.multi_reduction <maximumf>, %606, %cst_165 [1] : vector<16x2xf32> to vector<16xf32>
    %608 = vector.shape_cast %607 : vector<16xf32> to vector<16x1xf32>
    %609 = vector.broadcast %608 : vector<16x1xf32> to vector<16x2xf32>
    %610 = arith.subf %606, %609 : vector<16x2xf32>
    %611 = math.exp %610 : vector<16x2xf32>
    %cst_166 = arith.constant dense<0.000000e+00> : vector<16xf32>
    %612 = vector.multi_reduction <add>, %611, %cst_166 [1] : vector<16x2xf32> to vector<16xf32>
    %613 = vector.shape_cast %612 : vector<16xf32> to vector<16x1xf32>
    %614 = vector.broadcast %613 : vector<16x1xf32> to vector<16x2xf32>
    %615 = arith.divf %611, %614 : vector<16x2xf32>
    %c328 = arith.constant 328 : index
    %c0_167 = arith.constant 0 : index
    %616 = vector.load %arg3[%c328, %c0_167] : memref<480x192xbf16, #tpu.memory_space<vmem>>, vector<2x160xbf16>
    %cst_168 = arith.constant dense<0.000000e+00> : vector<16x160xf32>
    %617 = tpu.matmul %615, %616, %cst_168 {dimension_numbers = #tpu.dot_dimension_numbers<[1], [0], [0], [1], [0, 0, 1, 1], [], []>} : vector<16x2xf32>, vector<2x160xbf16>, vector<16x160xf32> -> vector<16x160xf32>
    %618 = vector.extract_strided_slice %617 {offsets = [0, 0], sizes = [16, 128], strides = [1, 1]} : vector<16x160xf32> to vector<16x128xf32>
    %619 = arith.mulf %602, %618 : vector<16x128xf32>
    %c336 = arith.constant 336 : index
    %c0_169 = arith.constant 0 : index
    %620 = vector.load %arg3[%c336, %c0_169] : memref<480x192xbf16, #tpu.memory_space<vmem>>, vector<128x32xbf16>
    %cst_170 = arith.constant dense<0.000000e+00> : vector<16x32xf32>
    %621 = tpu.matmul %619, %620, %cst_170 {dimension_numbers = #tpu.dot_dimension_numbers<[1], [0], [0], [1], [0, 0, 1, 1], [], []>} : vector<16x128xf32>, vector<128x32xbf16>, vector<16x32xf32> -> vector<16x32xf32>
    %622 = vector.extract_strided_slice %617 {offsets = [0, 128], sizes = [16, 32], strides = [1, 1]} : vector<16x160xf32> to vector<16x32xf32>
    %623 = arith.addf %621, %622 : vector<16x32xf32>
    %cst_171 = arith.constant 5.000000e-01 : f32
    %624 = vector.broadcast %cst_171 : f32 to vector<16x32xf32>
    %625 = arith.mulf %624, %623 : vector<16x32xf32>
    %626 = arith.addf %578, %625 : vector<16x32xf32>
    %c12 = arith.constant 12 : index
    %c0_172 = arith.constant 0 : index
    %627 = vector.load %arg2[%c12, %c0_172] : memref<16x128xf32, #tpu.memory_space<vmem>>, vector<1x32xf32>
    %c13 = arith.constant 13 : index
    %c0_173 = arith.constant 0 : index
    %628 = vector.load %arg2[%c13, %c0_173] : memref<16x128xf32, #tpu.memory_space<vmem>>, vector<1x32xf32>
    %cst_174 = arith.constant dense<0.000000e+00> : vector<16xf32>
    %629 = vector.multi_reduction <add>, %626, %cst_174 [1] : vector<16x32xf32> to vector<16xf32>
    %630 = vector.shape_cast %629 : vector<16xf32> to vector<16x1xf32>
    %cst_175 = arith.constant 3.200000e+01 : f32
    %631 = vector.broadcast %cst_175 : f32 to vector<16x1xf32>
    %632 = arith.divf %630, %631 : vector<16x1xf32>
    %633 = vector.broadcast %632 : vector<16x1xf32> to vector<16x32xf32>
    %634 = arith.subf %626, %633 : vector<16x32xf32>
    %635 = arith.mulf %634, %634 : vector<16x32xf32>
    %cst_176 = arith.constant dense<0.000000e+00> : vector<16xf32>
    %636 = vector.multi_reduction <add>, %635, %cst_176 [1] : vector<16x32xf32> to vector<16xf32>
    %637 = vector.shape_cast %636 : vector<16xf32> to vector<16x1xf32>
    %cst_177 = arith.constant 3.200000e+01 : f32
    %638 = vector.broadcast %cst_177 : f32 to vector<16x1xf32>
    %639 = arith.divf %637, %638 : vector<16x1xf32>
    %cst_178 = arith.constant 9.99999974E-6 : f32
    %640 = vector.broadcast %cst_178 : f32 to vector<16x1xf32>
    %641 = arith.addf %639, %640 : vector<16x1xf32>
    %642 = math.rsqrt %641 : vector<16x1xf32>
    %643 = vector.broadcast %642 : vector<16x1xf32> to vector<16x32xf32>
    %644 = arith.mulf %634, %643 : vector<16x32xf32>
    %645 = vector.broadcast %627 : vector<1x32xf32> to vector<16x32xf32>
    %646 = arith.mulf %644, %645 : vector<16x32xf32>
    %647 = vector.broadcast %628 : vector<1x32xf32> to vector<16x32xf32>
    %648 = arith.addf %646, %647 : vector<16x32xf32>
    %c464 = arith.constant 464 : index
    %c0_179 = arith.constant 0 : index
    %649 = vector.load %arg3[%c464, %c0_179] : memref<480x192xbf16, #tpu.memory_space<vmem>>, vector<16x16xbf16>
    %cst_180 = arith.constant dense<0.000000e+00> : vector<16x32xf32>
    %650 = tpu.matmul %649, %648, %cst_180 {dimension_numbers = #tpu.dot_dimension_numbers<[1], [0], [0], [1], [0, 0, 1, 1], [], []>} : vector<16x16xbf16>, vector<16x32xf32>, vector<16x32xf32> -> vector<16x32xf32>
    %651 = vector.extract_strided_slice %650 {offsets = [0, 0], sizes = [4, 32], strides = [1, 1]} : vector<16x32xf32> to vector<4x32xf32>
    %652 = vector.extract_strided_slice %650 {offsets = [4, 0], sizes = [4, 32], strides = [1, 1]} : vector<16x32xf32> to vector<4x32xf32>
    %653 = vector.extract_strided_slice %650 {offsets = [8, 0], sizes = [4, 32], strides = [1, 1]} : vector<16x32xf32> to vector<4x32xf32>
    %654 = vector.extract_strided_slice %650 {offsets = [12, 0], sizes = [4, 32], strides = [1, 1]} : vector<16x32xf32> to vector<4x32xf32>
    %655 = tpu.concatenate %651, %652, %653, %654 in 1 : vector<4x32xf32>, vector<4x32xf32>, vector<4x32xf32>, vector<4x32xf32> -> vector<4x128xf32>
    %c0_181 = arith.constant 0 : index
    %c0_182 = arith.constant 0 : index
    %656 = vector.load %arg4[%c0_181, %c0_182] : memref<4x128xf32, #tpu.memory_space<vmem>>, vector<4x128xf32>
    tpu.vector_store %arg4[%c0_181, %c0_182], %655 {strides = array<i32>} : memref<4x128xf32, #tpu.memory_space<vmem>>, vector<4x128xf32>,
    %cst_183 = arith.constant dense<0.000000e+00> : vector<2xf32>
    %657 = vector.multi_reduction <add>, %615, %cst_183 [0] : vector<16x2xf32> to vector<2xf32>
    %658 = vector.shape_cast %657 : vector<2xf32> to vector<1x2xf32>
    %cst_184 = arith.constant 0.000000e+00 : f32
    %659 = vector.broadcast %cst_184 : f32 to vector<1x126xf32>
    %660 = tpu.concatenate %658, %659 in 1 : vector<1x2xf32>, vector<1x126xf32> -> vector<1x128xf32>
    %c0_185 = arith.constant 0 : index
    %c0_186 = arith.constant 0 : index
    %661 = vector.load %arg5[%c0_185, %c0_186] : memref<1x128xf32, #tpu.memory_space<vmem>>, vector<1x128xf32>
    tpu.vector_store %arg5[%c0_185, %c0_186], %660 {strides = array<i32>} : memref<1x128xf32, #tpu.memory_space<vmem>>, vector<1x128xf32>,
    return
  }
}

</mosaic_0001>

<bundles_post_ra>
// kernel: moe_ebranchformer_layer.1
= control target key start
LH: loop header
LB: loop body
LE: loop exit
PB: predicated region body
PF: predicated region fallthrough
CT: control target
= control target key end

     0   :  { %vm3326_vm0 = vcmask 261120   ;;  %v2292_v4 = vmov 32.0   ;;  %vm3327_vm8 = vcmask 523264   ;;  %s2293_s16 = smov 104   ;;  %s2294_s17 = smov 120   ;;  %vm316_vm15 = vcmask 64512   ;;  %s3312_s1 = inlined_call_operand.vmem [shape: f32[16,32], index: 1, kind: input, shape index: {}]   ;;  %s3313_s2 = inlined_call_operand.vmem [shape: f32[16,128], index: 2, kind: input, shape index: {}]   ;;  %s3314_s3 = inlined_call_operand.vmem [shape: bf16[480,192], index: 3, kind: input, shape index: {}]   ;;  %s3315_s0 = inlined_call_operand.vmem [shape: f32[2,8], index: 0, kind: input, shape index: {}]   ;;  %s3316_s5 = inlined_call_operand.vmem [shape: f32[1,128], index: 5, kind: output, shape index: {1}]   ;;  %s3317_s4 = inlined_call_operand.vmem [shape: f32[4,128], index: 4, kind: output, shape index: {0}]  }
   0x1   :  { %v2337_v0 = vld [vmem:[%s3312_s1] sm:$0xff]  ;;  %v2344_v2 = vld [vmem:[%s3312_s1 + $0x8] sm:$0xff]  ;;  %2226 = vrcp.f32 %v2292_v4  ;;  %v1987_v21 = vld [vmem:[%s3314_s3 + $0x10] sm:$0xf]  ;;  %s2295_s18 = smov 112   ;;  %s2296_s19 = smov 96  }
   0x2   :  { %v29_v1 = vsel %vm3326_vm0, %v2337_v0, 0.0  ;;  %v32_v3 = vsel %vm3326_vm0, %v2344_v2, 0.0  ;;  %v2151_v22 = vld [vmem:[%s3314_s3 + $0x14] sm:$0xf0]  ;;  %v1983_v24 = vld [vmem:[%s3314_s3] sm:$0xf] }
   0x3   :  { %30 = vadd.xlane.f32.xlu0 %v29_v1  ;;  %v1988_v23 = vor.u32 %v2151_v22, %v1987_v21  ;;  %v2150_v25 = vld [vmem:[%s3314_s3 + $0x4] sm:$0xf0]  ;;  %v2005_v29 = vld [vmem:[%s3314_s3 + $0x50] sm:$0xf]  ;;  %v2155_v30 = vld [vmem:[%s3314_s3 + $0x54] sm:$0xf0] }
   0x4   :  { %v1984_v26 = vor.u32 %v2150_v25, %v1983_v24  ;;  %v2001_v31 = vld [vmem:[%s3314_s3 + $0x40] sm:$0xf]  ;;  %v2006_v32 = vor.u32 %v2155_v30, %v2005_v29  ;;  %v2154_v33 = vld [vmem:[%s3314_s3 + $0x44] sm:$0xf0]  ;;  %v1997_v36 = vld [vmem:[%s3314_s3 + $0x30] sm:$0xf] }
   0x5   :  { %110 = vmatpush.bf16.msra.mxu0 %v1988_v23  ;;  %v2002_v35 = vor.u32 %v2154_v33, %v2001_v31  ;;  %v2153_v37 = vld [vmem:[%s3314_s3 + $0x34] sm:$0xf0]  ;;  %v1993_v58 = vld [vmem:[%s3314_s3 + $0x20] sm:$0xf]  ;;  %v2152_v59 = vld [vmem:[%s3314_s3 + $0x24] sm:$0xf0] }
   0x6   :  { %166 = vmatpush.bf16.msra.mxu1 %v2006_v32  ;;  %2181 = vmatpush.bf16.msra.mxu3 %v2006_v32  ;;  %v1998_v39 = vor.u32 %v2153_v37, %v1997_v36  ;;  %v1994_v60 = vor.u32 %v2152_v59, %v1993_v58  ;;  %v2212_v61 = vld [vmem:[%s3313_s2] ss:$0 sm:$0xff]  ;;  %v2021_v30 = vld [vmem:[%s3314_s3 + $0x78] sm:$0xf0]  ;;  %v2157_v33 = vld [vmem:[%s3314_s3 + $0x64] sm:$0xf0] }
   0x7   :  { %v2227_v5 = vpop.eup %2226  ;;  %v2011_v32 = vld [vmem:[%s3314_s3 + $0x60] sm:$0xf]  ;;  %v2013_v36 = vld [vmem:[%s3314_s3 + $0x68] sm:$0xf0]  ;;  %s2297_s23 = smov 32   ;;  %s2298_s24 = smov 64  }
   0x8   :  { %v36_v6 = vmul.f32 32.0, %v2227_v5  ;;  %vm40_vm1 = vweird.f32 %v2227_v5  ;;  %s2301_s7 = smov 8   ;;  %s2302_s8 = smov 16  }
   0x9   :  { %111 = vmatpush.bf16.msra.mxu0 %v1984_v26  ;;  %v2019_v26 = vld [vmem:[%s3314_s3 + $0x70] sm:$0xf]  ;;  %s2303_s9 = smov 24  }
   0xa   :  { %v37_v7 = vsub.f32 1.0, %v36_v6  ;;  %167 = vmatpush.bf16.msra.mxu1 %v2002_v35  ;;  %2182 = vmatpush.bf16.msra.mxu3 %v2002_v35  ;;  %v2213_v6 = vld [vmem:[%s3313_s2 + $0x1] ss:$0 sm:$0xff]  ;;  %v2012_v35 = vor.u32 %v2157_v33, %v2011_v32 }
   0xb   :  { %33 = vadd.xlane.f32.xlu0 %v32_v3 }
   0xc   :  { %v38_v8 = vmul.f32 %v2227_v5, %v37_v7 }
   0xe   :  { %v39_v9 = vadd.f32 %v2227_v5, %v38_v8  ;;  %168 = vmatpush.bf16.msra.mxu1 %v1998_v39  ;;  %2183 = vmatpush.bf16.msra.mxu3 %v1998_v39 }
  0x10   :  { %v2348_v10 = vsel %vm40_vm1, %v2227_v5, %v39_v9 }
  0x12   :  { %169 = vmatpush.bf16.msra.mxu1 %v1994_v60  ;;  %2184 = vmatpush.bf16.msra.mxu3 %v1994_v60  ;;  %v2214_v60 = vld [vmem:[%s3313_s2 + $0x2] ss:$0 sm:$0xff] }
  0x76   :  { %v31_v11 = vpop.xlane.xlu0 %30 }
  0x77   :  { %v42_v12 = vmul.f32 %v2348_v10, %v31_v11 }
  0x79   :  { %v44_v13 = vsub.f32 %v2337_v0, %v42_v12 }
  0x7b   :  { %v46_v14 = vmul.f32 %v44_v13, %v44_v13 }
  0x7d   :  { %v48_v15 = vsel %vm3326_vm0, %v46_v14, 0.0 }
  0x7e   :  { %49 = vadd.xlane.f32.xlu1 %v48_v15  ;;  %v34_v16 = vpop.xlane.xlu0 %33 }
  0x7f   :  { %v43_v17 = vmul.f32 %v2348_v10, %v34_v16 }
  0x81   :  { %v45_v18 = vsub.f32 %v2344_v2, %v43_v17 }
  0x83   :  { %v47_v19 = vmul.f32 %v45_v18, %v45_v18 }
  0x85   :  { %v51_v20 = vsel %vm3326_vm0, %v47_v19, 0.0 }
  0x86   :  { %52 = vadd.xlane.f32.xlu1 %v51_v20 }
  0xf1   :  { %v50_v27 = vpop.xlane.xlu1 %49 }
  0xf2   :  { %v54_v28 = vmul.f32 %v50_v27, %v2348_v10  ;;  %v2159_v27 = vld [vmem:[%s3314_s3 + $0x74] sm:$0xf0] }
  0xf3   :  { %v2020_v29 = vor.u32 %v2159_v27, %v2019_v26 }
  0xf4   :  { %v56_v34 = vadd.f32 1e-05, %v54_v28  ;;  %v2158_v28 = vld [vmem:[%s3314_s3 + $0x74] sm:$0xf] }
  0xf5   :  { %v2024_v31 = vor.u32 %v2158_v28, %v2021_v30  ;;  %261 = vmatpush.bf16.msra.mxu2 %v2020_v29 }
  0xf6   :  { %2228 = vrsqrt.f32 %v56_v34  ;;  %vm64_vm3 = vweird.f32 %v56_v34 }
  0xf7   :  { %276 = vmatpush.bf16.msrb.mxu3 %v2024_v31 }
  0xf9   :  { %v53_v38 = vpop.xlane.xlu1 %52  ;;  %262 = vmatpush.bf16.msra.mxu2 %v2012_v35 }
  0xfa   :  { %v55_v40 = vmul.f32 %v53_v38, %v2348_v10 }
  0xfc   :  { %v2229_v41 = vpop.eup %2228  ;;  %v57_v42 = vadd.f32 1e-05, %v55_v40 }
  0xfd   :  { %v59_v43 = vmul.f32 %v2229_v41, %v56_v34  ;;  %vm65_vm2 = vweird.f32 %v2229_v41  ;;  %v2156_v34 = vld [vmem:[%s3314_s3 + $0x64] sm:$0xf] }
  0xfe   :  { %2230 = vrsqrt.f32 %v57_v42  ;;  %vm66_vm4 = vmor %vm64_vm3, %vm65_vm2  ;;  %vm74_vm5 = vweird.f32 %v57_v42  ;;  %v2016_v37 = vor.u32 %v2156_v34, %v2013_v36  ;;  %v2216_v34 = vld [vmem:[%s3313_s2 + $0x4] ss:$0 sm:$0xff] }
  0xff   :  { %v60_v44 = vmul.f32 %v2229_v41, %v59_v43 }
 0x100   :  { %277 = vmatpush.bf16.msrb.mxu3 %v2016_v37 }
 0x101   :  { %v61_v45 = vmul.f32 0.5, %v60_v44 }
 0x103   :  { %v62_v46 = vsub.f32 1.5, %v61_v45 }
 0x104   :  { %v2231_v47 = vpop.eup %2230 }
 0x105   :  { %v69_v48 = vmul.f32 %v2231_v47, %v57_v42  ;;  %v63_v49 = vmul.f32 %v2229_v41, %v62_v46  ;;  %vm75_vm6 = vweird.f32 %v2231_v47 }
 0x106   :  { %vm76_vm7 = vmor %vm74_vm5, %vm75_vm6 }
 0x107   :  { %v70_v50 = vmul.f32 %v2231_v47, %v69_v48  ;;  %v67_v51 = vsel %vm66_vm4, %v2229_v41, %v63_v49 }
 0x108   :  { %v78_v52 = vmul.f32 %v67_v51, %v44_v13 }
 0x109   :  { %v71_v53 = vmul.f32 0.5, %v70_v50 }
 0x10a   :  { %1989 = vmatmul.msk.f32.vlgmr.msra.gmra.mxu0 %vm3326_vm0, %v78_v52 }
 0x10b   :  { %v72_v54 = vsub.f32 1.5, %v71_v53 }
 0x10d   :  { %v73_v55 = vmul.f32 %v2231_v47, %v72_v54 }
 0x10f   :  { %v77_v56 = vsel %vm76_vm7, %v2231_v47, %v73_v55 }
 0x110   :  { %v79_v57 = vmul.f32 %v77_v56, %v45_v18 }
 0x112   :  { %1990 = vmatmul.msk.f32.gmra.mxu0 %vm3326_vm0, %v79_v57 }
 0x187   :  { %v113_v62 = vpop.f32.mrf.mxu0 }
 0x188   :  { %v114_v63 = vadd.f32 %v2212_v61, %v113_v62 }
 0x18a   :  { %v119_v1 = vmax.f32 %v114_v63, 0.0 }
 0x18c   :  { %2007 = vmatmul.msk.f32.vlgmr.msra.gmra.mxu1 %vm3327_vm8, %v119_v1 }
 0x18f   :  { %v116_v3 = vpop.f32.mrf.mxu0 }
 0x190   :  { %v117_v4 = vadd.f32 %v2212_v61, %v116_v3 }
 0x192   :  { %v120_v5 = vmax.f32 %v117_v4, 0.0  ;;  %v2215_v4 = vld [vmem:[%s3313_s2 + $0x3] ss:$0 sm:$0xff] }
 0x194   :  { %2008 = vmatmul.msk.f32.vlgmr.msra.gmra.mxu3 %vm3327_vm8, %v120_v5 }
 0x209   :  { %v171_v7 = vpop.f32.mrf.mxu1 }
 0x20a   :  { %v172_v8 = vadd.f32 %v2213_v6, %v171_v7 }
 0x20c   :  { %v177_v9 = vmul.f32 0.5, %v172_v8 }
 0x20e   :  { %v2405_v11 = vadd.f32 %v177_v9, %v2337_v0 }
 0x210   :  { %v181_v12 = vsel %vm3326_vm0, %v2405_v11, 0.0 }
 0x211   :  { %182 = vadd.xlane.f32.xlu2 %v181_v12 }
 0x217   :  { %v174_v13 = vpop.f32.mrf.mxu3 }
 0x218   :  { %v175_v14 = vadd.f32 %v2213_v6, %v174_v13 }
 0x21a   :  { %v178_v15 = vmul.f32 0.5, %v175_v14 }
 0x21c   :  { %v2410_v16 = vadd.f32 %v178_v15, %v2344_v2 }
 0x21e   :  { %v184_v17 = vsel %vm3326_vm0, %v2410_v16, 0.0 }
 0x21f   :  { %185 = vadd.xlane.f32.xlu2 %v184_v17 }
 0x284   :  { %v183_v18 = vpop.xlane.xlu2 %182 }
 0x285   :  { %v187_v19 = vmul.f32 %v183_v18, %v2348_v10 }
 0x287   :  { %v189_v0 = vsub.f32 %v2405_v11, %v187_v19 }
 0x289   :  { %v191_v20 = vmul.f32 %v189_v0, %v189_v0 }
 0x28b   :  { %v193_v21 = vsel %vm3326_vm0, %v191_v20, 0.0 }
 0x28c   :  { %194 = vadd.xlane.f32.xlu0 %v193_v21 }
 0x292   :  { %v186_v22 = vpop.xlane.xlu2 %185 }
 0x293   :  { %v188_v23 = vmul.f32 %v186_v22, %v2348_v10 }
 0x295   :  { %v190_v24 = vsub.f32 %v2410_v16, %v188_v23 }
 0x297   :  { %v192_v2 = vmul.f32 %v190_v24, %v190_v24 }
 0x299   :  { %v196_v25 = vsel %vm3326_vm0, %v192_v2, 0.0 }
 0x29a   :  { %197 = vadd.xlane.f32.xlu1 %v196_v25 }
 0x2ff   :  { %v195_v38 = vpop.xlane.xlu0 %194 }
 0x300   :  { %v199_v39 = vmul.f32 %v195_v38, %v2348_v10 }
 0x302   :  { %v201_v40 = vadd.f32 1e-05, %v199_v39 }
 0x304   :  { %2232 = vrsqrt.f32 %v201_v40  ;;  %vm209_vm10 = vweird.f32 %v201_v40 }
 0x30a   :  { %v2233_v41 = vpop.eup %2232 }
 0x30b   :  { %v204_v42 = vmul.f32 %v2233_v41, %v201_v40  ;;  %vm210_vm9 = vweird.f32 %v2233_v41 }
 0x30c   :  { %vm211_vm11 = vmor %vm209_vm10, %vm210_vm9 }
 0x30d   :  { %v205_v43 = vmul.f32 %v2233_v41, %v204_v42  ;;  %v198_v44 = vpop.xlane.xlu1 %197 }
 0x30e   :  { %v200_v45 = vmul.f32 %v198_v44, %v2348_v10 }
 0x30f   :  { %v206_v46 = vmul.f32 0.5, %v205_v43 }
 0x310   :  { %v202_v47 = vadd.f32 1e-05, %v200_v45 }
 0x311   :  { %v207_v48 = vsub.f32 1.5, %v206_v46 }
 0x312   :  { %2234 = vrsqrt.f32 %v202_v47  ;;  %vm219_vm13 = vweird.f32 %v202_v47 }
 0x313   :  { %v208_v49 = vmul.f32 %v2233_v41, %v207_v48  ;;  %v2542_v48 = vld [vmem:[%s3315_s0] sm:$0x3] }
 0x314   :  { %vm293_vm1 = vcmp.gt.f32.partialorder %v2542_v48, 0.5 }
 0x315   :  { %v212_v50 = vsel %vm211_vm11, %v2233_v41, %v208_v49  ;;  %v2299_v49 = vmov -1e+09  }
 0x316   :  { %v223_v51 = vmul.f32 %v212_v50, %v189_v0  ;;  %v294_v50 = vsel %vm293_vm1, 0.0, %v2299_v49 }
 0x318   :  { %v2235_v52 = vpop.eup %2234  ;;  %2025 = vmatmul.msk.f32.vlgmr.msra.gmra.mxu2 %vm3326_vm0, %v223_v51  ;;  %2027 = vmatmul.msk.f32.vlgmr.msrb.gmra.mxu3 %vm3326_vm0, %v223_v51  ;;  %v296_v51 = vrot.slane %v294_v50, 1 }
 0x319   :  { %v214_v53 = vmul.f32 %v2235_v52, %v202_v47  ;;  %vm220_vm12 = vweird.f32 %v2235_v52  ;;  %v2217_v47 = vld [vmem:[%s3313_s2 + $0x5] ss:$0 sm:$0xff] }
 0x31a   :  { %vm221_vm14 = vmor %vm219_vm13, %vm220_vm12 }
 0x31b   :  { %v215_v54 = vmul.f32 %v2235_v52, %v214_v53 }
 0x31d   :  { %v216_v55 = vmul.f32 0.5, %v215_v54  ;;  %v2547_v54 = vperm.slane %v296_v51, 0 }
 0x31f   :  { %v217_v56 = vsub.f32 1.5, %v216_v55 }
 0x321   :  { %v218_v57 = vmul.f32 %v2235_v52, %v217_v56 }
 0x323   :  { %v222_v58 = vsel %vm221_vm14, %v2235_v52, %v218_v57 }
 0x324   :  { %v224_v59 = vmul.f32 %v222_v58, %v190_v24 }
 0x326   :  { %2026 = vmatmul.msk.f32.gmra.mxu2 %vm3326_vm0, %v224_v59  ;;  %2028 = vmatmul.msk.f32.gmra.mxu3 %vm3326_vm0, %v224_v59 }
 0x39b   :  { %v264_v61 = vpop.f32.mrf.mxu2  ;;  %v279_v3 = vpop.f32.mrf.mxu3 }
 0x39c   :  { %v2453_v62 = vadd.f32 %v2214_v60, %v264_v61  ;;  %v291_v5 = vadd.f32 %v2215_v4, %v279_v3 }
 0x39e   :  { %310 = vrot.lane.b32.xlu0 %v2453_v62, %s2293_s16  ;;  %302 = vrot.lane.b32.xlu2 %v2453_v62, %s2294_s17  ;;  %v884_v8 = vmul.f32 %v291_v5, %v291_v5 }
 0x3a0   :  { %v886_v12 = vmul.f32 %v884_v8, %v291_v5 }
 0x3a2   :  { %v888_v14 = vmul.f32 0.044715, %v886_v12 }
 0x3a4   :  { %v890_v17 = vadd.f32 %v888_v14, %v291_v5 }
 0x3a6   :  { %306 = vrot.lane.b32.xlu2 %v2453_v62, %s2295_s18  ;;  %v892_v19 = vmul.f32 0.7978846, %v890_v17 }
 0x3a8   :  { %2236 = vtanh.f32 %v892_v19 }
 0x3a9   :  { %v267_v63 = vpop.f32.mrf.mxu2  ;;  %v282_v7 = vpop.f32.mrf.mxu3 }
 0x3aa   :  { %v2458_v1 = vadd.f32 %v2214_v60, %v267_v63  ;;  %v292_v9 = vadd.f32 %v2215_v4, %v282_v7 }
 0x3ac   :  { %304 = vrot.lane.b32.xlu0 %v2458_v1, %s2294_s17  ;;  %308 = vrot.lane.b32.xlu1 %v2458_v1, %s2295_s18  ;;  %v885_v13 = vmul.f32 %v292_v9, %v292_v9 }
 0x3ae   :  { %312 = vrot.lane.b32.xlu2 %v2458_v1, %s2293_s16  ;;  %v887_v15 = vmul.f32 %v885_v13, %v292_v9  ;;  %v2237_v22 = vpop.eup %2236 }
 0x3af   :  { %v896_v23 = vadd.f32 1.0, %v2237_v22 }
 0x3b0   :  { %v889_v18 = vmul.f32 0.044715, %v887_v15 }
 0x3b1   :  { %v898_v25 = vmul.f32 0.5, %v896_v23 }
 0x3b2   :  { %v891_v0 = vadd.f32 %v889_v18, %v292_v9 }
 0x3b3   :  { %v2490_v29 = vmul.f32 %v898_v25, %v291_v5  ;;  %v531_v5 = vperm.slane %v294_v50, 0 }
 0x3b4   :  { %341 = vrot.lane.b32.xlu0 %v2458_v1, %s2296_s19  ;;  %v893_v21 = vmul.f32 0.7978846, %v891_v0 }
 0x3b6   :  { %2238 = vtanh.f32 %v893_v21 }
 0x3bc   :  { %v2239_v2 = vpop.eup %2238 }
 0x3bd   :  { %v897_v26 = vadd.f32 1.0, %v2239_v2 }
 0x3bf   :  { %v899_v30 = vmul.f32 0.5, %v897_v26 }
 0x3c1   :  { %v2494_v31 = vmul.f32 %v899_v30, %v292_v9 }
 0x3f8   :  { %v2468_v6 = vpop.permute.xlu2 %302 }
 0x3f9   :  { %367 = vrot.lane.b32.xlu1 %v2468_v6, %s2296_s19  ;;  %v2197_v46 = vpack.i.bf16 %v2453_v62, %v2468_v6 }
 0x400   :  { %v2478_v24 = vpop.permute.xlu2 %306 }
 0x401   :  { %314 = vrot.lane.b32.xlu1 %v2453_v62, %s2296_s19 }
 0x408   :  { %v2496_v33 = vpop.permute.xlu2 %312 }
 0x410   :  { %v2474_v20 = vpop.permute.xlu0 %310 }
 0x411   :  { %471 = vrot.lane.b32.xlu2 %v2474_v20, %s2296_s19 }
 0x419   :  { %419 = vrot.lane.b32.xlu2 %v2478_v24, %s2296_s19 }
 0x41e   :  { %v2482_v27 = vpop.permute.xlu0 %304  ;;  %v2484_v28 = vpop.permute.xlu1 %308 }
 0x41f   :  { %393 = vrot.lane.b32.xlu1 %v2482_v27, %s2296_s19  ;;  %445 = vrot.lane.b32.xlu0 %v2484_v28, %s2296_s19 }
 0x421   :  { %906 = vrot.lane.b32.xlu2 %v2490_v29, %s2296_s19 }
 0x426   :  { %v342_v32 = vpop.permute.xlu0 %341 }
 0x427   :  { %2031 = vmatpush.xpose.msk.msrb.mxu2 %vm316_vm15, %v342_v32  ;;  %908 = vrot.lane.b32.xlu1 %v2494_v31, %s2296_s19 }
 0x428   :  { %497 = vrot.lane.b32.xlu0 %v2496_v33, %s2296_s19 }
 0x42a   :  { %2032 = vmatmul.msk.f32.vlgmr.msrb.gmra.mxu2 %vm316_vm15, %v2458_v1 }
 0x42f   :  { %973 = vrot.lane.b32.xlu1 %v2217_v47, %s2297_s23 }
 0x430   :  { %966 = vrot.lane.b32.xlu0 %v2216_v34, %s2297_s23 }
 0x46b   :  { %v472_v35 = vpop.permute.xlu2 %471  ;;  %v368_v36 = vpop.permute.xlu1 %367 }
 0x46c   :  { %2033 = vmatpush.xpose.msk.msra.mxu3 %vm316_vm15, %v368_v36 }
 0x46f   :  { %2034 = vmatmul.msk.f32.vlgmr.msra.gmra.mxu3 %vm316_vm15, %v2468_v6 }
 0x470   :  { %2041 = vmatpush.xpose.msk.msrb.mxu3 %vm316_vm15, %v472_v35 }
 0x473   :  { %v420_v37 = vpop.permute.xlu2 %419  ;;  %v315_v38 = vpop.permute.xlu1 %314 }
 0x474   :  { %2029 = vmatpush.xpose.msk.msrb.mxu0 %vm316_vm15, %v315_v38  ;;  %2037 = vmatpush.xpose.msk.msrb.mxu1 %vm316_vm15, %v420_v37  ;;  %v2207_v38 = vpack.i.bf16 %v2482_v27, %v2478_v24 }
 0x477   :  { %2030 = vmatmul.msk.f32.vlgmr.msrb.gmra.mxu0 %vm316_vm15, %v2453_v62  ;;  %2038 = vmatmul.msk.f32.vlgmr.msrb.gmra.mxu1 %vm316_vm15, %v2478_v24 }
 0x478   :  { %2042 = vmatmul.msk.f32.vlgmr.msrb.gmra.mxu3 %vm316_vm15, %v2474_v20 }
 0x47b   :  { %v907_v39 = vpop.permute.xlu2 %906 }
 0x47c   :  { %v912_v40 = vsel %vm3326_vm0, %v907_v39, 0.0 }
 0x47d   :  { %913 = vadd.xlane.f32.xlu0 %v912_v40 }
 0x491   :  { %v446_v41 = vpop.permute.xlu0 %445  ;;  %v394_v42 = vpop.permute.xlu1 %393 }
 0x492   :  { %2035 = vmatpush.xpose.msk.msra.mxu0 %vm316_vm15, %v394_v42  ;;  %2039 = vmatpush.xpose.msk.msra.mxu2 %vm316_vm15, %v446_v41 }
 0x495   :  { %2036 = vmatmul.msk.f32.vlgmr.msra.gmra.mxu0 %vm316_vm15, %v2482_v27  ;;  %2040 = vmatmul.msk.f32.vlgmr.msra.gmra.mxu2 %vm316_vm15, %v2484_v28 }
 0x499   :  { %v909_v43 = vpop.permute.xlu1 %908 }
 0x49a   :  { %v498_v44 = vpop.permute.xlu0 %497  ;;  %v915_v45 = vsel %vm3326_vm0, %v909_v43, 0.0 }
 0x49b   :  { %2043 = vmatpush.xpose.msk.msrb.mxu0 %vm316_vm15, %v498_v44  ;;  %916 = vadd.xlane.f32.xlu2 %v915_v45 }
 0x49e   :  { %2044 = vmatmul.msk.f32.vlgmr.msrb.gmra.mxu0 %vm316_vm15, %v2496_v33 }
 0x4a1   :  { %v2588_v39 = vpop.permute.xlu1 %973 }
 0x4a2   :  { %v2554_v57 = vpop.permute.xlu0 %966 }
 0x4ad   :  { %v364_v52 = vpop.f32.mrf.mxu2 }
 0x4ae   :  { %v524_v53 = vmul.f32 0.35355338, %v364_v52 }
 0x4b0   :  { %v2550_v55 = vadd.f32 %v2547_v54, %v524_v53 }
 0x4b2   :  { %v546_v56 = vsel %vm316_vm15, %v2550_v55, -inf }
 0x4b3   :  { %2198 = vrot.lane.b32.xlu2 %v2197_v46, %s2298_s24 }
 0x4dc   :  { %547 = vmax.xlane.f32.xlu2 %v546_v56 }
 0x4f0   :  { %v914_v58 = vpop.xlane.xlu0 %913 }
 0x4f1   :  { %v918_v59 = vmul.f32 %v914_v58, %v2348_v10 }
 0x4f2   :  { %v390_v25 = vpop.f32.mrf.mxu3 }
 0x4f3   :  { %v2558_v60 = vsub.f32 %v2490_v29, %v918_v59  ;;  %v525_v26 = vmul.f32 0.35355338, %v390_v25 }
 0x4f4   :  { %v338_v61 = vpop.f32.mrf.mxu0  ;;  %v442_v62 = vpop.f32.mrf.mxu1 }
 0x4f5   :  { %v523_v63 = vmul.f32 0.35355338, %v338_v61  ;;  %v527_v3 = vmul.f32 0.35355338, %v442_v62  ;;  %v922_v4 = vmul.f32 %v2558_v60, %v2558_v60  ;;  %v537_v30 = vadd.f32 %v531_v5, %v525_v26 }
 0x4f6   :  { %v2300_v26 = vmov 0  }
 0x4f7   :  { %926 = vrot.lane.b32.xlu1 %v922_v4, %s2296_s19  ;;  %v535_v6 = vadd.f32 %v531_v5, %v523_v63  ;;  %v2563_v7 = vadd.f32 %v531_v5, %v527_v3  ;;  %v549_v35 = vsel %vm316_vm15, %v537_v30, -inf  ;;  %v2202_v63 = vpack.i.bf16 %v2474_v20, %v2458_v1 }
 0x4f9   :  { %v543_v8 = vsel %vm316_vm15, %v535_v6, -inf  ;;  %v555_v9 = vsel %vm316_vm15, %v2563_v7, -inf }
 0x4fa   :  { %544 = vmax.xlane.f32.xlu0 %v543_v8  ;;  %556 = vmax.xlane.f32.xlu2 %v555_v9 }
 0x4fb   :  { %v494_v45 = vpop.f32.mrf.mxu3 }
 0x4fc   :  { %v529_v47 = vmul.f32 0.35355338, %v494_v45 }
 0x4fe   :  { %v2596_v27 = vadd.f32 %v531_v5, %v529_v47 }
 0x500   :  { %v561_v52 = vsel %vm316_vm15, %v2596_v27, -inf }
 0x50e   :  { %v917_v12 = vpop.xlane.xlu2 %916 }
 0x50f   :  { %v919_v13 = vmul.f32 %v917_v12, %v2348_v10 }
 0x511   :  { %v2570_v14 = vsub.f32 %v2494_v31, %v919_v13 }
 0x512   :  { %v416_v2 = vpop.f32.mrf.mxu0 }
 0x513   :  { %v923_v15 = vmul.f32 %v2570_v14, %v2570_v14  ;;  %v526_v51 = vmul.f32 0.35355338, %v416_v2 }
 0x515   :  { %928 = vrot.lane.b32.xlu1 %v923_v15, %s2296_s19  ;;  %v2602_v56 = vadd.f32 %v2547_v54, %v526_v51 }
 0x516   :  { %v2199_v17 = vpop.permute.xlu2 %2198 }
 0x517   :  { %v2201_v18 = vunpack.i.h.bf16 %v2199_v17  ;;  %v2200_v19 = vunpack.i.l.bf16 %v2199_v17  ;;  %v552_v61 = vsel %vm316_vm15, %v2602_v56, -inf }
 0x518   :  { %v468_v0 = vpop.f32.mrf.mxu2 }
 0x519   :  { %v528_v21 = vmul.f32 0.35355338, %v468_v0  ;;  %665 = vmatpush.msra.mxu1 %v2201_v18  ;;  %717 = vmatpush.msra.mxu3 %v2200_v19 }
 0x51b   :  { %v2576_v22 = vadd.f32 %v2547_v54, %v528_v21  ;;  %v520_v32 = vpop.f32.mrf.mxu0 }
 0x51c   :  { %v530_v34 = vmul.f32 0.35355338, %v520_v32 }
 0x51d   :  { %v558_v23 = vsel %vm316_vm15, %v2576_v22, -inf }
 0x51e   :  { %559 = vmax.xlane.f32.xlu2 %v558_v23  ;;  %v2582_v36 = vadd.f32 %v2547_v54, %v530_v34 }
 0x520   :  { %v564_v37 = vsel %vm316_vm15, %v2582_v36, -inf }
 0x53f   :  { %550 = vmax.xlane.f32.xlu1 %v549_v35 }
 0x547   :  { %565 = vmax.xlane.f32.xlu1 %v564_v37 }
 0x54f   :  { %v548_v24 = vpop.xlane.xlu2 %547 }
 0x550   :  { %v568_v50 = vsub.f32 %v2550_v55, %v548_v24 }
 0x552   :  { %v577_v53 = vmul.f32 1.442695, %v568_v50  ;;  %v978_v50 = vld [vmem:[%s3314_s3 + $0xc0] sm:$0xf] }
 0x560   :  { %2208 = vrot.lane.b32.xlu1 %v2207_v38, %s2298_s24 }
 0x569   :  { %v927_v40 = vpop.permute.xlu1 %926 }
 0x56a   :  { %v932_v41 = vsel %vm3326_vm0, %v927_v40, 0.0 }
 0x56b   :  { %933 = vadd.xlane.f32.xlu0 %v932_v41 }
 0x56d   :  { %v545_v42 = vpop.xlane.xlu0 %544  ;;  %v557_v3 = vpop.xlane.xlu2 %556 }
 0x56e   :  { %v567_v43 = vsub.f32 %v535_v6, %v545_v42  ;;  %v571_v6 = vsub.f32 %v2563_v7, %v557_v3 }
 0x570   :  { %v575_v44 = vmul.f32 1.442695, %v567_v43  ;;  %v583_v8 = vmul.f32 1.442695, %v571_v6 }
 0x572   :  { %2240 = vpow2.f32 %v575_v44 }
 0x573   :  { %2242 = vpow2.f32 %v577_v53 }
 0x578   :  { %v2592_v46 = vpop.eup %2240 }
 0x579   :  { %v591_v49 = vsel %vm316_vm15, %v2592_v46, 0.0  ;;  %v2607_v62 = vpop.eup %2242 }
 0x57a   :  { %592 = vadd.xlane.f32.xlu0 %v591_v49  ;;  %v594_v55 = vsel %vm316_vm15, %v2607_v62, 0.0 }
 0x582   :  { %562 = vmax.xlane.f32.xlu0 %v561_v52 }
 0x587   :  { %v929_v58 = vpop.permute.xlu1 %928 }
 0x588   :  { %v935_v59 = vsel %vm3326_vm0, %v929_v58, 0.0 }
 0x589   :  { %936 = vadd.xlane.f32.xlu2 %v935_v59 }
 0x58a   :  { %553 = vmax.xlane.f32.xlu0 %v552_v61 }
 0x591   :  { %595 = vadd.xlane.f32.xlu2 %v594_v55  ;;  %v560_v38 = vpop.xlane.xlu2 %559 }
 0x592   :  { %v572_v49 = vsub.f32 %v2576_v22, %v560_v38 }
 0x59e   :  { %2203 = vrot.lane.b32.xlu0 %v2202_v63, %s2298_s24 }
 0x5b2   :  { %v551_v54 = vpop.xlane.xlu1 %550 }
 0x5b3   :  { %v569_v4 = vsub.f32 %v537_v30, %v551_v54  ;;  %v297_v30 = vsel %vm293_vm1, 1, %v2300_v26 }
 0x5b4   :  { %v632_v35 = vperm.slane %v297_v30, 0  ;;  %v298_v3 = vrot.slane %v297_v30, 1 }
 0x5b5   :  { %v579_v5 = vmul.f32 1.442695, %v569_v4 }
 0x5b6   :  { %vm2628_vm5 = vcmp.eq.s32.totalorder %v632_v35, 1  ;;  %vm299_vm6 = vcmp.ne.s32.totalorder %v298_v3, 0 }
 0x5b7   :  { %2244 = vpow2.f32 %v579_v5 }
 0x5b8   :  { %2246 = vpow2.f32 %v583_v8 }
 0x5ba   :  { %v566_v20 = vpop.xlane.xlu1 %565 }
 0x5bb   :  { %v574_v55 = vsub.f32 %v2582_v36, %v566_v20  ;;  %v631_v20 = vsel %vm299_vm6, 1, %v2300_v26 }
 0x5bd   :  { %v2615_v9 = vpop.eup %2244  ;;  %v589_v4 = vmul.f32 1.442695, %v574_v55 }
 0x5be   :  { %v597_v12 = vsel %vm316_vm15, %v2615_v9, 0.0  ;;  %v2619_v13 = vpop.eup %2246 }
 0x5bf   :  { %598 = vadd.xlane.f32.xlu1 %v597_v12  ;;  %v603_v1 = vsel %vm316_vm15, %v2619_v13, 0.0 }
 0x5c8   :  { %604 = vadd.xlane.f32.xlu0 %v603_v1 }
 0x5d2   :  { %v2209_v15 = vpop.permute.xlu1 %2208 }
 0x5d3   :  { %v2211_v17 = vunpack.i.h.bf16 %v2209_v15  ;;  %v2210_v18 = vunpack.i.l.bf16 %v2209_v15 }
 0x5d5   :  { %743 = vmatpush.msra.mxu0 %v2211_v17  ;;  %769 = vmatpush.msrb.mxu1 %v2210_v18 }
 0x5dc   :  { %826 = vrot.lane.b32.xlu0 %v2496_v33, %s2298_s24 }
 0x5de   :  { %v934_v7 = vpop.xlane.xlu0 %933 }
 0x5df   :  { %v938_v19 = vmul.f32 %v934_v7, %v2348_v10  ;;  %v633_v7 = vperm.slane %v631_v20, 0 }
 0x5e1   :  { %v940_v0 = vadd.f32 1e-05, %v938_v19  ;;  %vm2668_vm7 = vcmp.eq.s32.totalorder %v633_v7, 1 }
 0x5e3   :  { %2248 = vrsqrt.f32 %v940_v0  ;;  %vm948_vm3 = vweird.f32 %v940_v0 }
 0x5e9   :  { %v2249_v21 = vpop.eup %2248 }
 0x5ea   :  { %v943_v23 = vmul.f32 %v2249_v21, %v940_v0  ;;  %vm949_vm2 = vweird.f32 %v2249_v21 }
 0x5eb   :  { %vm950_vm4 = vmor %vm948_vm3, %vm949_vm2 }
 0x5ec   :  { %v944_v2 = vmul.f32 %v2249_v21, %v943_v23 }
 0x5ed   :  { %v593_v25 = vpop.xlane.xlu0 %592 }
 0x5ee   :  { %v945_v32 = vmul.f32 0.5, %v944_v2  ;;  %2250 = vrcp.f32 %v593_v25 }
 0x5f0   :  { %v946_v34 = vsub.f32 1.5, %v945_v32 }
 0x5f2   :  { %v947_v37 = vmul.f32 %v2249_v21, %v946_v34 }
 0x5f4   :  { %v2251_v33 = vpop.eup %2250  ;;  %v951_v40 = vsel %vm950_vm4, %v2249_v21, %v947_v37 }
 0x5f5   :  { %v623_v42 = vmul.f32 %v2251_v33, %v2592_v46  ;;  %v563_v43 = vpop.xlane.xlu0 %562  ;;  %v962_v48 = vmul.f32 %v951_v40, %v2558_v60  ;;  %v2648_v60 = vunpack.c.l.bf16 %v978_v50 }
 0x5f6   :  { %v573_v44 = vsub.f32 %v2596_v27, %v563_v43  ;;  %v585_v27 = vmul.f32 1.442695, %v572_v49 }
 0x5f7   :  { %v636_v45 = vsel %vm2628_vm5, %v623_v42, 0.0  ;;  %v969_v47 = vmul.f32 %v2554_v57, %v962_v48  ;;  %v981_v59 = vperm.slane %v2648_v60, 3  ;;  %v1047_v7 = vperm.slane %v2648_v60, 1 }
 0x5f8   :  { %v587_v24 = vmul.f32 1.442695, %v573_v44  ;;  %2045 = vmatmul.msk.f32.vlgmr.msra.gmra.mxu1 %vm316_vm15, %v636_v45 }
 0x5f9   :  { %v2644_v46 = vadd.f32 %v2588_v39, %v969_v47 }
 0x5fa   :  { %2252 = vpow2.f32 %v587_v24 }
 0x5fb   :  { %990 = vrot.lane.b32.xlu0 %v2644_v46, %s2296_s19  ;;  %2254 = vpow2.f32 %v585_v27 }
 0x5fc   :  { %v937_v51 = vpop.xlane.xlu2 %936 }
 0x5fd   :  { %v939_v22 = vmul.f32 %v937_v51, %v2348_v10  ;;  %v554_v52 = vpop.xlane.xlu0 %553 }
 0x5fe   :  { %v570_v53 = vsub.f32 %v2602_v56, %v554_v52 }
 0x5ff   :  { %v941_v58 = vadd.f32 1e-05, %v939_v22  ;;  %v23_v22 = vlaneseq }
 0x600   :  { %v2653_v61 = vpop.eup %2252  ;;  %v581_v63 = vmul.f32 1.442695, %v570_v53 }
 0x601   :  { %2256 = vrsqrt.f32 %v941_v58  ;;  %v609_v54 = vsel %vm316_vm15, %v2653_v61, 0.0  ;;  %v2659_v5 = vpop.eup %2254  ;;  %vm958_vm10 = vweird.f32 %v941_v58 }
 0x602   :  { %2258 = vpow2.f32 %v581_v63  ;;  %610 = vadd.xlane.f32.xlu1 %v609_v54  ;;  %v606_v1 = vsel %vm316_vm15, %v2659_v5, 0.0 }
 0x603   :  { %983 = vrot.lane.b32.xlu0 %v981_v59, %s2297_s23  ;;  %v2706_v59 = vshrl.u32 %v23_v22, 7 }
 0x604   :  { %v596_v56 = vpop.xlane.xlu2 %595 }
 0x605   :  { %2260 = vrcp.f32 %v596_v56  ;;  %v25_v56 = vadd.s32 8, %v2706_v59  ;;  %vm1062_vm12 = vcmp.lt.s32.totalorder %v2706_v59, 1  ;;  %vm1030_vm14 = vcmp.lt.s32.totalorder %v2706_v59, 2 }
 0x606   :  { %2262 = vpow2.f32 %v589_v4  ;;  %vm998_vm1 = vcmp.lt.s32.totalorder %v2706_v59, 3  ;;  %vm1126_vm4 = vcmp.lt.s32.totalorder %v2706_v59, 6 }
 0x607   :  { %v2257_v6 = vpop.eup %2256 }
 0x608   :  { %v2661_v8 = vpop.eup %2258  ;;  %v953_v36 = vmul.f32 %v2257_v6, %v941_v58  ;;  %vm959_vm9 = vweird.f32 %v2257_v6 }
 0x609   :  { %v600_v12 = vsel %vm316_vm15, %v2661_v8, 0.0  ;;  %vm960_vm11 = vmor %vm958_vm10, %vm959_vm9  ;;  %vm1158_vm10 = vcmp.lt.s32.totalorder %v2706_v59, 5 }
 0x60a   :  { %v954_v15 = vmul.f32 %v2257_v6, %v953_v36  ;;  %601 = vadd.xlane.f32.xlu2 %v600_v12  ;;  %607 = vadd.xlane.f32.xlu1 %v606_v1  ;;  %v2730_v12 = vand.u32 7, %v25_v56 }
 0x60b   :  { %v2261_v17 = vpop.eup %2260 }
 0x60c   :  { %v955_v18 = vmul.f32 0.5, %v954_v15  ;;  %v2263_v19 = vpop.eup %2262  ;;  %v624_v21 = vmul.f32 %v2261_v17, %v2607_v62 }
 0x60d   :  { %v612_v32 = vsel %vm316_vm15, %v2263_v19, 0.0 }
 0x60e   :  { %v956_v0 = vsub.f32 1.5, %v955_v18  ;;  %v637_v34 = vsel %vm2668_vm7, %v624_v21, 0.0  ;;  %v1079_v18 = vperm.slane %v2648_v60, 2 }
 0x610   :  { %v2204_v23 = vpop.permute.xlu0 %2203  ;;  %v957_v26 = vmul.f32 %v2257_v6, %v956_v0 }
 0x611   :  { %v2206_v25 = vunpack.i.h.bf16 %v2204_v23  ;;  %v2205_v30 = vunpack.i.l.bf16 %v2204_v23 }
 0x612   :  { %613 = vadd.xlane.f32.xlu2 %v612_v32  ;;  %v961_v62 = vsel %vm960_vm11, %v2257_v6, %v957_v26 }
 0x613   :  { %691 = vmatpush.msrb.mxu2 %v2205_v30  ;;  %821 = vmatpush.msrb.mxu3 %v2206_v25  ;;  %v963_v35 = vmul.f32 %v961_v62, %v2570_v14  ;;  %v2757_v30 = vadd.s32 4294967293, %v2730_v12 }
 0x614   :  { %2046 = vmatmul.msk.f32.vlgmr.msrb.gmra.mxu2 %vm316_vm15, %v637_v34 }
 0x615   :  { %v970_v37 = vmul.f32 %v2554_v57, %v963_v35 }
 0x617   :  { %v2679_v33 = vadd.f32 %v2588_v39, %v970_v37 }
 0x623   :  { %992 = vrot.lane.b32.xlu1 %v2679_v33, %s2296_s19 }
 0x62a   :  { %774 = vrot.lane.b32.xlu2 %v2484_v28, %s2298_s24 }
 0x632   :  { %v599_v38 = vpop.xlane.xlu1 %598 }
 0x633   :  { %2264 = vrcp.f32 %v599_v38 }
 0x639   :  { %v2265_v40 = vpop.eup %2264 }
 0x63a   :  { %v625_v42 = vmul.f32 %v2265_v40, %v2615_v9  ;;  %v2218_v9 = vld [vmem:[%s3313_s2 + $0x6] ss:$0 sm:$0xff] }
 0x63b   :  { %v605_v43 = vpop.xlane.xlu0 %604  ;;  %1190 = vrot.lane.b32.xlu2 %v2218_v9, %s2297_s23  ;;  %v1143_v9 = vperm.slane %v2648_v60, 5 }
 0x63c   :  { %2266 = vrcp.f32 %v605_v43  ;;  %v638_v14 = vsel %vm2628_vm5, %v625_v42, 0.0 }
 0x63d   :  { %2047 = vmatmul.msk.f32.vlgmr.msra.gmra.mxu3 %vm316_vm15, %v638_v14 }
 0x642   :  { %v2267_v57 = vpop.eup %2266 }
 0x643   :  { %v627_v39 = vmul.f32 %v2267_v57, %v2619_v13 }
 0x645   :  { %v640_v48 = vsel %vm2628_vm5, %v627_v39, 0.0 }
 0x646   :  { %2049 = vmatmul.msk.f32.vlgmr.msrb.gmra.mxu1 %vm316_vm15, %v640_v48 }
 0x64e   :  { %v827_v28 = vpop.permute.xlu0 %826 }
 0x64f   :  { %847 = vmatpush.msrb.mxu0 %v827_v28 }
 0x66d   :  { %v2713_v3 = vpop.permute.xlu0 %990 }
 0x66e   :  { %v1028_v1 = vrot.slane %v2713_v3, 6  ;;  %v996_v20 = vrot.slane %v2713_v3, 5  ;;  %v1124_v15 = vrot.slane %v2713_v3, 2  ;;  %v1092_v57 = vrot.slane %v2713_v3, 1 }
 0x675   :  { %v611_v44 = vpop.xlane.xlu1 %610 }
 0x676   :  { %2268 = vrcp.f32 %v611_v44 }
 0x67c   :  { %v2269_v45 = vpop.eup %2268 }
 0x67d   :  { %v629_v47 = vmul.f32 %v2269_v45, %v2653_v61  ;;  %v602_v49 = vpop.xlane.xlu2 %601  ;;  %v608_v13 = vpop.xlane.xlu1 %607  ;;  %v2709_v61 = vand.u32 7, %v2706_v59  ;;  %v1111_v45 = vperm.slane %v2648_v60, 4 }
 0x67e   :  { %2270 = vrcp.f32 %v602_v49 }
 0x67f   :  { %v642_v24 = vsel %vm2628_vm5, %v629_v47, 0.0  ;;  %2272 = vrcp.f32 %v608_v13  ;;  %v2724_v6 = vadd.s32 4294967294, %v2709_v61  ;;  %v2728_v36 = vadd.s32 4294967293, %v2709_v61 }
 0x680   :  { %2051 = vmatmul.msk.f32.vlgmr.msrb.gmra.mxu3 %vm316_vm15, %v642_v24  ;;  %v2751_v2 = vadd.s32 2, %v2709_v61  ;;  %v2754_v25 = vadd.s32 1, %v2709_v61  ;;  %vm1094_vm5 = vcmp.lt.s32.totalorder %v2706_v59, 7  ;;  %v2804_v13 = vadd.s32 4294967295, %v2730_v12 }
 0x681   :  { %vm1035_vm2 = vcmp.ge.s32.totalorder %v2724_v6, 0  ;;  %vm1003_vm3 = vcmp.ge.s32.totalorder %v2728_v36, 0 }
 0x682   :  { %vm3319_vm6 = vcmp.lt.s32.totalorder %v2751_v2, 8  ;;  %vm3329_vm9 = vcmp.lt.s32.totalorder %v2754_v25, 8  ;;  %vm3320_vm11 = vcmp.ge.s32.totalorder %v2804_v13, 0 }
 0x684   :  { %v2271_v50 = vpop.eup %2270 }
 0x685   :  { %v614_v27 = vpop.xlane.xlu2 %613  ;;  %v626_v51 = vmul.f32 %v2271_v50, %v2661_v8  ;;  %v2273_v52 = vpop.eup %2272  ;;  %v1060_v8 = vrot.slane %v2713_v3, 7  ;;  %v2808_v50 = vadd.s32 3, %v2709_v61 }
 0x686   :  { %2274 = vrcp.f32 %v614_v27  ;;  %v628_v58 = vmul.f32 %v2273_v52, %v2659_v5  ;;  %v2720_v5 = vadd.s32 4294967295, %v2709_v61  ;;  %v2811_v27 = vadd.s32 4294967294, %v2730_v12 }
 0x687   :  { %v639_v53 = vsel %vm2668_vm7, %v626_v51, 0.0  ;;  %v1156_v52 = vrot.slane %v2713_v3, 3 }
 0x688   :  { %2048 = vmatmul.msk.f32.vlgmr.msra.gmra.mxu0 %vm316_vm15, %v639_v53  ;;  %v641_v54 = vsel %vm2668_vm7, %v628_v58, 0.0  ;;  %vm3330_vm13 = vcmp.ge.s32.totalorder %v2720_v5, 0 }
 0x68c   :  { %v2275_v41 = vpop.eup %2274 }
 0x68d   :  { %v630_v55 = vmul.f32 %v2275_v41, %v2263_v19  ;;  %v775_v63 = vpop.permute.xlu2 %774  ;;  %v1015_v19 = vperm.slane %v2648_v60, 0 }
 0x68e   :  { %795 = vmatpush.msra.mxu2 %v775_v63  ;;  %v1175_v63 = vperm.slane %v2648_v60, 6 }
 0x68f   :  { %2050 = vmatmul.msk.f32.vlgmr.msra.gmra.mxu2 %vm316_vm15, %v641_v54  ;;  %v643_v4 = vsel %vm2668_vm7, %v630_v55, 0.0  ;;  %vm3318_vm7 = vcmp.ge.s32.totalorder %v2757_v30, 0 }
 0x690   :  { %2052 = vmatmul.msk.f32.vlgmr.msrb.gmra.mxu0 %vm316_vm15, %v643_v4 }
 0x695   :  { %v2739_v17 = vpop.permute.xlu1 %992 }
 0x696   :  { %v1061_v0 = vrot.slane %v2739_v17, 7  ;;  %v1029_v21 = vrot.slane %v2739_v17, 6  ;;  %v997_v23 = vrot.slane %v2739_v17, 5  ;;  %v1125_v62 = vrot.slane %v2739_v17, 2 }
 0x697   :  { %v1093_v40 = vrot.slane %v2739_v17, 1  ;;  %v1157_v24 = vrot.slane %v2739_v17, 3 }
 0x698   :  { %v1064_v32 = vsel %vm1062_vm12, %v1061_v0, %v1060_v8  ;;  %v1032_v26 = vsel %vm1030_vm14, %v1029_v21, %v1028_v1  ;;  %v1000_v34 = vsel %vm998_vm1, %v997_v23, %v996_v20  ;;  %v1127_v39 = vsel %vm1126_vm4, %v1124_v15, %v1125_v62 }
 0x699   :  { %v1077_v35 = vsel %vm3330_vm13, %v1064_v32, 0.0  ;;  %v1045_v37 = vsel %vm1035_vm2, %v1032_v26, 0.0  ;;  %v1013_v38 = vsel %vm1003_vm3, %v1000_v34, 0.0  ;;  %v999_v48 = vsel %vm998_vm1, %v996_v20, %v997_v23 }
 0x69a   :  { %v1080_v42 = vmul.f32 %v1079_v18, %v1077_v35  ;;  %v1048_v43 = vmul.f32 %v1047_v7, %v1045_v37  ;;  %v1016_v14 = vmul.f32 %v1015_v19, %v1013_v38  ;;  %v1095_v28 = vsel %vm1094_vm5, %v1092_v57, %v1093_v40  ;;  %v984_v35 = vpop.permute.xlu0 %983 }
 0x69b   :  { %v1141_v44 = vsel %vm3319_vm6, %v1127_v39, 0.0  ;;  %v1014_v47 = vsel %vm3318_vm7, %v999_v48, 0.0  ;;  %v1109_v49 = vsel %vm3329_vm9, %v1095_v28, 0.0  ;;  %v1063_v58 = vsel %vm1062_vm12, %v1060_v8, %v1061_v0 }
 0x69c   :  { %1084 = vrot.lane.b32.xlu0 %v1080_v42, %s2297_s23  ;;  %1052 = vrot.lane.b32.xlu1 %v1048_v43, %s2297_s23  ;;  %v1144_v51 = vmul.f32 %v1143_v9, %v1141_v44  ;;  %v1017_v22 = vmul.f32 %v1015_v19, %v1014_v47  ;;  %v1112_v53 = vmul.f32 %v1111_v45, %v1109_v49  ;;  %vm3322_vm7 = vcmp.lt.s32.totalorder %v2808_v50, 8 }
 0x69d   :  { %1020 = vrot.lane.b32.xlu2 %v1016_v14, %s2297_s23  ;;  %v1159_v41 = vsel %vm1158_vm10, %v1156_v52, %v1157_v24  ;;  %v1031_v55 = vsel %vm1030_vm14, %v1028_v1, %v1029_v21  ;;  %vm3321_vm6 = vcmp.ge.s32.totalorder %v2811_v27, 0  ;;  %v1078_v54 = vsel %vm3320_vm11, %v1063_v58, 0.0 }
 0x69e   :  { %v1173_v4 = vsel %vm3322_vm7, %v1159_v41, 0.0  ;;  %v1046_v56 = vsel %vm3321_vm6, %v1031_v55, 0.0  ;;  %v2837_v8 = vadd.s32 2, %v2730_v12  ;;  %v2840_v20 = vadd.s32 1, %v2730_v12 }
 0x69f   :  { %v2843_v1 = vadd.s32 3, %v2730_v12  ;;  %v1081_v17 = vmul.f32 %v1079_v18, %v1078_v54  ;;  %v1176_v19 = vmul.f32 %v1175_v63, %v1173_v4  ;;  %v1049_v0 = vmul.f32 %v1047_v7, %v1046_v56 }
 0x6a0   :  { %v1128_v21 = vsel %vm1126_vm4, %v1125_v62, %v1124_v15  ;;  %vm3324_vm11 = vcmp.lt.s32.totalorder %v2837_v8, 8  ;;  %v1096_v23 = vsel %vm1094_vm5, %v1093_v40, %v1092_v57  ;;  %vm3328_vm6 = vcmp.lt.s32.totalorder %v2840_v20, 8  ;;  %v1191_v62 = vpop.permute.xlu2 %1190 }
 0x6a1   :  { %v1160_v60 = vsel %vm1158_vm10, %v1157_v24, %v1156_v52  ;;  %vm3323_vm7 = vcmp.lt.s32.totalorder %v2843_v1, 8  ;;  %v1142_v3 = vsel %vm3324_vm11, %v1128_v21, 0.0  ;;  %v1110_v15 = vsel %vm3328_vm6, %v1096_v23, 0.0 }
 0x6a2   :  { %v1174_v18 = vsel %vm3323_vm7, %v1160_v60, 0.0  ;;  %v1145_v7 = vmul.f32 %v1143_v9, %v1142_v3  ;;  %v1113_v32 = vmul.f32 %v1111_v45, %v1110_v15  ;;  %v986_v42 = vmul.f32 %v984_v35, %v2644_v46  ;;  %v2067_v60 = vld [vmem:[%s3314_s3 + $0xb0] sm:$0xf]  ;;  %v2163_v3 = vld [vmem:[%s3314_s3 + $0xb4] sm:$0xf0] }
 0x6a3   :  { %v1177_v26 = vmul.f32 %v1175_v63, %v1174_v18  ;;  %v987_v44 = vmul.f32 %v984_v35, %v2679_v33  ;;  %v2063_v15 = vld [vmem:[%s3314_s3 + $0xa0] sm:$0xf]  ;;  %v2068_v18 = vor.u32 %v2163_v3, %v2067_v60  ;;  %v2161_v35 = vld [vmem:[%s3314_s3 + $0x94] sm:$0xf0]  ;;  %vm3325_vm7 = vcmask 130048  }
 0x6a4   :  { %1148 = vrot.lane.b32.xlu0 %v1144_v51, %s2297_s23  ;;  %1022 = vrot.lane.b32.xlu1 %v1017_v22, %s2297_s23  ;;  %vm881_vm11 = vcmask 195584   ;;  %v2219_v60 = vld [vmem:[%s3313_s2 + $0x7] ss:$0 sm:$0xff] }
 0x6a5   :  { %1116 = vrot.lane.b32.xlu2 %v1112_v53, %s2297_s23  ;;  %v667_v53 = vpop.f32.mrf.mxu1  ;;  %1259 = vmatpush.bf16.msra.mxu1 %v2068_v18 }
 0x6ac   :  { %1086 = vrot.lane.b32.xlu0 %v1081_v17, %s2297_s23  ;;  %1180 = vrot.lane.b32.xlu1 %v1176_v19, %s2297_s23 }
 0x6ad   :  { %1054 = vrot.lane.b32.xlu2 %v1049_v0, %s2297_s23  ;;  %v693_v0 = vpop.f32.mrf.mxu2 }
 0x6b4   :  { %1150 = vrot.lane.b32.xlu0 %v1145_v7, %s2297_s23  ;;  %1118 = vrot.lane.b32.xlu1 %v1113_v32, %s2297_s23  ;;  %v2162_v7 = vld [vmem:[%s3314_s3 + $0xa4] sm:$0xf0] }
 0x6b5   :  { %1182 = vrot.lane.b32.xlu2 %v1177_v26, %s2297_s23  ;;  %v2064_v26 = vor.u32 %v2162_v7, %v2063_v15 }
 0x6b7   :  { %1260 = vmatpush.bf16.msra.mxu1 %v2064_v26  ;;  %v1282_v26 = vadd.s32 4294967289, %v2730_v12 }
 0x6c0   :  { %v719_v34 = vpop.f32.mrf.mxu3 }
 0x6c1   :  { %854 = vrot.lane.b32.xlu2 %v719_v34, %s2301_s7 }
 0x6c3   :  { %v771_v4 = vpop.f32.mrf.mxu1 }
 0x6f7   :  { %v1021_v37 = vpop.permute.xlu2 %1020 }
 0x6f8   :  { %v1026_v43 = vadd.f32 %v1021_v37, %v986_v42 }
 0x6ff   :  { %v1117_v39 = vpop.permute.xlu2 %1116 }
 0x703   :  { %v823_v21 = vpop.f32.mrf.mxu3 }
 0x705   :  { %v745_v19 = vpop.f32.mrf.mxu0 }
 0x707   :  { %v1055_v22 = vpop.permute.xlu2 %1054 }
 0x70d   :  { %v849_v42 = vpop.f32.mrf.mxu0 }
 0x70e   :  { %v1085_v38 = vpop.permute.xlu0 %1084  ;;  %v1053_v40 = vpop.permute.xlu1 %1052 }
 0x70f   :  { %v1058_v14 = vadd.f32 %v1053_v40, %v1026_v43  ;;  %v1183_v56 = vpop.permute.xlu2 %1182 }
 0x711   :  { %v1090_v28 = vadd.f32 %v1085_v38, %v1058_v14  ;;  %v2055_v38 = vld [vmem:[%s3314_s3 + $0x80] sm:$0xf] }
 0x712   :  { %v797_v23 = vpop.f32.mrf.mxu2 }
 0x713   :  { %v1122_v9 = vadd.f32 %v1117_v39, %v1090_v28 }
 0x716   :  { %v1149_v57 = vpop.permute.xlu0 %1148  ;;  %v1023_v48 = vpop.permute.xlu1 %1022 }
 0x717   :  { %v1154_v45 = vadd.f32 %v1149_v57, %v1122_v9  ;;  %v1027_v24 = vadd.f32 %v1023_v48, %v987_v44 }
 0x719   :  { %v1059_v58 = vadd.f32 %v1055_v22, %v1027_v24 }
 0x71b   :  { %v855_v57 = vpop.permute.xlu2 %854 }
 0x71c   :  { %v876_v28 = vsel %vm316_vm15, %v667_v53, %v855_v57  ;;  %v2085_v53 = vld [vmem:[%s3314_s3 + $0x118] sm:$0xf] }
 0x71e   :  { %v1087_v47 = vpop.permute.xlu0 %1086  ;;  %v1181_v49 = vpop.permute.xlu1 %1180 }
 0x71f   :  { %v1186_v51 = vadd.f32 %v1181_v49, %v1154_v45  ;;  %v1091_v46 = vadd.f32 %v1087_v47, %v1059_v58 }
 0x721   :  { %v1193_v52 = vadd.f32 %v1191_v62, %v1186_v51 }
 0x723   :  { %1197 = vrot.lane.b32.xlu1 %v1193_v52, %s2296_s19 }
 0x726   :  { %v1119_v41 = vpop.permute.xlu1 %1118  ;;  %v1151_v63 = vpop.permute.xlu0 %1150 }
 0x727   :  { %v1123_v55 = vadd.f32 %v1119_v41, %v1091_v46  ;;  %v2167_v41 = vld [vmem:[%s3314_s3 + $0x11c] sm:$0xf0] }
 0x729   :  { %v1155_v54 = vadd.f32 %v1151_v63, %v1123_v55  ;;  %v2081_v55 = vld [vmem:[%s3314_s3 + $0x108] sm:$0xf]  ;;  %v2086_v63 = vor.u32 %v2167_v41, %v2085_v53 }
 0x72b   :  { %v1187_v17 = vadd.f32 %v1183_v56, %v1155_v54  ;;  %862 = vrot.lane.b32.xlu1 %v771_v4, %s2302_s8  ;;  %v2166_v54 = vld [vmem:[%s3314_s3 + $0x10c] sm:$0xf0]  ;;  %1550 = vmatpush.bf16.msrb.mxu2 %v2086_v63  ;;  %v2077_v56 = vld [vmem:[%s3314_s3 + $0xf8] sm:$0xf] }
 0x72c   :  { %v2082_v4 = vor.u32 %v2166_v54, %v2081_v55 }
 0x72d   :  { %v1194_v33 = vadd.f32 %v1191_v62, %v1187_v17  ;;  %v2059_v62 = vld [vmem:[%s3314_s3 + $0x90] sm:$0xf]  ;;  %v2165_v17 = vld [vmem:[%s3314_s3 + $0xfc] sm:$0xf0] }
 0x72e   :  { %v2060_v37 = vor.u32 %v2161_v35, %v2059_v62  ;;  %v1304_v35 = vadd.s32 4294967290, %v2709_v61 }
 0x72f   :  { %1199 = vrot.lane.b32.xlu0 %v1194_v33, %s2296_s19  ;;  %1551 = vmatpush.bf16.msrb.mxu2 %v2082_v4  ;;  %v2078_v33 = vor.u32 %v2165_v17, %v2077_v56 }
 0x730   :  { %1261 = vmatpush.bf16.msra.mxu1 %v2060_v37 }
 0x733   :  { %856 = vrot.lane.b32.xlu1 %v745_v19, %s2301_s7  ;;  %v2073_v19 = vld [vmem:[%s3314_s3 + $0xe8] sm:$0xf]  ;;  %1552 = vmatpush.bf16.msrb.mxu2 %v2078_v33 }
 0x737   :  { %870 = vrot.lane.b32.xlu0 %v823_v21, %s2303_s9 }
 0x73f   :  { %864 = vrot.lane.b32.xlu0 %v797_v23, %s2302_s8  ;;  %v1270_v23 = vld [vmem:[%s3314_s3 + $0xd0] sm:$0xf] }
 0x740   :  { %v2944_v3 = vunpack.c.l.bf16 %v1270_v23 }
 0x742   :  { %v1274_v7 = vperm.slane %v2944_v3, 7  ;;  %v1341_v55 = vperm.slane %v2944_v3, 2  ;;  %v3331_v56 = vperm.slane %v2944_v3, 3 }
 0x795   :  { %v1198_v32 = vpop.permute.xlu1 %1197 }
 0x796   :  { %v1203_v34 = vmul.f32 %v1198_v32, %v2490_v29  ;;  %v2160_v29 = vld [vmem:[%s3314_s3 + $0x84] sm:$0xf0]  ;;  %v1281_v32 = vadd.s32 4294967289, %v2709_v61 }
 0x797   :  { %v2056_v40 = vor.u32 %v2160_v29, %v2055_v38 }
 0x798   :  { %1207 = vrot.lane.b32.xlu2 %v1203_v34, %s2297_s23 }
 0x799   :  { %1262 = vmatpush.bf16.msra.mxu1 %v2056_v40 }
 0x79d   :  { %v863_v39 = vpop.permute.xlu1 %862 }
 0x79e   :  { %v879_v9 = vsel %vm3325_vm7, %v876_v28, %v863_v39  ;;  %v1327_v28 = vadd.s32 4294967291, %v2709_v61 }
 0x7a0   :  { %872 = vrot.lane.b32.xlu2 %v849_v42, %s2303_s9  ;;  %vm1329_vm6 = vcmp.ge.s32.totalorder %v1327_v28, 0  ;;  %v1387_v28 = vperm.slane %v2944_v3, 5 }
 0x7a1   :  { %v1200_v43 = vpop.permute.xlu0 %1199 }
 0x7a2   :  { %v1204_v14 = vmul.f32 %v1200_v43, %v2494_v31 }
 0x7a4   :  { %1209 = vrot.lane.b32.xlu1 %v1204_v14, %s2297_s23  ;;  %v1295_v14 = vperm.slane %v2944_v3, 0 }
 0x7a5   :  { %v857_v49 = vpop.permute.xlu1 %856 }
 0x7a6   :  { %v877_v51 = vsel %vm316_vm15, %v693_v0, %v857_v49  ;;  %v2164_v0 = vld [vmem:[%s3314_s3 + $0xec] sm:$0xf0]  ;;  %vm1283_vm15 = vcmp.ge.s32.totalorder %v1281_v32, 0 }
 0x7a7   :  { %v2074_v21 = vor.u32 %v2164_v0, %v2073_v19 }
 0x7a9   :  { %v871_v48 = vpop.permute.xlu0 %870  ;;  %1553 = vmatpush.bf16.msrb.mxu2 %v2074_v21 }
 0x7aa   :  { %v882_v44 = vsel %vm881_vm11, %v879_v9, %v871_v48  ;;  %v1305_v48 = vadd.s32 4294967290, %v2730_v12 }
 0x7b1   :  { %v865_v24 = vpop.permute.xlu0 %864 }
 0x7b2   :  { %v880_v22 = vsel %vm3325_vm7, %v877_v51, %v865_v24  ;;  %vm1306_vm7 = vcmp.ge.s32.totalorder %v1304_v35, 0  ;;  %v1328_v24 = vadd.s32 4294967291, %v2730_v12 }
 0x7b4   :  { %vm1330_vm13 = vcmp.ge.s32.totalorder %v1328_v24, 0 }
 0x7f2   :  { %v1208_v45 = vpop.permute.xlu2 %1207 }
 0x7f3   :  { %v1213_v47 = vsel %vm3326_vm0, %v882_v44, %v1208_v45  ;;  %v1351_v45 = vadd.s32 4294967292, %v2709_v61 }
 0x7f4   :  { %2069 = vmatmul.msk.f32.vlgmr.msra.gmra.mxu1 %vm3327_vm8, %v1213_v47  ;;  %v1318_v47 = vperm.slane %v2944_v3, 1 }
 0x7f5   :  { %vm1353_vm9 = vcmp.ge.s32.totalorder %v1351_v45, 0  ;;  %v1398_v45 = vperm.slane %v2944_v3, 6 }
 0x7fa   :  { %v873_v31 = vpop.permute.xlu2 %872 }
 0x7fb   :  { %v883_v52 = vsel %vm881_vm11, %v880_v22, %v873_v31  ;;  %vm1284_vm11 = vcmp.ge.s32.totalorder %v1282_v26, 0 }
 0x816   :  { %v1210_v58 = vpop.permute.xlu1 %1209 }
 0x817   :  { %v1214_v46 = vsel %vm3326_vm0, %v883_v52, %v1210_v58  ;;  %vm1348_vm0 = vcmp.lt.s32.totalorder %v2706_v59, 4  ;;  %v2984_v52 = vadd.s32 4294967292, %v2730_v12  ;;  %v1271_v58 = vld [vmem:[%s3314_s3 + $0xd8] sm:$0xf] }
 0x818   :  { %2070 = vmatmul.msk.f32.gmra.mxu1 %vm3327_vm8, %v1214_v46  ;;  %vm1307_vm8 = vcmp.ge.s32.totalorder %v1305_v48, 0  ;;  %v3011_v21 = vunpack.c.l.bf16 %v1271_v58  ;;  %v1425_v58 = vadd.s32 4, %v2709_v61 }
 0x81a   :  { %v1413_v26 = vperm.slane %v3011_v21, 1 }
 0x871   :  { %v1264_v15 = vpop.f32.mrf.mxu1 }
 0x872   :  { %v2946_v18 = vadd.f32 %v2219_v60, %v1264_v15  ;;  %v1376_v15 = vperm.slane %v2944_v3, 4 }
 0x874   :  { %v1275_v34 = vmul.f32 %v1274_v7, %v2946_v18  ;;  %v1277_v62 = vrot.slane %v2946_v18, 1  ;;  %v1300_v38 = vrot.slane %v2946_v18, 2  ;;  %v1323_v29 = vrot.slane %v2946_v18, 3 }
 0x875   :  { %v1346_v40 = vrot.slane %v2946_v18, 4  ;;  %v1370_v42 = vrot.slane %v2946_v18, 5  ;;  %v3332_v57 = vrot.slane %v2946_v18, 6  ;;  %v3333_v39 = vrot.slane %v2946_v18, 7 }
 0x895   :  { %v1267_v37 = vpop.f32.mrf.mxu1 }
 0x896   :  { %v2960_v43 = vadd.f32 %v2219_v60, %v1267_v37 }
 0x898   :  { %v1278_v9 = vrot.slane %v2960_v43, 1  ;;  %v1301_v44 = vrot.slane %v2960_v43, 2  ;;  %v1324_v49 = vrot.slane %v2960_v43, 3  ;;  %v1347_v31 = vrot.slane %v2960_v43, 4 }
 0x899   :  { %v1371_v63 = vrot.slane %v2960_v43, 5  ;;  %v1382_v17 = vrot.slane %v2960_v43, 6  ;;  %v1393_v32 = vrot.slane %v2960_v43, 7  ;;  %v1276_v48 = vmul.f32 %v1274_v7, %v2960_v43 }
 0x89a   :  { %v2976_v51 = vsel %vm1094_vm5, %v1278_v9, %v1277_v62  ;;  %v2980_v22 = vsel %vm1126_vm4, %v1301_v44, %v1300_v38  ;;  %v2998_v54 = vsel %vm1158_vm10, %v1324_v49, %v1323_v29  ;;  %v3004_v4 = vsel %vm1348_vm0, %v1347_v31, %v1346_v40 }
 0x89b   :  { %v1293_v46 = vsel %vm1283_vm15, %v2976_v51, 0.0  ;;  %v1316_v53 = vsel %vm1306_vm7, %v2980_v22, 0.0  ;;  %v1339_v0 = vsel %vm1329_vm6, %v2998_v54, 0.0  ;;  %v1279_v23 = vsel %vm1094_vm5, %v1277_v62, %v1278_v9 }
 0x89c   :  { %v1296_v41 = vmul.f32 %v1295_v14, %v1293_v46  ;;  %v1319_v19 = vmul.f32 %v1318_v47, %v1316_v53  ;;  %vm1354_vm7 = vcmp.ge.s32.totalorder %v2984_v52, 0  ;;  %v1363_v60 = vsel %vm1353_vm9, %v3004_v4, 0.0 }
 0x89d   :  { %v3023_v37 = vsel %vm998_vm1, %v1371_v63, %v1370_v42  ;;  %v3033_v9 = vsel %vm1030_vm14, %v1382_v17, %v3332_v57  ;;  %v1294_v46 = vsel %vm1284_vm11, %v1279_v23, 0.0  ;;  %v1302_v36 = vsel %vm1126_vm4, %v1300_v38, %v1301_v44 }
 0x89e   :  { %v1298_v33 = vadd.f32 %v1296_v41, %v1275_v34  ;;  %v1342_v34 = vmul.f32 %v1341_v55, %v1339_v0  ;;  %v1374_v62 = vsel %vm1003_vm3, %v3023_v37, 0.0  ;;  %v1366_v41 = vmul.f32 %v3331_v56, %v1363_v60 }
 0x89f   :  { %v3050_v0 = vsel %vm1062_vm12, %v1393_v32, %v3333_v39  ;;  %v1444_v60 = vadd.s32 5, %v2709_v61  ;;  %v1463_v56 = vadd.s32 6, %v2709_v61  ;;  %v1297_v57 = vmul.f32 %v1295_v14, %v1294_v46 }
 0x8a0   :  { %v1321_v35 = vadd.f32 %v1319_v19, %v1298_v33  ;;  %v1406_v33 = vperm.slane %v3011_v21, 0  ;;  %v1385_v19 = vsel %vm1035_vm2, %v3033_v9, 0.0  ;;  %v1325_v6 = vsel %vm1158_vm10, %v1323_v29, %v1324_v49 }
 0x8a1   :  { %vm3338_vm2 = vcmp.ge.s32.totalorder %v2720_v5, 0  ;;  %v1420_v44 = vperm.slane %v3011_v21, 2  ;;  %v1317_v39 = vsel %vm1307_vm8, %v1302_v36, 0.0  ;;  %vm1429_vm3 = vcmp.lt.s32.totalorder %v1425_v58, 8 }
 0x8a2   :  { %v1344_v53 = vadd.f32 %v1342_v34, %v1321_v35  ;;  %v1377_v34 = vmul.f32 %v1376_v15, %v1374_v62  ;;  %v1396_v38 = vsel %vm3338_vm2, %v3050_v0, 0.0  ;;  %v1388_v62 = vmul.f32 %v1387_v28, %v1385_v19 }
 0x8a3   :  { %v1349_v14 = vsel %vm1348_vm0, %v1346_v40, %v1347_v31  ;;  %vm3339_vm4 = vcmp.lt.s32.totalorder %v2754_v25, 8  ;;  %v1482_v5 = vadd.s32 7, %v2709_v61  ;;  %v1340_v49 = vsel %vm1330_vm13, %v1325_v6, 0.0 }
 0x8a4   :  { %v1368_v35 = vadd.f32 %v1366_v41, %v1344_v53  ;;  %v1403_v29 = vsel %vm3339_vm4, %v1279_v23, 0.0  ;;  %v1399_v41 = vmul.f32 %v1398_v45, %v1396_v38  ;;  %v1439_v19 = vperm.slane %v3011_v21, 3 }
 0x8a5   :  { %v1320_v40 = vmul.f32 %v1318_v47, %v1317_v39  ;;  %v1372_v61 = vsel %vm998_vm1, %v1370_v42, %v1371_v63  ;;  %vm3340_vm0 = vcmp.lt.s32.totalorder %v2751_v2, 8  ;;  %v1299_v7 = vadd.f32 %v1297_v57, %v1276_v48 }
 0x8a6   :  { %v1379_v53 = vadd.f32 %v1377_v34, %v1368_v35  ;;  %v1411_v25 = vsel %vm3340_vm0, %v1302_v36, 0.0  ;;  %v1364_v24 = vsel %vm1354_vm7, %v1349_v14, 0.0  ;;  %v1407_v23 = vmul.f32 %v1406_v33, %v1403_v29 }
 0x8a7   :  { %vm1448_vm8 = vcmp.lt.s32.totalorder %v1444_v60, 8  ;;  %v1343_v35 = vmul.f32 %v1341_v55, %v1340_v49  ;;  %v3341_v39 = vrot.slane %v2946_v18, 6  ;;  %vm3342_vm13 = vcmp.lt.s32.totalorder %v2808_v50, 8 }
 0x8a8   :  { %v1390_v46 = vadd.f32 %v1388_v62, %v1379_v53  ;;  %v1418_v42 = vsel %vm3342_vm13, %v1325_v6, 0.0  ;;  %v1322_v2 = vadd.f32 %v1320_v40, %v1299_v7  ;;  %vm3343_vm1 = vcmp.ge.s32.totalorder %v2757_v30, 0 }
 0x8a9   :  { %v1383_v47 = vsel %vm1030_vm14, %v3341_v39, %v1382_v17  ;;  %v1375_v57 = vsel %vm3343_vm1, %v1372_v61, 0.0  ;;  %v1414_v63 = vmul.f32 %v1413_v26, %v1411_v25  ;;  %v1458_v36 = vperm.slane %v3011_v21, 4 }
 0x8aa   :  { %v1401_v31 = vadd.f32 %v1399_v41, %v1390_v46  ;;  %v3344_v55 = vperm.slane %v2944_v3, 3  ;;  %v3345_v38 = vrot.slane %v2946_v18, 7  ;;  %v1437_v50 = vsel %vm1429_vm3, %v1349_v14, 0.0 }
 0x8ab   :  { %v1345_v6 = vadd.f32 %v1343_v35, %v1322_v2  ;;  %vm3346_vm14 = vcmp.ge.s32.totalorder %v2811_v27, 0  ;;  %v1421_v62 = vmul.f32 %v1420_v44, %v1418_v42  ;;  %vm1467_vm5 = vcmp.lt.s32.totalorder %v1463_v56, 8 }
 0x8ac   :  { %v1409_v52 = vadd.f32 %v1407_v23, %v1401_v31  ;;  %v1367_v34 = vmul.f32 %v3344_v55, %v1364_v24  ;;  %v1394_v17 = vsel %vm1062_vm12, %v3345_v38, %v1393_v32  ;;  %v1386_v30 = vsel %vm3346_vm14, %v1383_v47, 0.0 }
 0x8ad   :  { %v1378_v29 = vmul.f32 %v1376_v15, %v1375_v57  ;;  %v1456_v48 = vsel %vm1448_vm8, %v1372_v61, 0.0  ;;  %v1477_v49 = vperm.slane %v3011_v21, 5  ;;  %vm3347_vm6 = vcmp.ge.s32.totalorder %v2804_v13, 0 }
 0x8ae   :  { %v1416_v53 = vadd.f32 %v1414_v63, %v1409_v52  ;;  %v1369_v46 = vadd.f32 %v1367_v34, %v1345_v6  ;;  %v1397_v59 = vsel %vm3347_vm6, %v1394_v17, 0.0  ;;  %v1440_v58 = vmul.f32 %v1439_v19, %v1437_v50 }
 0x8af   :  { %vm1486_vm12 = vcmp.lt.s32.totalorder %v1482_v5, 8  ;;  %v1389_v27 = vmul.f32 %v1387_v28, %v1386_v30  ;;  %v1475_v14 = vsel %vm1467_vm5, %v1383_v47, 0.0  ;;  %v1426_v56 = vadd.s32 4, %v2730_v12 }
 0x8b0   :  { %v1423_v32 = vadd.f32 %v1421_v62, %v1416_v53  ;;  %v1380_v41 = vadd.f32 %v1378_v29, %v1369_v46  ;;  %v1459_v60 = vmul.f32 %v1458_v36, %v1456_v48  ;;  %v1496_v40 = vperm.slane %v3011_v21, 6 }
 0x8b1   :  { %vm3348_vm9 = vcmp.lt.s32.totalorder %v2840_v20, 8  ;;  %v1400_v61 = vmul.f32 %v1398_v45, %v1397_v59  ;;  %v1494_v25 = vsel %vm1486_vm12, %v1394_v17, 0.0  ;;  %v1445_v7 = vadd.s32 5, %v2730_v12  ;;  %v2220_v45 = vld [vmem:[%s3313_s2 + $0x8] ss:$0 sm:$0xff] }
 0x8b2   :  { %v1442_v15 = vadd.f32 %v1440_v58, %v1423_v32  ;;  %v1404_v13 = vsel %vm3348_vm9, %v2976_v51, 0.0  ;;  %v1391_v5 = vadd.f32 %v1389_v27, %v1380_v41  ;;  %v1478_v24 = vmul.f32 %v1477_v49, %v1475_v14  ;;  %v2099_v14 = vld [vmem:[%s3314_s3 + $0x138] sm:$0xf]  ;;  %v2171_v41 = vld [vmem:[%s3314_s3 + $0x13c] sm:$0xf0] }
 0x8b3   :  { %vm3349_vm10 = vcmp.lt.s32.totalorder %v2837_v8, 8  ;;  %v1408_v35 = vmul.f32 %v1406_v33, %v1404_v13  ;;  %vm1430_vm15 = vcmp.lt.s32.totalorder %v1426_v56, 8  ;;  %v1464_v20 = vadd.s32 6, %v2730_v12  ;;  %v2170_v56 = vld [vmem:[%s3314_s3 + $0x13c] sm:$0xf] }
 0x8b4   :  { %v1461_v28 = vadd.f32 %v1459_v60, %v1442_v15  ;;  %v1412_v31 = vsel %vm3349_vm10, %v2980_v22, 0.0  ;;  %v1402_v23 = vadd.f32 %v1400_v61, %v1391_v5  ;;  %v1497_v3 = vmul.f32 %v1496_v40, %v1494_v25  ;;  %v2101_v60 = vld [vmem:[%s3314_s3 + $0x140] sm:$0xf0]  ;;  %v2169_v13 = vld [vmem:[%s3314_s3 + $0x12c] sm:$0xf0] }
 0x8b5   :  { %vm3350_vm11 = vcmp.lt.s32.totalorder %v2843_v1, 8  ;;  %v1415_v8 = vmul.f32 %v1413_v26, %v1412_v31  ;;  %vm1449_vm7 = vcmp.lt.s32.totalorder %v1445_v7, 8  ;;  %v1483_v22 = vadd.s32 7, %v2730_v12  ;;  %v2168_v25 = vld [vmem:[%s3314_s3 + $0x12c] sm:$0xf] }
 0x8b6   :  { %v1480_v51 = vadd.f32 %v1478_v24, %v1461_v28  ;;  %v1419_v39 = vsel %vm3350_vm11, %v2998_v54, 0.0  ;;  %v1410_v47 = vadd.f32 %v1408_v35, %v1402_v23  ;;  %v1438_v42 = vsel %vm1430_vm15, %v3004_v4, 0.0  ;;  %v2093_v5 = vld [vmem:[%s3314_s3 + $0x130] sm:$0xf0] }
 0x8b7   :  { %v1422_v57 = vmul.f32 %v1420_v44, %v1419_v39  ;;  %vm1468_vm2 = vcmp.lt.s32.totalorder %v1464_v20, 8  ;;  %v1457_v63 = vsel %vm1449_vm7, %v3023_v37, 0.0  ;;  %v1441_v54 = vmul.f32 %v1439_v19, %v1438_v42 }
 0x8b8   :  { %v1499_v33 = vadd.f32 %v1497_v3, %v1480_v51  ;;  %v1417_v2 = vadd.f32 %v1415_v8, %v1410_v47  ;;  %vm1487_vm3 = vcmp.lt.s32.totalorder %v1483_v22, 8  ;;  %v1476_v12 = vsel %vm1468_vm2, %v3033_v9, 0.0 }
 0x8b9   :  { %v1460_v34 = vmul.f32 %v1458_v36, %v1457_v63  ;;  %vm3351_vm4 = vcmask 523264   ;;  %v1495_v4 = vsel %vm1487_vm3, %v3050_v0, 0.0  ;;  %v1479_v38 = vmul.f32 %v1477_v49, %v1476_v12 }
 0x8ba   :  { %v1502_v52 = vadd.f32 %v2220_v45, %v1499_v33  ;;  %v1424_v1 = vadd.f32 %v1422_v57, %v1417_v2  ;;  %v1498_v50 = vmul.f32 %v1496_v40, %v1495_v4  ;;  %vm3352_vm0 = vmmov %vm3351_vm4  ;;  %vm3353_vm8 = vcmask 261120   ;;  %v2091_v40 = vld [vmem:[%s3314_s3 + $0x128] sm:$0xf] }
 0x8bb   :  { %vm3354_vm13 = vmmov %vm3353_vm8  ;;  %v2100_v15 = vor.u32 %v2171_v41, %v2099_v14  ;;  %v2104_v61 = vor.u32 %v2170_v56, %v2101_v60  ;;  %v2092_v28 = vor.u32 %v2169_v13, %v2091_v40  ;;  %v2096_v31 = vor.u32 %v2168_v25, %v2093_v5  ;;  %v2179_v25 = vld [vmem:[%s3314_s3 + $0x1c4] sm:$0xf0] }
 0x8bc   :  { %v1504_v26 = vadd.f32 %v1502_v52, %v2946_v18  ;;  %v1443_v55 = vadd.f32 %v1441_v54, %v1424_v1  ;;  %v2221_v18 = vld [vmem:[%s3313_s2 + $0x9] ss:$0 sm:$0xff]  ;;  %vm3355_vm1 = vmmov %vm3353_vm8 }
 0x8bd   :  { %vm3356_vm14 = vmmov %vm3355_vm1  ;;  %1643 = vmatpush.bf16.msra.mxu3 %v2100_v15  ;;  %1658 = vmatpush.bf16.msra.mxu0 %v2104_v61  ;;  %v2143_v61 = vld [vmem:[%s3314_s3 + $0x1c0] sm:$0xf] }
 0x8be   :  { %2087 = vmatmul.msk.f32.vlgmr.msrb.gmra.mxu2 %vm3351_vm4, %v1504_v26  ;;  %v1462_v44 = vadd.f32 %v1460_v34, %v1443_v55  ;;  %vm3357_vm9 = vmmov %vm3355_vm1  ;;  %v2222_v55 = vld [vmem:[%s3313_s2 + $0xb] ss:$0 sm:$0xff]  ;;  %vm1677_vm4 = vcmask 15360  }
 0x8bf   :  { %vm3358_vm10 = vmmov %vm3355_vm1 }
 0x8c0   :  { %v1481_v17 = vadd.f32 %v1479_v38, %v1462_v44  ;;  %vm3359_vm2 = vmmov %vm3355_vm1 }
 0x8c1   :  { %1644 = vmatpush.bf16.msra.mxu3 %v2092_v28  ;;  %1659 = vmatpush.bf16.msra.mxu0 %v2096_v31  ;;  %vm3360_vm3 = vmmov %vm3355_vm1  ;;  %v2139_v28 = vld [vmem:[%s3314_s3 + $0x1b0] sm:$0xf] }
 0x8c2   :  { %v1500_v37 = vadd.f32 %v1498_v50, %v1481_v17 }
 0x8c4   :  { %v1503_v6 = vadd.f32 %v2220_v45, %v1500_v37 }
 0x8c6   :  { %v1505_v21 = vadd.f32 %v1503_v6, %v2960_v43 }
 0x8c8   :  { %2088 = vmatmul.msk.f32.gmra.mxu2 %vm3352_vm0, %v1505_v21  ;;  %vm1738_vm0 = vcmask 1040384  }
 0x941   :  { %v1555_v9 = vpop.f32.mrf.mxu2 }
 0x942   :  { %v1556_v19 = vadd.f32 %v2221_v18, %v1555_v9 }
 0x944   :  { %v3161_v36 = vadd.f32 %v1556_v19, %v2405_v11 }
 0x946   :  { %v1563_v0 = vsel %vm3353_vm8, %v3161_v36, 0.0 }
 0x947   :  { %1564 = vadd.xlane.f32.xlu0 %v1563_v0 }
 0x94b   :  { %v1558_v30 = vpop.f32.mrf.mxu2 }
 0x94c   :  { %v1559_v53 = vadd.f32 %v2221_v18, %v1558_v30 }
 0x94e   :  { %v3166_v62 = vadd.f32 %v1559_v53, %v2410_v16 }
 0x950   :  { %v1566_v43 = vsel %vm3354_vm13, %v3166_v62, 0.0 }
 0x951   :  { %1567 = vadd.xlane.f32.xlu2 %v1566_v43 }
 0x9ba   :  { %v1565_v29 = vpop.xlane.xlu0 %1564 }
 0x9bb   :  { %v1569_v48 = vmul.f32 %v1565_v29, %v2348_v10  ;;  %v1726_v29 = vld [vmem:[%s3314_s3 + $0x148] sm:$0x11] }
 0x9bd   :  { %v1571_v49 = vsub.f32 %v3161_v36, %v1569_v48  ;;  %v1728_v48 = vunpack.c.l.b16 %v1726_v29 }
 0x9bf   :  { %v1573_v11 = vmul.f32 %v1571_v49, %v1571_v49 }
 0x9c1   :  { %v1575_v46 = vsel %vm3355_vm1, %v1573_v11, 0.0  ;;  %v1730_v11 = vpack.c.b16 %v1728_v48, %v1728_v48  ;;  %v2115_v48 = vld [vmem:[%s3314_s3 + $0x150] sm:$0xf] }
 0x9c2   :  { %1576 = vadd.xlane.f32.xlu1 %v1575_v46 }
 0x9c4   :  { %v1568_v59 = vpop.xlane.xlu2 %1567 }
 0x9c5   :  { %v1570_v32 = vmul.f32 %v1568_v59, %v2348_v10  ;;  %v1740_v59 = vsel %vm1738_vm0, %v1730_v11, 0 }
 0x9c6   :  { %1752 = vmatpush.bf16.msrb.mxu3 %v1740_v59  ;;  %v2223_v59 = vld [vmem:[%s3313_s2 + $0xa] ss:$0 sm:$0xff] }
 0x9c7   :  { %v1572_v58 = vsub.f32 %v3166_v62, %v1570_v32 }
 0x9c9   :  { %v1574_v16 = vmul.f32 %v1572_v58, %v1572_v58 }
 0x9cb   :  { %v1578_v27 = vsel %vm3356_vm14, %v1574_v16, 0.0 }
 0x9cc   :  { %1579 = vadd.xlane.f32.xlu0 %v1578_v27 }
 0xa35   :  { %v1577_v7 = vpop.xlane.xlu1 %1576 }
 0xa36   :  { %v1581_v24 = vmul.f32 %v1577_v7, %v2348_v10  ;;  %v2144_v7 = vor.u32 %v2179_v25, %v2143_v61 }
 0xa38   :  { %v1583_v23 = vadd.f32 1e-05, %v1581_v24  ;;  %v2178_v24 = vld [vmem:[%s3314_s3 + $0x1b4] sm:$0xf0]  ;;  %1841 = vmatpush.bf16.msrb.mxu1 %v2144_v7 }
 0xa3a   :  { %2276 = vrsqrt.f32 %v1583_v23  ;;  %vm1591_vm6 = vweird.f32 %v1583_v23 }
 0xa3f   :  { %v1580_v20 = vpop.xlane.xlu0 %1579 }
 0xa40   :  { %v2277_v35 = vpop.eup %2276  ;;  %v1582_v3 = vmul.f32 %v1580_v20, %v2348_v10  ;;  %v2140_v20 = vor.u32 %v2178_v24, %v2139_v28 }
 0xa41   :  { %v1586_v51 = vmul.f32 %v2277_v35, %v1583_v23  ;;  %vm1592_vm5 = vweird.f32 %v2277_v35 }
 0xa42   :  { %v1584_v39 = vadd.f32 1e-05, %v1582_v3  ;;  %vm1593_vm12 = vmor %vm1591_vm6, %vm1592_vm5  ;;  %v2135_v3 = vld [vmem:[%s3314_s3 + $0x1a0] sm:$0xf]  ;;  %1842 = vmatpush.bf16.msrb.mxu1 %v2140_v20 }
 0xa43   :  { %v1587_v45 = vmul.f32 %v2277_v35, %v1586_v51 }
 0xa44   :  { %2278 = vrsqrt.f32 %v1584_v39  ;;  %vm1601_vm11 = vweird.f32 %v1584_v39 }
 0xa45   :  { %v1588_v47 = vmul.f32 0.5, %v1587_v45  ;;  %v2177_v45 = vld [vmem:[%s3314_s3 + $0x1a4] sm:$0xf0] }
 0xa47   :  { %v1589_v8 = vsub.f32 1.5, %v1588_v47 }
 0xa49   :  { %v1590_v22 = vmul.f32 %v2277_v35, %v1589_v8  ;;  %v2136_v8 = vor.u32 %v2177_v45, %v2135_v3 }
 0xa4a   :  { %v2279_v33 = vpop.eup %2278 }
 0xa4b   :  { %v1594_v42 = vsel %vm1593_vm12, %v2277_v35, %v1590_v22  ;;  %v1596_v57 = vmul.f32 %v2279_v33, %v1584_v39  ;;  %vm1602_vm15 = vweird.f32 %v2279_v33  ;;  %1843 = vmatpush.bf16.msrb.mxu1 %v2136_v8 }
 0xa4c   :  { %v1605_v2 = vmul.f32 %v1594_v42, %v1571_v49  ;;  %vm1603_vm7 = vmor %vm1601_vm11, %vm1602_vm15  ;;  %v1729_v49 = vunpack.c.h.b16 %v1726_v29  ;;  %v2131_v42 = vld [vmem:[%s3314_s3 + $0x190] sm:$0xf] }
 0xa4d   :  { %v1597_v52 = vmul.f32 %v2279_v33, %v1596_v57  ;;  %vm3362_vm15 = vmmov %vm3359_vm2 }
 0xa4e   :  { %2105 = vmatmul.msk.f32.vlgmr.msra.gmra.mxu3 %vm3357_vm9, %v1605_v2  ;;  %2107 = vmatmul.msk.f32.vlgmr.msra.gmra.mxu0 %vm3358_vm10, %v1605_v2  ;;  %v1731_v46 = vpack.c.b16 %v1729_v49, %v1729_v49  ;;  %v2176_v2 = vld [vmem:[%s3314_s3 + $0x194] sm:$0xf0]  ;;  %vm3361_vm10 = vmmov %vm3359_vm2 }
 0xa4f   :  { %v1598_v63 = vmul.f32 0.5, %v1597_v52  ;;  %v2172_v49 = vld [vmem:[%s3314_s3 + $0x154] sm:$0xf0]  ;;  %vm3363_vm11 = vmmov %vm3359_vm2 }
 0xa50   :  { %v1743_v32 = vsel %vm1738_vm0, %v1731_v46, 0  ;;  %v2116_v11 = vor.u32 %v2172_v49, %v2115_v48 }
 0xa51   :  { %v1599_v1 = vsub.f32 1.5, %v1598_v63  ;;  %1767 = vmatpush.bf16.msrb.mxu0 %v1743_v32  ;;  %v2132_v63 = vor.u32 %v2176_v2, %v2131_v42 }
 0xa53   :  { %v1600_v54 = vmul.f32 %v2279_v33, %v1599_v1  ;;  %1844 = vmatpush.bf16.msrb.mxu1 %v2132_v63 }
 0xa55   :  { %v1604_v26 = vsel %vm1603_vm7, %v2279_v33, %v1600_v54  ;;  %v2127_v54 = vld [vmem:[%s3314_s3 + $0x180] sm:$0xf]  ;;  %vm3364_vm7 = vmmov %vm3359_vm2 }
 0xa56   :  { %v1606_v12 = vmul.f32 %v1604_v26, %v1572_v58  ;;  %v2175_v26 = vld [vmem:[%s3314_s3 + $0x184] sm:$0xf0] }
 0xa58   :  { %2106 = vmatmul.msk.f32.gmra.mxu3 %vm3359_vm2, %v1606_v12  ;;  %2108 = vmatmul.msk.f32.gmra.mxu0 %vm3360_vm3, %v1606_v12 }
 0xacb   :  { %v1661_v34 = vpop.f32.mrf.mxu0 }
 0xacc   :  { %v1675_v4 = vadd.f32 %v2222_v55, %v1661_v34  ;;  %v2128_v34 = vor.u32 %v2175_v26, %v2127_v54 }
 0xace   :  { %v1678_v44 = vsel %vm1677_vm4, %v1675_v4, -inf  ;;  %1845 = vmatpush.bf16.msrb.mxu1 %v2128_v34 }
 0xacf   :  { %1679 = vmax.xlane.f32.xlu2 %v1678_v44 }
 0xad1   :  { %v1646_v46 = vpop.f32.mrf.mxu3 }
 0xad5   :  { %v1664_v38 = vpop.f32.mrf.mxu0 }
 0xad6   :  { %v1676_v17 = vadd.f32 %v2222_v55, %v1664_v38  ;;  %v2123_v38 = vld [vmem:[%s3314_s3 + $0x170] sm:$0xf] }
 0xad8   :  { %v1681_v50 = vsel %vm1677_vm4, %v1676_v17, -inf }
 0xad9   :  { %1682 = vmax.xlane.f32.xlu1 %v1681_v50 }
 0xadb   :  { %v1649_v32 = vpop.f32.mrf.mxu3 }
 0xb42   :  { %v1680_v37 = vpop.xlane.xlu2 %1679 }
 0xb43   :  { %v1684_v6 = vsub.f32 %v1675_v4, %v1680_v37 }
 0xb45   :  { %v1686_v21 = vmul.f32 1.442695, %v1684_v6 }
 0xb47   :  { %2280 = vpow2.f32 %v1686_v21 }
 0xb4c   :  { %v1683_v9 = vpop.xlane.xlu1 %1682 }
 0xb4d   :  { %v2281_v18 = vpop.eup %2280  ;;  %v1685_v19 = vsub.f32 %v1676_v17, %v1683_v9  ;;  %v2174_v17 = vld [vmem:[%s3314_s3 + $0x174] sm:$0xf0] }
 0xb4e   :  { %v1690_v0 = vsel %vm1677_vm4, %v2281_v18, 0.0  ;;  %v2124_v6 = vor.u32 %v2174_v17, %v2123_v38 }
 0xb4f   :  { %1691 = vadd.xlane.f32.xlu0 %v1690_v0  ;;  %v1688_v30 = vmul.f32 1.442695, %v1685_v19 }
 0xb50   :  { %1846 = vmatpush.bf16.msrb.mxu1 %v2124_v6 }
 0xb51   :  { %2282 = vpow2.f32 %v1688_v30 }
 0xb57   :  { %v3212_v53 = vpop.eup %2282 }
 0xb58   :  { %v1693_v43 = vsel %vm1677_vm4, %v3212_v53, 0.0 }
 0xb59   :  { %1694 = vadd.xlane.f32.xlu2 %v1693_v43  ;;  %v2173_v43 = vld [vmem:[%s3314_s3 + $0x164] sm:$0xf0] }
 0xbc2   :  { %v1692_v58 = vpop.xlane.xlu0 %1691 }
 0xbc3   :  { %2284 = vrcp.f32 %v1692_v58  ;;  %v1707_v41 = vand.u32 2147483648, %v1692_v58  ;;  %v1705_v60 = vand.u32 2147483647, %v1692_v58  ;;  %vm1701_vm13 = vweird.f32 %v1692_v58 }
 0xbc5   :  { %v1708_v13 = vor.u32 1.1754944e-38, %v1707_v41  ;;  %vm1706_vm14 = vcmp.eq.f32.partialorder %v1705_v60, 8.507059e+37  ;;  %v1670_v41 = vadd.f32 %v2223_v59, %v1649_v32 }
 0xbc9   :  { %v2285_v16 = vpop.eup %2284 }
 0xbca   :  { %v1697_v27 = vmul.f32 %v2285_v16, %v1692_v58  ;;  %vm1702_vm8 = vweird.f32 %v2285_v16  ;;  %v1669_v58 = vadd.f32 %v2223_v59, %v1646_v46 }
 0xbcb   :  { %vm1703_vm1 = vmor %vm1701_vm13, %vm1702_vm8 }
 0xbcc   :  { %v1698_v14 = vsub.f32 1.0, %v1697_v27  ;;  %v1695_v56 = vpop.xlane.xlu2 %1694 }
 0xbcd   :  { %2286 = vrcp.f32 %v1695_v56  ;;  %v1722_v47 = vand.u32 2147483648, %v1695_v56  ;;  %v1720_v33 = vand.u32 2147483647, %v1695_v56  ;;  %vm1716_vm6 = vweird.f32 %v1695_v56 }
 0xbce   :  { %v1699_v15 = vmul.f32 %v2285_v16, %v1698_v14 }
 0xbcf   :  { %v1723_v52 = vor.u32 1.1754944e-38, %v1722_v47  ;;  %vm1721_vm9 = vcmp.eq.f32.partialorder %v1720_v33, 8.507059e+37 }
 0xbd0   :  { %v1700_v40 = vadd.f32 %v2285_v16, %v1699_v15 }
 0xbd2   :  { %v1704_v5 = vsel %vm1703_vm1, %v2285_v16, %v1700_v40  ;;  %v1671_v16 = vmax.f32 %v1669_v58, 0.0  ;;  %vm3365_vm1 = vcmask 130048  }
 0xbd3   :  { %v1709_v31 = vsel %vm1706_vm14, %v1708_v13, %v1704_v5  ;;  %v2287_v23 = vpop.eup %2286  ;;  %vm3366_vm14 = vmmov %vm3364_vm7 }
 0xbd4   :  { %v1710_v35 = vmul.f32 %v2281_v18, %v1709_v31  ;;  %v1712_v51 = vmul.f32 %v2287_v23, %v1695_v56  ;;  %vm1717_vm5 = vweird.f32 %v2287_v23  ;;  %v1672_v56 = vmax.f32 %v1670_v41, 0.0 }
 0xbd5   :  { %vm1718_vm12 = vmor %vm1716_vm6, %vm1717_vm5  ;;  %vm1959_vm5 = vcmask 785408   ;;  %vm3367_vm6 = vcmask 523264  }
 0xbd6   :  { %2109 = vmatmul.msk.f32.vlgmr.msrb.gmra.mxu3 %vm1677_vm4, %v1710_v35  ;;  %2111 = vmatmul.msk.f32.vlgmr.msrb.gmra.mxu0 %vm1677_vm4, %v1710_v35  ;;  %v1713_v39 = vsub.f32 1.0, %v1712_v51  ;;  %v1962_v4 = vsel %vm1677_vm4, %v1710_v35, 0.0 }
 0xbd8   :  { %v1714_v22 = vmul.f32 %v2287_v23, %v1713_v39 }
 0xbda   :  { %v1715_v57 = vadd.f32 %v2287_v23, %v1714_v22 }
 0xbdc   :  { %v1719_v1 = vsel %vm1718_vm12, %v2287_v23, %v1715_v57 }
 0xbdd   :  { %v1724_v12 = vsel %vm1721_vm9, %v1723_v52, %v1719_v1 }
 0xbde   :  { %v1725_v55 = vmul.f32 %v3212_v53, %v1724_v12  ;;  %v2119_v53 = vld [vmem:[%s3314_s3 + $0x160] sm:$0xf] }
 0xbdf   :  { %v2120_v29 = vor.u32 %v2173_v43, %v2119_v53  ;;  %v2147_v43 = vld [vmem:[%s3314_s3 + $0x1d0] sm:$0xf] }
 0xbe0   :  { %2110 = vmatmul.msk.f32.gmra.mxu3 %vm1677_vm4, %v1725_v55  ;;  %v1963_v44 = vsel %vm1677_vm4, %v1725_v55, 0.0  ;;  %2112 = vmatmul.msk.f32.gmra.mxu0 %vm1677_vm4, %v1725_v55 }
 0xbe1   :  { %v1964_v50 = vadd.f32 %v1963_v44, %v1962_v4  ;;  %1847 = vmatpush.bf16.msrb.mxu1 %v2120_v29  ;;  %v2180_v29 = vld [vmem:[%s3314_s3 + $0x1d4] sm:$0xf0] }
 0xbe2   :  { %v2148_v49 = vor.u32 %v2180_v29, %v2147_v43 }
 0xbe3   :  { %v1965_v37 = vrot.slane %v1964_v50, 4 }
 0xbe5   :  { %v1966_v21 = vadd.f32 %v1965_v37, %v1964_v50  ;;  %1848 = vmatpush.bf16.msrb.mxu1 %v2116_v11 }
 0xbe7   :  { %v1967_v18 = vrot.slane %v1966_v21, 2 }
 0xbe9   :  { %v1968_v9 = vadd.f32 %v1967_v18, %v1966_v21 }
 0xbeb   :  { %v1969_v19 = vrot.slane %v1968_v9, 1 }
 0xbed   :  { %v1970_v0 = vadd.f32 %v1969_v19, %v1968_v9 }
 0xbef   :  { %v1971_v30 = vsel %vm1677_vm4, %v1970_v0, 0.0 }
 0xbf0   :  { %1972 = vst [vmem:[%s3316_s5] sm:$0x1] %v1971_v30  ;;  %v2225_v30 = vld [vmem:[%s3313_s2 + $0xd] ss:$0 sm:$0xff] }
 0xc53   :  { %v1769_v40 = vpop.f32.mrf.mxu0 }
 0xc59   :  { %v1754_v27 = vpop.f32.mrf.mxu3 }
 0xc5a   :  { %v1775_v14 = vmul.f32 %v1754_v27, %v1671_v16 }
 0xc5c   :  { %1849 = vmatmul.f32.vlgmr.msrb.gmra.mxu1 %v1775_v14 }
 0xc5d   :  { %v1772_v28 = vpop.f32.mrf.mxu0 }
 0xc63   :  { %v1757_v15 = vpop.f32.mrf.mxu3 }
 0xc64   :  { %v1776_v60 = vmul.f32 %v1757_v15, %v1672_v56 }
 0xc66   :  { %1852 = vmatmul.f32.gmra.mxu1 %v1776_v60 }
 0xcd9   :  { %v1850_v13 = vpop.f32.mrf.mxu1 }
 0xcda   :  { %v1851_v61 = vadd.f32 %v1850_v13, %v1769_v40 }
 0xcdc   :  { %v1856_v25 = vmul.f32 0.5, %v1851_v61 }
 0xcde   :  { %v1858_v5 = vadd.f32 %v1856_v25, %v3161_v36 }
 0xce0   :  { %v1862_v7 = vsel %vm3361_vm10, %v1858_v5, 0.0 }
 0xce1   :  { %1863 = vadd.xlane.f32.xlu0 %v1862_v7 }
 0xce3   :  { %v1853_v24 = vpop.f32.mrf.mxu1 }
 0xce4   :  { %v1854_v31 = vadd.f32 %v1853_v24, %v1772_v28 }
 0xce6   :  { %v1857_v23 = vmul.f32 0.5, %v1854_v31 }
 0xce8   :  { %v1859_v35 = vadd.f32 %v1857_v23, %v3166_v62 }
 0xcea   :  { %v1865_v20 = vsel %vm3362_vm15, %v1859_v35, 0.0 }
 0xceb   :  { %1866 = vadd.xlane.f32.xlu1 %v1865_v20 }
 0xd54   :  { %v1864_v51 = vpop.xlane.xlu0 %1863 }
 0xd55   :  { %v1868_v3 = vmul.f32 %v1864_v51, %v2348_v10 }
 0xd57   :  { %v1870_v45 = vsub.f32 %v1858_v5, %v1868_v3 }
 0xd59   :  { %v1872_v39 = vmul.f32 %v1870_v45, %v1870_v45 }
 0xd5b   :  { %v1874_v47 = vsel %vm3363_vm11, %v1872_v39, 0.0 }
 0xd5c   :  { %1875 = vadd.xlane.f32.xlu1 %v1874_v47 }
 0xd5e   :  { %v1867_v36 = vpop.xlane.xlu1 %1866 }
 0xd5f   :  { %v1869_v8 = vmul.f32 %v1867_v36, %v2348_v10 }
 0xd61   :  { %v1871_v22 = vsub.f32 %v1859_v35, %v1869_v8 }
 0xd63   :  { %v1873_v33 = vmul.f32 %v1871_v22, %v1871_v22 }
 0xd65   :  { %v1877_v42 = vsel %vm3364_vm7, %v1873_v33, 0.0 }
 0xd66   :  { %1878 = vadd.xlane.f32.xlu2 %v1877_v42 }
 0xdcf   :  { %v1876_v62 = vpop.xlane.xlu1 %1875 }
 0xdd0   :  { %v1880_v2 = vmul.f32 %v1876_v62, %v2348_v10 }
 0xdd2   :  { %v1882_v57 = vadd.f32 1e-05, %v1880_v2 }
 0xdd4   :  { %2288 = vrsqrt.f32 %v1882_v57  ;;  %vm1890_vm3 = vweird.f32 %v1882_v57 }
 0xdd9   :  { %v1879_v63 = vpop.xlane.xlu2 %1878 }
 0xdda   :  { %v2289_v52 = vpop.eup %2288  ;;  %v1881_v54 = vmul.f32 %v1879_v63, %v2348_v10  ;;  %v2224_v10 = vld [vmem:[%s3313_s2 + $0xc] ss:$0 sm:$0xff] }
 0xddb   :  { %v1885_v1 = vmul.f32 %v2289_v52, %v1882_v57  ;;  %vm1891_vm2 = vweird.f32 %v2289_v52 }
 0xddc   :  { %v1883_v12 = vadd.f32 1e-05, %v1881_v54  ;;  %vm1892_vm4 = vmor %vm1890_vm3, %vm1891_vm2 }
 0xddd   :  { %v1886_v26 = vmul.f32 %v2289_v52, %v1885_v1 }
 0xdde   :  { %2290 = vrsqrt.f32 %v1883_v12  ;;  %vm1900_vm8 = vweird.f32 %v1883_v12 }
 0xddf   :  { %v1887_v55 = vmul.f32 0.5, %v1886_v26 }
 0xde1   :  { %v1888_v34 = vsub.f32 1.5, %v1887_v55 }
 0xde3   :  { %v1889_v38 = vmul.f32 %v2289_v52, %v1888_v34 }
 0xde4   :  { %v2291_v4 = vpop.eup %2290 }
 0xde5   :  { %v1895_v44 = vmul.f32 %v2291_v4, %v1883_v12  ;;  %v1893_v37 = vsel %vm1892_vm4, %v2289_v52, %v1889_v38  ;;  %vm1901_vm0 = vweird.f32 %v2291_v4 }
 0xde6   :  { %vm1902_vm13 = vmor %vm1900_vm8, %vm1901_vm0  ;;  %v1904_v18 = vmul.f32 %v1893_v37, %v1870_v45 }
 0xde7   :  { %v1896_v17 = vmul.f32 %v2291_v4, %v1895_v44 }
 0xde8   :  { %v1907_v53 = vmul.f32 %v2224_v10, %v1904_v18 }
 0xde9   :  { %v1897_v50 = vmul.f32 0.5, %v1896_v17 }
 0xdea   :  { %v1910_v11 = vadd.f32 %v2225_v30, %v1907_v53 }
 0xdeb   :  { %v1898_v6 = vsub.f32 1.5, %v1897_v50 }
 0xded   :  { %v1899_v21 = vmul.f32 %v2291_v4, %v1898_v6 }
 0xdef   :  { %v1903_v9 = vsel %vm1902_vm13, %v2291_v4, %v1899_v21 }
 0xdf0   :  { %v1905_v19 = vmul.f32 %v1903_v9, %v1871_v22 }
 0xdf2   :  { %v1908_v0 = vmul.f32 %v2224_v10, %v1905_v19 }
 0xdf4   :  { %v1911_v48 = vadd.f32 %v2225_v30, %v1908_v0 }
 0xdf6   :  { %1936 = vmatpush.msra.mxu2 %v1911_v48 }
 0xdf8   :  { %1937 = vmatpush.msra.mxu2 %v1910_v11 }
 0xdf9   :  { %2149 = vmatmul.msk.bf16.vlgmr.msra.gmra.mxu2 %vm3365_vm1, %v2148_v49 }
 0xe7c   :  { %v1939_v46 = vpop.f32.mrf.mxu2 }
 0xe7d   :  { %v1945_v59 = vrot.slane %v1939_v46, 4 }
 0xe7f   :  { %1946 = vrot.lane.b32.xlu0 %v1945_v59, %s2297_s23 }
 0xe84   :  { %v1941_v32 = vpop.f32.mrf.mxu2 }
 0xe85   :  { %v1953_v58 = vrot.slane %v1941_v32, 4  ;;  %1950 = vrot.lane.b32.xlu2 %v1941_v32, %s2298_s24 }
 0xe87   :  { %1954 = vrot.lane.b32.xlu1 %v1953_v58, %s2296_s19 }
 0xedf   :  { %v1951_v14 = vpop.permute.xlu2 %1950 }
 0xef1   :  { %v1947_v16 = vpop.permute.xlu0 %1946 }
 0xef2   :  { %v1957_v27 = vsel %vm3366_vm14, %v1939_v46, %v1947_v16 }
 0xef3   :  { %v1958_v41 = vsel %vm3367_vm6, %v1957_v27, %v1951_v14 }
 0xef9   :  { %v1955_v56 = vpop.permute.xlu1 %1954 }
 0xefa   :  { %v1960_v15 = vsel %vm1959_vm5, %v1958_v41, %v1955_v56 }
 0xefb   :  { %1961 = vst [vmem:[%s3317_s4] sm:$0xf] %v1960_v15 }

</bundles_post_ra>
